<compile_context>
chip_gen: v7x
topology: tpu7x:2x2x1
jax: 0.10.0
libtpu: 0.0.40
codegen_flags: <defaults>
</compile_context>

<pallas_src>
import jax
import jax.numpy as jnp
from jax.experimental import pallas as pl
from jax.experimental.pallas import tpu as pltpu


LATENT_DIM = 16
HIDDEN = 512
STYLE_DIM = 64
NUM_DOMAINS = 2


# ------------------------------- kernel -----------------------------------

def _mapping_kernel(z_ref, w_in_ref, b_sh_ref, w_sh_ref, s_sh_ref,
                    w_u1_ref, s_u1_ref, b_u1_ref,
                    w_ur_ref, s_ur_ref, b_ur_ref,
                    w_out_ref, b_out_ref, out_ref):
    f32 = jnp.float32
    bf16 = jnp.bfloat16

    def lin(x, w, b):
        # bf16 operands on the MXU, f32 accumulation, bias add in f32.
        return jnp.dot(x, w, preferred_element_type=f32) + b

    def lin_q(x, w_i8, s, b):
        # int8 weight (exact in bf16) on the MXU; per-output-channel dequant
        # scale folded into the f32 bias-add.
        acc = jnp.dot(x, w_i8.astype(bf16), preferred_element_type=f32)
        return acc * s + b

    def relu_bf16(x):
        return jnp.maximum(x, 0.0).astype(bf16)

    # ---- shared trunk: Linear+ReLU x 4 ----
    h = relu_bf16(lin(z_ref[...].astype(bf16), w_in_ref[...], b_sh_ref[0]))
    for l in range(3):
        h = relu_bf16(lin_q(h, w_sh_ref[l], s_sh_ref[l], b_sh_ref[l + 1]))

    # ---- first unshared layer of all domains fused: (TB,512)x(512,D*512) ----
    h1 = relu_bf16(lin_q(h, w_u1_ref[...], s_u1_ref[0], b_u1_ref[0]))

    # ---- remaining unshared layers per domain; concat into one 128-lane slab
    outs = []
    for d in range(NUM_DOMAINS):                       # static unroll
        hd = h1[:, d * HIDDEN:(d + 1) * HIDDEN]
        for l in range(2):
            idx = d * 2 + l
            hd = relu_bf16(lin_q(hd, w_ur_ref[idx], s_ur_ref[idx],
                                 b_ur_ref[idx]))
        outs.append(lin(hd, w_out_ref[d], b_out_ref[d]))   # final Linear, no ReLU
    out_ref[...] = jnp.concatenate(outs, axis=-1)          # (TB, D*STYLE) lane-dense


# ------------------------------- wrapper -----------------------------------

def _round_up(x, m):
    return (x + m - 1) // m * m


def _pick_tile(B):
    """Adaptive batch tile: one step for small B, limited padding for big B."""
    if B <= 1024:
        return _round_up(B, 8)                 # single grid step
    for tb in (1024, 512, 256, 128):           # keep padding under ~12.5%
        if (_round_up(B, tb) - B) * 8 <= B:
            return tb
    return 128


def _const_spec(shape):
    nd = len(shape)
    return pl.BlockSpec(shape, lambda i, _n=nd: (0,) * _n)   # resident across grid


def _nbytes(a):
    return int(a.size) * a.dtype.itemsize


def mapping_network(z, y, params):
    """z: (B, latent_dim) f32, y: (B,) int32 -> (B, style_dim) f32."""
    B = z.shape[0]
    TB = _pick_tile(B)
    B_pad = _round_up(B, TB)
    z_pad = jnp.pad(z, ((0, B_pad - B), (0, 0))) if B_pad != B else z

    (w_in, b_sh, w_sh, s_sh, w_u1, s_u1, b_u1,
     w_ur, s_ur, b_ur, w_out, b_out) = params
    out_width = NUM_DOMAINS * STYLE_DIM                 # 128 lanes -> dense stores
    num_steps = B_pad // TB

    in_specs = [pl.BlockSpec((TB, LATENT_DIM), lambda i: (i, 0))]
    in_specs += [_const_spec(p.shape) for p in params]

    # Only shard the batch across TensorCores when the call is multi-step and
    # big enough to be compute-bound; otherwise each core would re-DMA the
    # full weight set right where the kernel is weight-HBM-bound.
    dims = ("parallel",) if (num_steps >= 2 and B_pad >= 2048) else ("arbitrary",)

    flops = 2 * B_pad * (LATENT_DIM * HIDDEN
                         + 3 * HIDDEN * HIDDEN
                         + NUM_DOMAINS * 3 * HIDDEN * HIDDEN
                         + NUM_DOMAINS * HIDDEN * STYLE_DIM)
    bytes_accessed = (sum(_nbytes(p) for p in params)
                      + _nbytes(z_pad) + B_pad * out_width * 4)
    cost = pl.CostEstimate(flops=int(flops), transcendentals=0,
                           bytes_accessed=int(bytes_accessed))

    out_slab = pl.pallas_call(
        _mapping_kernel,
        out_shape=jax.ShapeDtypeStruct((B_pad, out_width), jnp.float32),
        grid=(num_steps,),
        in_specs=in_specs,
        out_specs=pl.BlockSpec((TB, out_width), lambda i: (i, 0)),
        compiler_params=pltpu.CompilerParams(
            dimension_semantics=dims,
            vmem_limit_bytes=32 * 1024 * 1024,          # valid on v5e/v6e/v7x
        ),
        cost_estimate=cost,
    )(z_pad, *params)

    # Per-sample domain selection (matches PyTorch out[idx, y]) in the wrapper.
    out = out_slab[:B].reshape(B, NUM_DOMAINS, STYLE_DIM)
    return jnp.take_along_axis(out, y[:, None, None], axis=1)[:, 0, :]


# ------------------------- parameter construction -------------------------

def _init_linear(key, fan_in, fan_out):
    """PyTorch-default-style init: U(-1/sqrt(fan_in), 1/sqrt(fan_in))."""
    kw, kb = jax.random.split(key)
    bound = 1.0 / float(fan_in) ** 0.5
    w = jax.random.uniform(kw, (fan_in, fan_out), jnp.float32, -bound, bound)
    b = jax.random.uniform(kb, (fan_out,), jnp.float32, -bound, bound)
    return w, b


def _quantize_per_col(w):
    """Symmetric int8 quantization with one scale per output channel."""
    amax = jnp.max(jnp.abs(w), axis=0)
    scale = jnp.where(amax > 0, amax / 127.0, 1.0).astype(jnp.float32)
    q = jnp.clip(jnp.round(w / scale), -127, 127).astype(jnp.int8)
    return q, scale


def make_params(key):
    keys = jax.random.split(key, 4 + NUM_DOMAINS * 4)

    # shared: Linear(latent,512) + 3 x Linear(512,512)
    w_in, b0 = _init_linear(keys[0], LATENT_DIM, HIDDEN)
    sh_w, sh_b = [], [b0]
    for l in range(3):
        w, b = _init_linear(keys[1 + l], HIDDEN, HIDDEN)
        sh_w.append(w)
        sh_b.append(b)

    # unshared: per domain, 3 x Linear(512,512) + Linear(512, style_dim)
    u1_w, u1_b = [], []                 # first unshared layer (fused over domains)
    ur_w, ur_b = [], []                 # remaining two unshared 512x512 layers
    out_w, out_b = [], []
    for d in range(NUM_DOMAINS):
        w, b = _init_linear(keys[4 + d * 4 + 0], HIDDEN, HIDDEN)
        u1_w.append(w)
        u1_b.append(b)
        for l in range(1, 3):
            w, b = _init_linear(keys[4 + d * 4 + l], HIDDEN, HIDDEN)
            ur_w.append(w)
            ur_b.append(b)
        w, b = _init_linear(keys[4 + d * 4 + 3], HIDDEN, STYLE_DIM)
        out_w.append(w)
        out_b.append(b)

    # int8 + per-output-channel scale for every 512-wide hidden layer
    w_sh_q, s_sh = zip(*[_quantize_per_col(w) for w in sh_w])
    w_u1_q, s_u1 = _quantize_per_col(jnp.concatenate(u1_w, axis=1))
    w_ur_q, s_ur = zip(*[_quantize_per_col(w) for w in ur_w])

    bf16 = jnp.bfloat16
    return (
        w_in.astype(bf16),                        # (16, 512)            bf16
        jnp.stack(sh_b, 0),                       # (4, 512)             f32
        jnp.stack(w_sh_q, 0),                     # (3, 512, 512)        int8
        jnp.stack(s_sh, 0),                       # (3, 512)             f32
        w_u1_q,                                   # (512, D*512)         int8
        s_u1[None, :],                            # (1, D*512)           f32
        jnp.concatenate(u1_b, 0)[None, :],        # (1, D*512)           f32
        jnp.stack(w_ur_q, 0),                     # (D*2, 512, 512)      int8
        jnp.stack(s_ur, 0),                       # (D*2, 512)           f32
        jnp.stack(ur_b, 0),                       # (D*2, 512)           f32
        jnp.stack(out_w, 0).astype(bf16),         # (D, 512, 64)         bf16
        jnp.stack(out_b, 0),                      # (D, 64)              f32
    )


# ------------------------------ reference ---------------------------------

def mapping_network_ref(z, y, params):
    """Plain-JAX reference using the exact same quantized-weight math."""
    (w_in, b_sh, w_sh, s_sh, w_u1, s_u1, b_u1,
     w_ur, s_ur, b_ur, w_out, b_out) = params
    bf16 = jnp.bfloat16
    f32 = jnp.float32

    def lin(x, w, b):
        return jnp.dot(x, w, preferred_element_type=f32) + b

    def lin_q(x, w_i8, s, b):
        return jnp.dot(x, w_i8.astype(bf16), preferred_element_type=f32) * s + b

    def relu_bf16(x):
        return jnp.maximum(x, 0.0).astype(bf16)

    h = relu_bf16(lin(z.astype(bf16), w_in, b_sh[0]))
    for l in range(3):
        h = relu_bf16(lin_q(h, w_sh[l], s_sh[l], b_sh[l + 1]))
    h1 = relu_bf16(lin_q(h, w_u1, s_u1[0], b_u1[0]))
    outs = []
    for d in range(NUM_DOMAINS):
        hd = h1[:, d * HIDDEN:(d + 1) * HIDDEN]
        for l in range(2):
            idx = d * 2 + l
            hd = relu_bf16(lin_q(hd, w_ur[idx], s_ur[idx], b_ur[idx]))
        outs.append(lin(hd, w_out[d], b_out[d]))
    out = jnp.stack(outs, axis=1)                 # (B, D, style)
    return out[jnp.arange(z.shape[0]), y]         # (B, style)


if __name__ == "__main__":
    key = jax.random.PRNGKey(0)
    kp, kz, ky = jax.random.split(key, 3)

    B = 2
    params = make_params(kp)
    z = jax.random.normal(kz, (B, LATENT_DIM), jnp.float32)
    y = jax.random.randint(ky, (B,), 0, NUM_DOMAINS, jnp.int32)

    s = mapping_network(z, y, params)
    s = jax.block_until_ready(s)

    s_ref = mapping_network_ref(z, y, params)
    assert s.shape == (B, STYLE_DIM)
    err = float(jnp.max(jnp.abs(s - s_ref)))
    assert jnp.allclose(s, s_ref, atol=2e-3, rtol=2e-3), f"max abs err = {err}"

    print("KERNEL_OK")
</pallas_src>

<mosaic_0001>
module attributes {stable_mosaic.version = 11 : i64} {
  func.func @_mapping_kernel(%arg0: i32, %arg1: memref<8x16xf32, #tpu.memory_space<vmem>>, %arg2: memref<16x512xbf16, #tpu.memory_space<vmem>>, %arg3: memref<4x512xf32, #tpu.memory_space<vmem>>, %arg4: memref<3x512x512xi8, #tpu.memory_space<vmem>>, %arg5: memref<3x512xf32, #tpu.memory_space<vmem>>, %arg6: memref<512x1024xi8, #tpu.memory_space<vmem>>, %arg7: memref<1x1024xf32, #tpu.memory_space<vmem>>, %arg8: memref<1x1024xf32, #tpu.memory_space<vmem>>, %arg9: memref<4x512x512xi8, #tpu.memory_space<vmem>>, %arg10: memref<4x512xf32, #tpu.memory_space<vmem>>, %arg11: memref<4x512xf32, #tpu.memory_space<vmem>>, %arg12: memref<2x512x64xbf16, #tpu.memory_space<vmem>>, %arg13: memref<2x64xf32, #tpu.memory_space<vmem>>, %arg14: memref<8x128xf32, #tpu.memory_space<vmem>>) attributes {dimension_semantics = [#tpu.dimension_semantics<arbitrary>], iteration_bounds = array<i64: 1>, scalar_prefetch = 0 : i64, scratch_operands = 0 : i64, tpu.core_type = #tpu.core_type<tc>, window_params = [{transform_indices = @transform_0, window_bounds = array<i64: 8, 16>}, {pipeline_mode = #tpu.pipeline_mode<synchronous>, transform_indices = @transform_1, window_bounds = array<i64: 16, 512>}, {pipeline_mode = #tpu.pipeline_mode<synchronous>, transform_indices = @transform_2, window_bounds = array<i64: 4, 512>}, {pipeline_mode = #tpu.pipeline_mode<synchronous>, transform_indices = @transform_3, window_bounds = array<i64: 3, 512, 512>}, {pipeline_mode = #tpu.pipeline_mode<synchronous>, transform_indices = @transform_4, window_bounds = array<i64: 3, 512>}, {pipeline_mode = #tpu.pipeline_mode<synchronous>, transform_indices = @transform_5, window_bounds = array<i64: 512, 1024>}, {pipeline_mode = #tpu.pipeline_mode<synchronous>, transform_indices = @transform_6, window_bounds = array<i64: 1, 1024>}, {pipeline_mode = #tpu.pipeline_mode<synchronous>, transform_indices = @transform_7, window_bounds = array<i64: 1, 1024>}, {pipeline_mode = #tpu.pipeline_mode<synchronous>, transform_indices = @transform_8, window_bounds = array<i64: 4, 512, 512>}, {pipeline_mode = #tpu.pipeline_mode<synchronous>, transform_indices = @transform_9, window_bounds = array<i64: 4, 512>}, {pipeline_mode = #tpu.pipeline_mode<synchronous>, transform_indices = @transform_10, window_bounds = array<i64: 4, 512>}, {pipeline_mode = #tpu.pipeline_mode<synchronous>, transform_indices = @transform_11, window_bounds = array<i64: 2, 512, 64>}, {pipeline_mode = #tpu.pipeline_mode<synchronous>, transform_indices = @transform_12, window_bounds = array<i64: 2, 64>}, {transform_indices = @transform_13, window_bounds = array<i64: 8, 128>}]} {
    %c0 = arith.constant 0 : index
    %c0_0 = arith.constant 0 : index
    %0 = vector.load %arg1[%c0, %c0_0] : memref<8x16xf32, #tpu.memory_space<vmem>>, vector<8x16xf32>
    %1 = arith.truncf %0 : vector<8x16xf32> to vector<8x16xbf16>
    %c0_1 = arith.constant 0 : index
    %c0_2 = arith.constant 0 : index
    %2 = vector.load %arg2[%c0_1, %c0_2] : memref<16x512xbf16, #tpu.memory_space<vmem>>, vector<16x512xbf16>
    %c0_3 = arith.constant 0 : index
    %c0_4 = arith.constant 0 : index
    %3 = vector.load %arg3[%c0_3, %c0_4] : memref<4x512xf32, #tpu.memory_space<vmem>>, vector<1x512xf32>
    %4 = vector.shape_cast %3 : vector<1x512xf32> to vector<512xf32>
    %cst = arith.constant dense<0.000000e+00> : vector<8x512xf32>
    %5 = tpu.matmul %1, %2, %cst {dimension_numbers = #tpu.dot_dimension_numbers<[1], [0], [0], [1], [0, 0, 1, 1], [], []>} : vector<8x16xbf16>, vector<16x512xbf16>, vector<8x512xf32> -> vector<8x512xf32>
    %6 = vector.shape_cast %4 : vector<512xf32> to vector<1x512xf32>
    %7 = vector.broadcast %6 : vector<1x512xf32> to vector<8x512xf32>
    %8 = arith.addf %5, %7 : vector<8x512xf32>
    %cst_5 = arith.constant 0.000000e+00 : f32
    %9 = vector.broadcast %cst_5 : f32 to vector<8x512xf32>
    %10 = arith.maximumf %8, %9 : vector<8x512xf32>
    %11 = arith.truncf %10 : vector<8x512xf32> to vector<8x512xbf16>
    %c0_6 = arith.constant 0 : index
    %c0_7 = arith.constant 0 : index
    %c0_8 = arith.constant 0 : index
    %12 = vector.load %arg4[%c0_6, %c0_7, %c0_8] : memref<3x512x512xi8, #tpu.memory_space<vmem>>, vector<1x512x512xi8>
    %13 = vector.shape_cast %12 : vector<1x512x512xi8> to vector<512x512xi8>
    %c0_9 = arith.constant 0 : index
    %c0_10 = arith.constant 0 : index
    %14 = vector.load %arg5[%c0_9, %c0_10] : memref<3x512xf32, #tpu.memory_space<vmem>>, vector<1x512xf32>
    %15 = vector.shape_cast %14 : vector<1x512xf32> to vector<512xf32>
    %c1 = arith.constant 1 : index
    %c0_11 = arith.constant 0 : index
    %16 = vector.load %arg3[%c1, %c0_11] : memref<4x512xf32, #tpu.memory_space<vmem>>, vector<1x512xf32>
    %17 = vector.shape_cast %16 : vector<1x512xf32> to vector<512xf32>
    %18 = arith.sitofp %13 : vector<512x512xi8> to vector<512x512xbf16>
    %cst_12 = arith.constant dense<0.000000e+00> : vector<8x512xf32>
    %19 = tpu.matmul %11, %18, %cst_12 {dimension_numbers = #tpu.dot_dimension_numbers<[1], [0], [0], [1], [0, 0, 1, 1], [], []>} : vector<8x512xbf16>, vector<512x512xbf16>, vector<8x512xf32> -> vector<8x512xf32>
    %20 = vector.shape_cast %15 : vector<512xf32> to vector<1x512xf32>
    %21 = vector.broadcast %20 : vector<1x512xf32> to vector<8x512xf32>
    %22 = arith.mulf %19, %21 : vector<8x512xf32>
    %23 = vector.shape_cast %17 : vector<512xf32> to vector<1x512xf32>
    %24 = vector.broadcast %23 : vector<1x512xf32> to vector<8x512xf32>
    %25 = arith.addf %22, %24 : vector<8x512xf32>
    %cst_13 = arith.constant 0.000000e+00 : f32
    %26 = vector.broadcast %cst_13 : f32 to vector<8x512xf32>
    %27 = arith.maximumf %25, %26 : vector<8x512xf32>
    %28 = arith.truncf %27 : vector<8x512xf32> to vector<8x512xbf16>
    %c1_14 = arith.constant 1 : index
    %c0_15 = arith.constant 0 : index
    %c0_16 = arith.constant 0 : index
    %29 = vector.load %arg4[%c1_14, %c0_15, %c0_16] : memref<3x512x512xi8, #tpu.memory_space<vmem>>, vector<1x512x512xi8>
    %30 = vector.shape_cast %29 : vector<1x512x512xi8> to vector<512x512xi8>
    %c1_17 = arith.constant 1 : index
    %c0_18 = arith.constant 0 : index
    %31 = vector.load %arg5[%c1_17, %c0_18] : memref<3x512xf32, #tpu.memory_space<vmem>>, vector<1x512xf32>
    %32 = vector.shape_cast %31 : vector<1x512xf32> to vector<512xf32>
    %c2 = arith.constant 2 : index
    %c0_19 = arith.constant 0 : index
    %33 = vector.load %arg3[%c2, %c0_19] : memref<4x512xf32, #tpu.memory_space<vmem>>, vector<1x512xf32>
    %34 = vector.shape_cast %33 : vector<1x512xf32> to vector<512xf32>
    %35 = arith.sitofp %30 : vector<512x512xi8> to vector<512x512xbf16>
    %cst_20 = arith.constant dense<0.000000e+00> : vector<8x512xf32>
    %36 = tpu.matmul %28, %35, %cst_20 {dimension_numbers = #tpu.dot_dimension_numbers<[1], [0], [0], [1], [0, 0, 1, 1], [], []>} : vector<8x512xbf16>, vector<512x512xbf16>, vector<8x512xf32> -> vector<8x512xf32>
    %37 = vector.shape_cast %32 : vector<512xf32> to vector<1x512xf32>
    %38 = vector.broadcast %37 : vector<1x512xf32> to vector<8x512xf32>
    %39 = arith.mulf %36, %38 : vector<8x512xf32>
    %40 = vector.shape_cast %34 : vector<512xf32> to vector<1x512xf32>
    %41 = vector.broadcast %40 : vector<1x512xf32> to vector<8x512xf32>
    %42 = arith.addf %39, %41 : vector<8x512xf32>
    %cst_21 = arith.constant 0.000000e+00 : f32
    %43 = vector.broadcast %cst_21 : f32 to vector<8x512xf32>
    %44 = arith.maximumf %42, %43 : vector<8x512xf32>
    %45 = arith.truncf %44 : vector<8x512xf32> to vector<8x512xbf16>
    %c2_22 = arith.constant 2 : index
    %c0_23 = arith.constant 0 : index
    %c0_24 = arith.constant 0 : index
    %46 = vector.load %arg4[%c2_22, %c0_23, %c0_24] : memref<3x512x512xi8, #tpu.memory_space<vmem>>, vector<1x512x512xi8>
    %47 = vector.shape_cast %46 : vector<1x512x512xi8> to vector<512x512xi8>
    %c2_25 = arith.constant 2 : index
    %c0_26 = arith.constant 0 : index
    %48 = vector.load %arg5[%c2_25, %c0_26] : memref<3x512xf32, #tpu.memory_space<vmem>>, vector<1x512xf32>
    %49 = vector.shape_cast %48 : vector<1x512xf32> to vector<512xf32>
    %c3 = arith.constant 3 : index
    %c0_27 = arith.constant 0 : index
    %50 = vector.load %arg3[%c3, %c0_27] : memref<4x512xf32, #tpu.memory_space<vmem>>, vector<1x512xf32>
    %51 = vector.shape_cast %50 : vector<1x512xf32> to vector<512xf32>
    %52 = arith.sitofp %47 : vector<512x512xi8> to vector<512x512xbf16>
    %cst_28 = arith.constant dense<0.000000e+00> : vector<8x512xf32>
    %53 = tpu.matmul %45, %52, %cst_28 {dimension_numbers = #tpu.dot_dimension_numbers<[1], [0], [0], [1], [0, 0, 1, 1], [], []>} : vector<8x512xbf16>, vector<512x512xbf16>, vector<8x512xf32> -> vector<8x512xf32>
    %54 = vector.shape_cast %49 : vector<512xf32> to vector<1x512xf32>
    %55 = vector.broadcast %54 : vector<1x512xf32> to vector<8x512xf32>
    %56 = arith.mulf %53, %55 : vector<8x512xf32>
    %57 = vector.shape_cast %51 : vector<512xf32> to vector<1x512xf32>
    %58 = vector.broadcast %57 : vector<1x512xf32> to vector<8x512xf32>
    %59 = arith.addf %56, %58 : vector<8x512xf32>
    %cst_29 = arith.constant 0.000000e+00 : f32
    %60 = vector.broadcast %cst_29 : f32 to vector<8x512xf32>
    %61 = arith.maximumf %59, %60 : vector<8x512xf32>
    %62 = arith.truncf %61 : vector<8x512xf32> to vector<8x512xbf16>
    %c0_30 = arith.constant 0 : index
    %c0_31 = arith.constant 0 : index
    %63 = vector.load %arg6[%c0_30, %c0_31] : memref<512x1024xi8, #tpu.memory_space<vmem>>, vector<512x1024xi8>
    %c0_32 = arith.constant 0 : index
    %c0_33 = arith.constant 0 : index
    %64 = vector.load %arg7[%c0_32, %c0_33] : memref<1x1024xf32, #tpu.memory_space<vmem>>, vector<1x1024xf32>
    %65 = vector.shape_cast %64 : vector<1x1024xf32> to vector<1024xf32>
    %c0_34 = arith.constant 0 : index
    %c0_35 = arith.constant 0 : index
    %66 = vector.load %arg8[%c0_34, %c0_35] : memref<1x1024xf32, #tpu.memory_space<vmem>>, vector<1x1024xf32>
    %67 = vector.shape_cast %66 : vector<1x1024xf32> to vector<1024xf32>
    %68 = arith.sitofp %63 : vector<512x1024xi8> to vector<512x1024xbf16>
    %cst_36 = arith.constant dense<0.000000e+00> : vector<8x1024xf32>
    %69 = tpu.matmul %62, %68, %cst_36 {dimension_numbers = #tpu.dot_dimension_numbers<[1], [0], [0], [1], [0, 0, 1, 1], [], []>} : vector<8x512xbf16>, vector<512x1024xbf16>, vector<8x1024xf32> -> vector<8x1024xf32>
    %70 = vector.shape_cast %65 : vector<1024xf32> to vector<1x1024xf32>
    %71 = vector.broadcast %70 : vector<1x1024xf32> to vector<8x1024xf32>
    %72 = arith.mulf %69, %71 : vector<8x1024xf32>
    %73 = vector.shape_cast %67 : vector<1024xf32> to vector<1x1024xf32>
    %74 = vector.broadcast %73 : vector<1x1024xf32> to vector<8x1024xf32>
    %75 = arith.addf %72, %74 : vector<8x1024xf32>
    %cst_37 = arith.constant 0.000000e+00 : f32
    %76 = vector.broadcast %cst_37 : f32 to vector<8x1024xf32>
    %77 = arith.maximumf %75, %76 : vector<8x1024xf32>
    %78 = arith.truncf %77 : vector<8x1024xf32> to vector<8x1024xbf16>
    %79 = vector.extract_strided_slice %78 {offsets = [0, 0], sizes = [8, 512], strides = [1, 1]} : vector<8x1024xbf16> to vector<8x512xbf16>
    %c0_38 = arith.constant 0 : index
    %c0_39 = arith.constant 0 : index
    %c0_40 = arith.constant 0 : index
    %80 = vector.load %arg9[%c0_38, %c0_39, %c0_40] : memref<4x512x512xi8, #tpu.memory_space<vmem>>, vector<1x512x512xi8>
    %81 = vector.shape_cast %80 : vector<1x512x512xi8> to vector<512x512xi8>
    %c0_41 = arith.constant 0 : index
    %c0_42 = arith.constant 0 : index
    %82 = vector.load %arg10[%c0_41, %c0_42] : memref<4x512xf32, #tpu.memory_space<vmem>>, vector<1x512xf32>
    %83 = vector.shape_cast %82 : vector<1x512xf32> to vector<512xf32>
    %c0_43 = arith.constant 0 : index
    %c0_44 = arith.constant 0 : index
    %84 = vector.load %arg11[%c0_43, %c0_44] : memref<4x512xf32, #tpu.memory_space<vmem>>, vector<1x512xf32>
    %85 = vector.shape_cast %84 : vector<1x512xf32> to vector<512xf32>
    %86 = arith.sitofp %81 : vector<512x512xi8> to vector<512x512xbf16>
    %cst_45 = arith.constant dense<0.000000e+00> : vector<8x512xf32>
    %87 = tpu.matmul %79, %86, %cst_45 {dimension_numbers = #tpu.dot_dimension_numbers<[1], [0], [0], [1], [0, 0, 1, 1], [], []>} : vector<8x512xbf16>, vector<512x512xbf16>, vector<8x512xf32> -> vector<8x512xf32>
    %88 = vector.shape_cast %83 : vector<512xf32> to vector<1x512xf32>
    %89 = vector.broadcast %88 : vector<1x512xf32> to vector<8x512xf32>
    %90 = arith.mulf %87, %89 : vector<8x512xf32>
    %91 = vector.shape_cast %85 : vector<512xf32> to vector<1x512xf32>
    %92 = vector.broadcast %91 : vector<1x512xf32> to vector<8x512xf32>
    %93 = arith.addf %90, %92 : vector<8x512xf32>
    %cst_46 = arith.constant 0.000000e+00 : f32
    %94 = vector.broadcast %cst_46 : f32 to vector<8x512xf32>
    %95 = arith.maximumf %93, %94 : vector<8x512xf32>
    %96 = arith.truncf %95 : vector<8x512xf32> to vector<8x512xbf16>
    %c1_47 = arith.constant 1 : index
    %c0_48 = arith.constant 0 : index
    %c0_49 = arith.constant 0 : index
    %97 = vector.load %arg9[%c1_47, %c0_48, %c0_49] : memref<4x512x512xi8, #tpu.memory_space<vmem>>, vector<1x512x512xi8>
    %98 = vector.shape_cast %97 : vector<1x512x512xi8> to vector<512x512xi8>
    %c1_50 = arith.constant 1 : index
    %c0_51 = arith.constant 0 : index
    %99 = vector.load %arg10[%c1_50, %c0_51] : memref<4x512xf32, #tpu.memory_space<vmem>>, vector<1x512xf32>
    %100 = vector.shape_cast %99 : vector<1x512xf32> to vector<512xf32>
    %c1_52 = arith.constant 1 : index
    %c0_53 = arith.constant 0 : index
    %101 = vector.load %arg11[%c1_52, %c0_53] : memref<4x512xf32, #tpu.memory_space<vmem>>, vector<1x512xf32>
    %102 = vector.shape_cast %101 : vector<1x512xf32> to vector<512xf32>
    %103 = arith.sitofp %98 : vector<512x512xi8> to vector<512x512xbf16>
    %cst_54 = arith.constant dense<0.000000e+00> : vector<8x512xf32>
    %104 = tpu.matmul %96, %103, %cst_54 {dimension_numbers = #tpu.dot_dimension_numbers<[1], [0], [0], [1], [0, 0, 1, 1], [], []>} : vector<8x512xbf16>, vector<512x512xbf16>, vector<8x512xf32> -> vector<8x512xf32>
    %105 = vector.shape_cast %100 : vector<512xf32> to vector<1x512xf32>
    %106 = vector.broadcast %105 : vector<1x512xf32> to vector<8x512xf32>
    %107 = arith.mulf %104, %106 : vector<8x512xf32>
    %108 = vector.shape_cast %102 : vector<512xf32> to vector<1x512xf32>
    %109 = vector.broadcast %108 : vector<1x512xf32> to vector<8x512xf32>
    %110 = arith.addf %107, %109 : vector<8x512xf32>
    %cst_55 = arith.constant 0.000000e+00 : f32
    %111 = vector.broadcast %cst_55 : f32 to vector<8x512xf32>
    %112 = arith.maximumf %110, %111 : vector<8x512xf32>
    %113 = arith.truncf %112 : vector<8x512xf32> to vector<8x512xbf16>
    %c0_56 = arith.constant 0 : index
    %c0_57 = arith.constant 0 : index
    %c0_58 = arith.constant 0 : index
    %114 = vector.load %arg12[%c0_56, %c0_57, %c0_58] : memref<2x512x64xbf16, #tpu.memory_space<vmem>>, vector<1x512x64xbf16>
    %115 = vector.shape_cast %114 : vector<1x512x64xbf16> to vector<512x64xbf16>
    %c0_59 = arith.constant 0 : index
    %c0_60 = arith.constant 0 : index
    %116 = vector.load %arg13[%c0_59, %c0_60] : memref<2x64xf32, #tpu.memory_space<vmem>>, vector<1x64xf32>
    %117 = vector.shape_cast %116 : vector<1x64xf32> to vector<64xf32>
    %cst_61 = arith.constant dense<0.000000e+00> : vector<8x64xf32>
    %118 = tpu.matmul %113, %115, %cst_61 {dimension_numbers = #tpu.dot_dimension_numbers<[1], [0], [0], [1], [0, 0, 1, 1], [], []>} : vector<8x512xbf16>, vector<512x64xbf16>, vector<8x64xf32> -> vector<8x64xf32>
    %119 = vector.shape_cast %117 : vector<64xf32> to vector<1x64xf32>
    %120 = vector.broadcast %119 : vector<1x64xf32> to vector<8x64xf32>
    %121 = arith.addf %118, %120 : vector<8x64xf32>
    %122 = vector.extract_strided_slice %78 {offsets = [0, 512], sizes = [8, 512], strides = [1, 1]} : vector<8x1024xbf16> to vector<8x512xbf16>
    %c2_62 = arith.constant 2 : index
    %c0_63 = arith.constant 0 : index
    %c0_64 = arith.constant 0 : index
    %123 = vector.load %arg9[%c2_62, %c0_63, %c0_64] : memref<4x512x512xi8, #tpu.memory_space<vmem>>, vector<1x512x512xi8>
    %124 = vector.shape_cast %123 : vector<1x512x512xi8> to vector<512x512xi8>
    %c2_65 = arith.constant 2 : index
    %c0_66 = arith.constant 0 : index
    %125 = vector.load %arg10[%c2_65, %c0_66] : memref<4x512xf32, #tpu.memory_space<vmem>>, vector<1x512xf32>
    %126 = vector.shape_cast %125 : vector<1x512xf32> to vector<512xf32>
    %c2_67 = arith.constant 2 : index
    %c0_68 = arith.constant 0 : index
    %127 = vector.load %arg11[%c2_67, %c0_68] : memref<4x512xf32, #tpu.memory_space<vmem>>, vector<1x512xf32>
    %128 = vector.shape_cast %127 : vector<1x512xf32> to vector<512xf32>
    %129 = arith.sitofp %124 : vector<512x512xi8> to vector<512x512xbf16>
    %cst_69 = arith.constant dense<0.000000e+00> : vector<8x512xf32>
    %130 = tpu.matmul %122, %129, %cst_69 {dimension_numbers = #tpu.dot_dimension_numbers<[1], [0], [0], [1], [0, 0, 1, 1], [], []>} : vector<8x512xbf16>, vector<512x512xbf16>, vector<8x512xf32> -> vector<8x512xf32>
    %131 = vector.shape_cast %126 : vector<512xf32> to vector<1x512xf32>
    %132 = vector.broadcast %131 : vector<1x512xf32> to vector<8x512xf32>
    %133 = arith.mulf %130, %132 : vector<8x512xf32>
    %134 = vector.shape_cast %128 : vector<512xf32> to vector<1x512xf32>
    %135 = vector.broadcast %134 : vector<1x512xf32> to vector<8x512xf32>
    %136 = arith.addf %133, %135 : vector<8x512xf32>
    %cst_70 = arith.constant 0.000000e+00 : f32
    %137 = vector.broadcast %cst_70 : f32 to vector<8x512xf32>
    %138 = arith.maximumf %136, %137 : vector<8x512xf32>
    %139 = arith.truncf %138 : vector<8x512xf32> to vector<8x512xbf16>
    %c3_71 = arith.constant 3 : index
    %c0_72 = arith.constant 0 : index
    %c0_73 = arith.constant 0 : index
    %140 = vector.load %arg9[%c3_71, %c0_72, %c0_73] : memref<4x512x512xi8, #tpu.memory_space<vmem>>, vector<1x512x512xi8>
    %141 = vector.shape_cast %140 : vector<1x512x512xi8> to vector<512x512xi8>
    %c3_74 = arith.constant 3 : index
    %c0_75 = arith.constant 0 : index
    %142 = vector.load %arg10[%c3_74, %c0_75] : memref<4x512xf32, #tpu.memory_space<vmem>>, vector<1x512xf32>
    %143 = vector.shape_cast %142 : vector<1x512xf32> to vector<512xf32>
    %c3_76 = arith.constant 3 : index
    %c0_77 = arith.constant 0 : index
    %144 = vector.load %arg11[%c3_76, %c0_77] : memref<4x512xf32, #tpu.memory_space<vmem>>, vector<1x512xf32>
    %145 = vector.shape_cast %144 : vector<1x512xf32> to vector<512xf32>
    %146 = arith.sitofp %141 : vector<512x512xi8> to vector<512x512xbf16>
    %cst_78 = arith.constant dense<0.000000e+00> : vector<8x512xf32>
    %147 = tpu.matmul %139, %146, %cst_78 {dimension_numbers = #tpu.dot_dimension_numbers<[1], [0], [0], [1], [0, 0, 1, 1], [], []>} : vector<8x512xbf16>, vector<512x512xbf16>, vector<8x512xf32> -> vector<8x512xf32>
    %148 = vector.shape_cast %143 : vector<512xf32> to vector<1x512xf32>
    %149 = vector.broadcast %148 : vector<1x512xf32> to vector<8x512xf32>
    %150 = arith.mulf %147, %149 : vector<8x512xf32>
    %151 = vector.shape_cast %145 : vector<512xf32> to vector<1x512xf32>
    %152 = vector.broadcast %151 : vector<1x512xf32> to vector<8x512xf32>
    %153 = arith.addf %150, %152 : vector<8x512xf32>
    %cst_79 = arith.constant 0.000000e+00 : f32
    %154 = vector.broadcast %cst_79 : f32 to vector<8x512xf32>
    %155 = arith.maximumf %153, %154 : vector<8x512xf32>
    %156 = arith.truncf %155 : vector<8x512xf32> to vector<8x512xbf16>
    %c1_80 = arith.constant 1 : index
    %c0_81 = arith.constant 0 : index
    %c0_82 = arith.constant 0 : index
    %157 = vector.load %arg12[%c1_80, %c0_81, %c0_82] : memref<2x512x64xbf16, #tpu.memory_space<vmem>>, vector<1x512x64xbf16>
    %158 = vector.shape_cast %157 : vector<1x512x64xbf16> to vector<512x64xbf16>
    %c1_83 = arith.constant 1 : index
    %c0_84 = arith.constant 0 : index
    %159 = vector.load %arg13[%c1_83, %c0_84] : memref<2x64xf32, #tpu.memory_space<vmem>>, vector<1x64xf32>
    %160 = vector.shape_cast %159 : vector<1x64xf32> to vector<64xf32>
    %cst_85 = arith.constant dense<0.000000e+00> : vector<8x64xf32>
    %161 = tpu.matmul %156, %158, %cst_85 {dimension_numbers = #tpu.dot_dimension_numbers<[1], [0], [0], [1], [0, 0, 1, 1], [], []>} : vector<8x512xbf16>, vector<512x64xbf16>, vector<8x64xf32> -> vector<8x64xf32>
    %162 = vector.shape_cast %160 : vector<64xf32> to vector<1x64xf32>
    %163 = vector.broadcast %162 : vector<1x64xf32> to vector<8x64xf32>
    %164 = arith.addf %161, %163 : vector<8x64xf32>
    %165 = tpu.concatenate %121, %164 in 1 : vector<8x64xf32>, vector<8x64xf32> -> vector<8x128xf32>
    %c0_86 = arith.constant 0 : index
    %c0_87 = arith.constant 0 : index
    %166 = vector.load %arg14[%c0_86, %c0_87] : memref<8x128xf32, #tpu.memory_space<vmem>>, vector<8x128xf32>
    tpu.vector_store %arg14[%c0_86, %c0_87], %165 {strides = array<i32>} : memref<8x128xf32, #tpu.memory_space<vmem>>, vector<8x128xf32>,
    return
  }
  func.func @transform_0(%arg0: i32) -> (i32, i32) {
    %c0_i32 = arith.constant 0 : i32
    %c0_i32_0 = arith.constant 0 : i32
    return %arg0, %c0_i32 : i32, i32
  }
  func.func @transform_1(%arg0: i32) -> (i32, i32) {
    %c0_i32 = arith.constant 0 : i32
    %c0_i32_0 = arith.constant 0 : i32
    %c0_i32_1 = arith.constant 0 : i32
    return %c0_i32, %c0_i32_0 : i32, i32
  }
  func.func @transform_2(%arg0: i32) -> (i32, i32) {
    %c0_i32 = arith.constant 0 : i32
    %c0_i32_0 = arith.constant 0 : i32
    %c0_i32_1 = arith.constant 0 : i32
    return %c0_i32, %c0_i32_0 : i32, i32
  }
  func.func @transform_3(%arg0: i32) -> (i32, i32, i32) {
    %c0_i32 = arith.constant 0 : i32
    %c0_i32_0 = arith.constant 0 : i32
    %c0_i32_1 = arith.constant 0 : i32
    %c0_i32_2 = arith.constant 0 : i32
    return %c0_i32, %c0_i32_0, %c0_i32_1 : i32, i32, i32
  }
  func.func @transform_4(%arg0: i32) -> (i32, i32) {
    %c0_i32 = arith.constant 0 : i32
    %c0_i32_0 = arith.constant 0 : i32
    %c0_i32_1 = arith.constant 0 : i32
    return %c0_i32, %c0_i32_0 : i32, i32
  }
  func.func @transform_5(%arg0: i32) -> (i32, i32) {
    %c0_i32 = arith.constant 0 : i32
    %c0_i32_0 = arith.constant 0 : i32
    %c0_i32_1 = arith.constant 0 : i32
    return %c0_i32, %c0_i32_0 : i32, i32
  }
  func.func @transform_6(%arg0: i32) -> (i32, i32) {
    %c0_i32 = arith.constant 0 : i32
    %c0_i32_0 = arith.constant 0 : i32
    %c0_i32_1 = arith.constant 0 : i32
    return %c0_i32, %c0_i32_0 : i32, i32
  }
  func.func @transform_7(%arg0: i32) -> (i32, i32) {
    %c0_i32 = arith.constant 0 : i32
    %c0_i32_0 = arith.constant 0 : i32
    %c0_i32_1 = arith.constant 0 : i32
    return %c0_i32, %c0_i32_0 : i32, i32
  }
  func.func @transform_8(%arg0: i32) -> (i32, i32, i32) {
    %c0_i32 = arith.constant 0 : i32
    %c0_i32_0 = arith.constant 0 : i32
    %c0_i32_1 = arith.constant 0 : i32
    %c0_i32_2 = arith.constant 0 : i32
    return %c0_i32, %c0_i32_0, %c0_i32_1 : i32, i32, i32
  }
  func.func @transform_9(%arg0: i32) -> (i32, i32) {
    %c0_i32 = arith.constant 0 : i32
    %c0_i32_0 = arith.constant 0 : i32
    %c0_i32_1 = arith.constant 0 : i32
    return %c0_i32, %c0_i32_0 : i32, i32
  }
  func.func @transform_10(%arg0: i32) -> (i32, i32) {
    %c0_i32 = arith.constant 0 : i32
    %c0_i32_0 = arith.constant 0 : i32
    %c0_i32_1 = arith.constant 0 : i32
    return %c0_i32, %c0_i32_0 : i32, i32
  }
  func.func @transform_11(%arg0: i32) -> (i32, i32, i32) {
    %c0_i32 = arith.constant 0 : i32
    %c0_i32_0 = arith.constant 0 : i32
    %c0_i32_1 = arith.constant 0 : i32
    %c0_i32_2 = arith.constant 0 : i32
    return %c0_i32, %c0_i32_0, %c0_i32_1 : i32, i32, i32
  }
  func.func @transform_12(%arg0: i32) -> (i32, i32) {
    %c0_i32 = arith.constant 0 : i32
    %c0_i32_0 = arith.constant 0 : i32
    %c0_i32_1 = arith.constant 0 : i32
    return %c0_i32, %c0_i32_0 : i32, i32
  }
  func.func @transform_13(%arg0: i32) -> (i32, i32) {
    %c0_i32 = arith.constant 0 : i32
    %c0_i32_0 = arith.constant 0 : i32
    return %arg0, %c0_i32 : i32, i32
  }
}

</mosaic_0001>

<bundles_post_ra>
// kernel: tpu_custom_call.1
= control target key start
LH: loop header
LB: loop body
LE: loop exit
PB: predicated region body
PF: predicated region fallthrough
CT: control target
= control target key end

     0   :  { %18 = vsyncpa [#allocation3], 0  ;;  %s5766_s0 = inlined_call_operand.vmem [shape: f32[8,16], index: 0, kind: input, shape index: {}]   ;;  %s5767_s1 = inlined_call_operand.vmem [shape: bf16[16,512], index: 1, kind: input, shape index: {}]   ;;  %s5768_s2 = inlined_call_operand.vmem [shape: f32[4,512], index: 2, kind: input, shape index: {}]   ;;  %s5769_s3 = inlined_call_operand.hbm [shape: s8[3,512,512], index: 3, kind: input, shape index: {}]   ;;  %s5770_s4 = inlined_call_operand.vmem [shape: f32[3,512], index: 4, kind: input, shape index: {}]   ;;  %s5771_s5 = inlined_call_operand.hbm [shape: s8[512,1024], index: 5, kind: input, shape index: {}]   ;;  %s5772_s6 = inlined_call_operand.vmem [shape: f32[1,1024], index: 6, kind: input, shape index: {}]   ;;  %s5773_s7 = inlined_call_operand.vmem [shape: f32[1,1024], index: 7, kind: input, shape index: {}]   ;;  %s5774_s8 = inlined_call_operand.hbm [shape: s8[4,512,512], index: 8, kind: input, shape index: {}]   ;;  %s5775_s9 = inlined_call_operand.vmem [shape: f32[4,512], index: 9, kind: input, shape index: {}]   ;;  %s5776_s10 = inlined_call_operand.vmem [shape: f32[4,512], index: 10, kind: input, shape index: {}]   ;;  %s5777_s11 = inlined_call_operand.vmem [shape: bf16[2,512,64], index: 11, kind: input, shape index: {}]   ;;  %s5778_s12 = inlined_call_operand.vmem [shape: f32[2,64], index: 12, kind: input, shape index: {}]   ;;  %s5779_s13 = inlined_call_operand.hbm [shape: f32[8,128], index: 13, kind: output, shape index: {}]  }
   0x1   :  { %19 = vsyncpa [#allocation6], 0 }
   0x2   :  { %20 = vsyncpa [#allocation4], 0  ;;  %s5173_s25 = smov [#allocation5]   ;;  %s5079_s29 = scalar_lea.hbm %s5771_s5, 16384 }
   0x3   :  { %s46_s26 = sshll.u32 %s5173_s25, 4  ;;  %p5080_p0 = scmp.ne.s32.totalorder %s5771_s5, %s5079_s29  ;;  %s47_s26 = int_to_ptr.vmem [resolvable:$true] %s46_s26 }
   0x4   :  { %p5083_p1 = scmp.lt.u32.totalorder %s5079_s29, %s5771_s5 }
   0x6   :  { %p5085_p2 = pnand %p5083_p1, %p5080_p0 }
   0x8   :  { %5088 = shalt.err (!%p5085_p2)
}
   0x9   :  { %s5089_s17 = scalar_lea.vmem %s47_s26, 16384  ;;  %p5094_p4 = scmp.lt.s32.totalorder %s47_s26, %s47_s26 }
   0xa   :  { %p5090_p3 = scmp.ne.s32.totalorder %s47_s26, %s5089_s17  ;;  %p5095_p5 = scmp.lt.s32.totalorder %s5089_s17, %s5089_s17 }
   0xc   :  { %p5096_p6 = por %p5095_p5, %p5094_p4 }
   0xe   :  { %p5097_p7 = pnand %p5096_p6, %p5090_p3 }
  0x10   :  { %5100 = shalt.err (!%p5097_p7)
}
  0x11   :  { %s5174_s18 = smov 1024   ;;  %s5175_s19 = smov 64  }
  0x12   :  { %52 = dma.hbm_to_vmem [thread:$0]  %s5771_s5, 16384, %s47_s26, [#allocation6], %s5174_s18, %s5174_s18, %s5175_s19  }
  0x13   :  { %s5176_s22 = smov [#allocation2]   ;;  %s5101_s27 = scalar_lea.hbm %s5769_s3, 24576 }
  0x14   :  { %s32_s23 = sshll.u32 %s5176_s22, 4  ;;  %p5102_p8 = scmp.ne.s32.totalorder %s5769_s3, %s5101_s27  ;;  %s33_s23 = int_to_ptr.vmem [resolvable:$true] %s32_s23 }
  0x15   :  { %p5105_p9 = scmp.lt.u32.totalorder %s5101_s27, %s5769_s3 }
  0x17   :  { %p5107_p10 = pnand %p5105_p9, %p5102_p8 }
  0x19   :  { %5110 = shalt.err (!%p5107_p10)
}
  0x1a   :  { %s5111_s15 = scalar_lea.vmem %s33_s23, 24576  ;;  %p5116_p12 = scmp.lt.s32.totalorder %s33_s23, %s33_s23 }
  0x1b   :  { %p5112_p11 = scmp.ne.s32.totalorder %s33_s23, %s5111_s15  ;;  %p5117_p13 = scmp.lt.s32.totalorder %s5111_s15, %s5111_s15 }
  0x1d   :  { %p5118_p0 = por %p5117_p13, %p5116_p12 }
  0x1f   :  { %p5119_p1 = pnand %p5118_p0, %p5112_p11 }
  0x21   :  { %5122 = shalt.err (!%p5119_p1)
}
  0x22   :  { %s5177_s5 = smov 512   ;;  %s5178_s26 = smov 32  }
  0x23   :  { %38 = dma.hbm_to_vmem [thread:$0]  %s5769_s3, 24576, %s33_s23, [#allocation3], %s5177_s5, %s5177_s5, %s5178_s26  }
  0x24   :  { %s5179_s18 = smov [#allocation7]   ;;  %s5123_s24 = scalar_lea.hbm %s5774_s8, 32768 }
  0x25   :  { %s62_s20 = sshll.u32 %s5179_s18, 4  ;;  %p5124_p2 = scmp.ne.s32.totalorder %s5774_s8, %s5123_s24  ;;  %s63_s20 = int_to_ptr.vmem [resolvable:$true] %s62_s20 }
  0x26   :  { %p5127_p3 = scmp.lt.u32.totalorder %s5123_s24, %s5774_s8 }
  0x28   :  { %p5129_p4 = pnand %p5127_p3, %p5124_p2 }
  0x2a   :  { %5132 = shalt.err (!%p5129_p4)
}
  0x2b   :  { %s5133_s30 = scalar_lea.vmem %s63_s20, 32768  ;;  %p5138_p6 = scmp.lt.s32.totalorder %s63_s20, %s63_s20 }
  0x2c   :  { %p5134_p5 = scmp.ne.s32.totalorder %s63_s20, %s5133_s30  ;;  %p5139_p7 = scmp.lt.s32.totalorder %s5133_s30, %s5133_s30 }
  0x2e   :  { %p5140_p8 = por %p5139_p7, %p5138_p6 }
  0x30   :  { %p5141_p9 = pnand %p5140_p8, %p5134_p5 }
  0x32   :  { %5144 = shalt.err (!%p5141_p9)
}
  0x33   :  { %68 = dma.hbm_to_vmem [thread:$0]  %s5774_s8, 32768, %s63_s20, [#allocation6], %s5177_s5, %s5177_s5, %s5178_s26  }
  0x34   :  { %5167 = dma.done.wait [#allocation3], 24576  }
  0x35   :  { %5168 = vsyncadd [#allocation3], 4294942720 }
  0x36   :  { %5169 = dma.done.wait [#allocation6], 49152  }
  0x37   :  { %5170 = vsyncadd [#allocation6], 4294918144  ;;  %v5180_v0 = vmov 0   ;;  %v5007_v1 = vld [vmem:[%s5767_s1 + $0x4] ss:$16 sps:$4 sm:$0xff]   ;;  %vm135_vm0 = vcmask 130048  }
  0x38   :  { %171 = vmatprep.mubr.bf16.mxu0 %v5180_v0  ;;  %212 = vmatprep.mubr.bf16.mxu1 %v5180_v0  ;;  %v5009_v2 = vld [vmem:[%s5767_s1] ss:$16 sps:$4 sm:$0xff]   ;;  %v5010_v5 = vld [vmem:[%s5767_s1 + $0xc] ss:$16 sps:$4 sm:$0xff]   ;;  %v5012_v6 = vld [vmem:[%s5767_s1 + $0x8] ss:$16 sps:$4 sm:$0xff]  }
  0x39   :  { %v87_v3 = vld [vmem:[%s5766_s0] sm:$0xff]  ;;  %139 = vmatprep.subr.bf16.mxu0 %v5007_v1  ;;  %v230_v7 = vld [vmem:[#allocation2 + $0x8] sm:$0xff]  ;;  %v232_v8 = vld [vmem:[#allocation2 + $0x18] sm:$0xff]  ;;  %180 = vmatprep.subr.bf16.mxu1 %v5010_v5  ;;  %vm4672_vm1 = vcmask 523264  }
  0x3a   :  { %v88_v4 = vpack.c.bf16 %v87_v3, %v87_v3  ;;  %140 = vmatpush1.bf16.msra.mxu0 %v5009_v2  ;;  %v229_v9 = vld [vmem:[#allocation2] sm:$0xff]  ;;  %v297_v10 = vunpack.c.l.s8.bf16 %v230_v7  ;;  %v299_v11 = vunpack.c.l.s8.bf16 %v232_v8  ;;  %v231_v13 = vld [vmem:[#allocation2 + $0x10] sm:$0xff]  ;;  %v301_v14 = vunpack.c.h.s8.bf16 %v230_v7  ;;  %181 = vmatpush1.bf16.msra.mxu1 %v5012_v6  ;;  %v234_v16 = vld [vmem:[#allocation2 + $0x28] sm:$0xff] }
  0x3b   :  { %v296_v12 = vunpack.c.l.s8.bf16 %v229_v9  ;;  %v298_v15 = vunpack.c.l.s8.bf16 %v231_v13  ;;  %v303_v17 = vunpack.c.h.s8.bf16 %v232_v8  ;;  %v300_v18 = vunpack.c.h.s8.bf16 %v229_v9  ;;  %v236_v19 = vld [vmem:[#allocation2 + $0x38] sm:$0xff]  ;;  %v233_v21 = vld [vmem:[#allocation2 + $0x20] sm:$0xff]  ;;  %v235_v24 = vld [vmem:[#allocation2 + $0x30] sm:$0xff] }
  0x3c   :  { %424 = vmatprep.subr.bf16.mxu0 %v297_v10  ;;  %506 = vmatprep.subr.bf16.mxu1 %v299_v11  ;;  %v305_v20 = vunpack.c.l.s8.bf16 %v234_v16  ;;  %v302_v22 = vunpack.c.h.s8.bf16 %v231_v13  ;;  %v307_v23 = vunpack.c.l.s8.bf16 %v236_v19  ;;  %v304_v25 = vunpack.c.l.s8.bf16 %v233_v21  ;;  %v238_v27 = vld [vmem:[#allocation2 + $0x48] sm:$0xff]  ;;  %v240_v29 = vld [vmem:[#allocation2 + $0x58] sm:$0xff]  ;;  %v237_v31 = vld [vmem:[#allocation2 + $0x40] sm:$0xff] }
  0x3d   :  { %4695 = vmatmul.mubr.msk.bf16.vlgmr.msra.gmra.mrb[0].mxu0 %vm135_vm0, %v88_v4  ;;  %4696 = vmatmul.mubr.msk.bf16.vlgmr.msra.gmra.mrb[0].mxu1 %vm135_vm0, %v88_v4  ;;  %v309_v26 = vunpack.c.h.s8.bf16 %v234_v16  ;;  %v306_v28 = vunpack.c.l.s8.bf16 %v235_v24  ;;  %v311_v30 = vunpack.c.h.s8.bf16 %v236_v19  ;;  %v308_v32 = vunpack.c.h.s8.bf16 %v233_v21  ;;  %v239_v34 = vld [vmem:[#allocation2 + $0x50] sm:$0xff]  ;;  %v242_v38 = vld [vmem:[#allocation2 + $0x68] sm:$0xff]  ;;  %v244_v41 = vld [vmem:[#allocation2 + $0x78] sm:$0xff] }
  0x3e   :  { %425 = vmatpush1.bf16.msra.mxu0 %v296_v12  ;;  %507 = vmatpush1.bf16.msra.mxu1 %v298_v15  ;;  %v313_v33 = vunpack.c.l.s8.bf16 %v238_v27  ;;  %v310_v35 = vunpack.c.h.s8.bf16 %v235_v24  ;;  %v315_v36 = vunpack.c.l.s8.bf16 %v240_v29  ;;  %v312_v37 = vunpack.c.l.s8.bf16 %v237_v31  ;;  %v241_v43 = vld [vmem:[#allocation2 + $0x60] sm:$0xff]  ;;  %v243_v46 = vld [vmem:[#allocation2 + $0x70] sm:$0xff]  ;;  %v246_v50 = vld [vmem:[#allocation2 + $0x88] sm:$0xff] }
  0x3f   :  { %426 = vmatprep.subr.bf16.mxu0 %v301_v14  ;;  %508 = vmatprep.subr.bf16.mxu1 %v303_v17  ;;  %v317_v39 = vunpack.c.h.s8.bf16 %v238_v27  ;;  %v314_v40 = vunpack.c.l.s8.bf16 %v239_v34  ;;  %v319_v42 = vunpack.c.h.s8.bf16 %v240_v29  ;;  %v316_v44 = vunpack.c.h.s8.bf16 %v237_v31  ;;  %v248_v53 = vld [vmem:[#allocation2 + $0x98] sm:$0xff]  ;;  %v245_v55 = vld [vmem:[#allocation2 + $0x80] sm:$0xff]  ;;  %v247_v58 = vld [vmem:[#allocation2 + $0x90] sm:$0xff] }
  0x40   :  { %v321_v45 = vunpack.c.l.s8.bf16 %v242_v38  ;;  %v318_v47 = vunpack.c.h.s8.bf16 %v239_v34  ;;  %v323_v48 = vunpack.c.l.s8.bf16 %v244_v41  ;;  %v320_v49 = vunpack.c.l.s8.bf16 %v241_v43  ;;  %v250_v62 = vld [vmem:[#allocation2 + $0xa8] sm:$0xff]  ;;  %v252_v1 = vld [vmem:[#allocation2 + $0xb8] sm:$0xff]  ;;  %v249_v3 = vld [vmem:[#allocation2 + $0xa0] sm:$0xff] }
  0x41   :  { %v325_v51 = vunpack.c.h.s8.bf16 %v242_v38  ;;  %v322_v52 = vunpack.c.l.s8.bf16 %v243_v46  ;;  %v327_v54 = vunpack.c.h.s8.bf16 %v244_v41  ;;  %v324_v56 = vunpack.c.h.s8.bf16 %v241_v43  ;;  %v251_v6 = vld [vmem:[#allocation2 + $0xb0] sm:$0xff]  ;;  %v254_v10 = vld [vmem:[#allocation2 + $0xc8] sm:$0xff]  ;;  %v256_v13 = vld [vmem:[#allocation2 + $0xd8] sm:$0xff] }
  0x42   :  { %427 = vmatpush1.bf16.msra.mxu0 %v300_v18  ;;  %509 = vmatpush1.bf16.msra.mxu1 %v302_v22  ;;  %v329_v57 = vunpack.c.l.s8.bf16 %v246_v50  ;;  %v326_v59 = vunpack.c.h.s8.bf16 %v243_v46  ;;  %v331_v60 = vunpack.c.l.s8.bf16 %v248_v53  ;;  %v328_v61 = vunpack.c.l.s8.bf16 %v245_v55  ;;  %v253_v15 = vld [vmem:[#allocation2 + $0xc0] sm:$0xff]  ;;  %v255_v18 = vld [vmem:[#allocation2 + $0xd0] sm:$0xff]  ;;  %v258_v27 = vld [vmem:[#allocation2 + $0xe8] sm:$0xff] }
  0x43   :  { %428 = vmatprep.subr.bf16.mxu0 %v305_v20  ;;  %510 = vmatprep.subr.bf16.mxu1 %v307_v23  ;;  %v333_v63 = vunpack.c.h.s8.bf16 %v246_v50  ;;  %v330_v0 = vunpack.c.l.s8.bf16 %v247_v58  ;;  %v335_v2 = vunpack.c.h.s8.bf16 %v248_v53  ;;  %v332_v4 = vunpack.c.h.s8.bf16 %v245_v55  ;;  %v257_v31 = vld [vmem:[#allocation2 + $0xe0] sm:$0xff] }
  0x44   :  { %v337_v5 = vunpack.c.l.s8.bf16 %v250_v62  ;;  %v334_v7 = vunpack.c.h.s8.bf16 %v247_v58  ;;  %v339_v8 = vunpack.c.l.s8.bf16 %v252_v1  ;;  %v336_v9 = vunpack.c.l.s8.bf16 %v249_v3  ;;  %v5314_v46 = vld [vmem:[%s5768_s2] ss:$4 sm:$0xf] }
  0x45   :  { %v341_v11 = vunpack.c.h.s8.bf16 %v250_v62  ;;  %v338_v12 = vunpack.c.l.s8.bf16 %v251_v6  ;;  %v343_v14 = vunpack.c.h.s8.bf16 %v252_v1  ;;  %v340_v16 = vunpack.c.h.s8.bf16 %v249_v3 }
  0x46   :  { %429 = vmatpush1.bf16.msra.mxu0 %v304_v25  ;;  %511 = vmatpush1.bf16.msra.mxu1 %v306_v28  ;;  %v345_v17 = vunpack.c.l.s8.bf16 %v254_v10  ;;  %v342_v19 = vunpack.c.h.s8.bf16 %v251_v6  ;;  %v347_v20 = vunpack.c.l.s8.bf16 %v256_v13  ;;  %v344_v21 = vunpack.c.l.s8.bf16 %v253_v15  ;;  %v260_v28 = vld [vmem:[#allocation2 + $0xf8] sm:$0xff] }
  0x47   :  { %430 = vmatprep.subr.bf16.mxu0 %v309_v26  ;;  %512 = vmatprep.subr.bf16.mxu1 %v311_v30  ;;  %v349_v22 = vunpack.c.h.s8.bf16 %v254_v10  ;;  %v346_v23 = vunpack.c.l.s8.bf16 %v255_v18  ;;  %v351_v24 = vunpack.c.h.s8.bf16 %v256_v13  ;;  %v348_v25 = vunpack.c.h.s8.bf16 %v253_v15  ;;  %v266_v10 = vld [vmem:[#allocation2 + $0x128] sm:$0xff] }
  0x48   :  { %v350_v26 = vunpack.c.h.s8.bf16 %v255_v18  ;;  %v353_v29 = vunpack.c.l.s8.bf16 %v258_v27  ;;  %v355_v30 = vunpack.c.l.s8.bf16 %v260_v28  ;;  %v95_v43 = vlaneseq  ;;  %v267_v18 = vld [vmem:[#allocation2 + $0x130] sm:$0xff] }
  0x49   :  { %v369_v15 = vunpack.c.l.s8.bf16 %v266_v10 }
  0x4a   :  { %431 = vmatpush1.bf16.msra.mxu0 %v308_v32  ;;  %513 = vmatpush1.bf16.msra.mxu1 %v310_v35  ;;  %v259_v32 = vld [vmem:[#allocation2 + $0xf0] sm:$0xff]  ;;  %v357_v35 = vunpack.c.h.s8.bf16 %v258_v27 }
  0x4b   :  { %432 = vmatprep.subr.bf16.mxu0 %v313_v33  ;;  %514 = vmatprep.subr.bf16.mxu1 %v315_v36  ;;  %v352_v33 = vunpack.c.l.s8.bf16 %v257_v31  ;;  %v354_v34 = vunpack.c.l.s8.bf16 %v259_v32  ;;  %v359_v36 = vunpack.c.h.s8.bf16 %v260_v28  ;;  %v358_v38 = vunpack.c.h.s8.bf16 %v259_v32 }
  0x4e   :  { %433 = vmatpush1.bf16.msra.mxu0 %v312_v37  ;;  %515 = vmatpush1.bf16.msra.mxu1 %v314_v40  ;;  %v356_v37 = vunpack.c.h.s8.bf16 %v257_v31  ;;  %v264_v40 = vld [vmem:[#allocation2 + $0x118] sm:$0xff] }
  0x4f   :  { %434 = vmatprep.subr.bf16.mxu0 %v317_v39  ;;  %516 = vmatprep.subr.bf16.mxu1 %v319_v42  ;;  %v262_v39 = vld [vmem:[#allocation2 + $0x108] sm:$0xff]  ;;  %v363_v42 = vunpack.c.l.s8.bf16 %v264_v40 }
  0x50   :  { %v361_v41 = vunpack.c.l.s8.bf16 %v262_v39 }
  0x52   :  { %435 = vmatpush1.bf16.msra.mxu0 %v316_v44  ;;  %517 = vmatpush1.bf16.msra.mxu1 %v318_v47  ;;  %v5306_v44 = vshrl.u32 %v95_v43, 7 }
  0x53   :  { %436 = vmatprep.subr.bf16.mxu0 %v321_v45  ;;  %518 = vmatprep.subr.bf16.mxu1 %v323_v48 }
  0x54   :  { %v5309_v45 = vsub.s32 0, %v5306_v44  ;;  %v5317_v47 = vsub.s32 1, %v5306_v44  ;;  %v5320_v48 = vsub.s32 3, %v5306_v44 }
  0x56   :  { %437 = vmatpush1.bf16.msra.mxu0 %v320_v49  ;;  %519 = vmatpush1.bf16.msra.mxu1 %v322_v52  ;;  %v98_v49 = vrot.slane %v5314_v46, %v5309_v45  ;;  %v102_v50 = vrot.slane %v5314_v46, %v5317_v47  ;;  %v110_v52 = vrot.slane %v5314_v46, %v5320_v48 }
  0x57   :  { %438 = vmatprep.subr.bf16.mxu0 %v325_v51  ;;  %520 = vmatprep.subr.bf16.mxu1 %v327_v54 }
  0x5a   :  { %439 = vmatpush1.bf16.msra.mxu0 %v324_v56  ;;  %521 = vmatpush1.bf16.msra.mxu1 %v326_v59 }
  0x5b   :  { %440 = vmatprep.subr.bf16.mxu0 %v329_v57  ;;  %522 = vmatprep.subr.bf16.mxu1 %v331_v60  ;;  %v261_v60 = vld [vmem:[#allocation2 + $0x100] sm:$0xff] }
  0x5c   :  { %v364_v13 = vunpack.c.h.s8.bf16 %v261_v60 }
  0x5e   :  { %441 = vmatpush1.bf16.msra.mxu0 %v328_v61  ;;  %523 = vmatpush1.bf16.msra.mxu1 %v330_v0  ;;  %v263_v61 = vld [vmem:[#allocation2 + $0x110] sm:$0xff] }
  0x5f   :  { %442 = vmatprep.subr.bf16.mxu0 %v333_v63  ;;  %524 = vmatprep.subr.bf16.mxu1 %v335_v2 }
  0x62   :  { %443 = vmatpush1.bf16.msra.mxu0 %v332_v4  ;;  %525 = vmatpush1.bf16.msra.mxu1 %v334_v7  ;;  %v360_v4 = vunpack.c.l.s8.bf16 %v261_v60  ;;  %v279_v60 = vld [vmem:[#allocation2 + $0x190] sm:$0xff] }
  0x63   :  { %444 = vmatprep.subr.bf16.mxu0 %v337_v5  ;;  %526 = vmatprep.subr.bf16.mxu1 %v339_v8  ;;  %v362_v5 = vunpack.c.l.s8.bf16 %v263_v61  ;;  %v365_v8 = vunpack.c.h.s8.bf16 %v262_v39 }
  0x66   :  { %445 = vmatpush1.bf16.msra.mxu0 %v336_v9  ;;  %527 = vmatpush1.bf16.msra.mxu1 %v338_v12  ;;  %v367_v9 = vunpack.c.h.s8.bf16 %v264_v40 }
  0x67   :  { %446 = vmatprep.subr.bf16.mxu0 %v341_v11  ;;  %528 = vmatprep.subr.bf16.mxu1 %v343_v14  ;;  %v268_v11 = vld [vmem:[#allocation2 + $0x138] sm:$0xff]  ;;  %v366_v14 = vunpack.c.h.s8.bf16 %v263_v61 }
  0x6a   :  { %447 = vmatpush1.bf16.msra.mxu0 %v340_v16  ;;  %529 = vmatpush1.bf16.msra.mxu1 %v342_v19  ;;  %v371_v16 = vunpack.c.l.s8.bf16 %v268_v11 }
  0x6b   :  { %448 = vmatprep.subr.bf16.mxu0 %v345_v17  ;;  %530 = vmatprep.subr.bf16.mxu1 %v347_v20  ;;  %v265_v17 = vld [vmem:[#allocation2 + $0x120] sm:$0xff]  ;;  %v370_v20 = vunpack.c.l.s8.bf16 %v267_v18 }
  0x6c   :  { %v368_v19 = vunpack.c.l.s8.bf16 %v265_v17 }
  0x6e   :  { %449 = vmatpush1.bf16.msra.mxu0 %v344_v21  ;;  %531 = vmatpush1.bf16.msra.mxu1 %v346_v23  ;;  %v373_v21 = vunpack.c.h.s8.bf16 %v266_v10  ;;  %v270_v23 = vld [vmem:[#allocation2 + $0x148] sm:$0xff] }
  0x6f   :  { %450 = vmatprep.subr.bf16.mxu0 %v349_v22  ;;  %532 = vmatprep.subr.bf16.mxu1 %v351_v24  ;;  %v375_v22 = vunpack.c.h.s8.bf16 %v268_v11  ;;  %v272_v24 = vld [vmem:[#allocation2 + $0x158] sm:$0xff]  ;;  %v377_v27 = vunpack.c.l.s8.bf16 %v270_v23 }
  0x70   :  { %v379_v28 = vunpack.c.l.s8.bf16 %v272_v24 }
  0x72   :  { %451 = vmatpush1.bf16.msra.mxu0 %v348_v25  ;;  %533 = vmatpush1.bf16.msra.mxu1 %v350_v26  ;;  %v372_v25 = vunpack.c.h.s8.bf16 %v265_v17  ;;  %v374_v26 = vunpack.c.h.s8.bf16 %v267_v18 }
  0x73   :  { %452 = vmatprep.subr.bf16.mxu0 %v353_v29  ;;  %534 = vmatprep.subr.bf16.mxu1 %v355_v30  ;;  %v269_v29 = vld [vmem:[#allocation2 + $0x140] sm:$0xff]  ;;  %v271_v30 = vld [vmem:[#allocation2 + $0x150] sm:$0xff] }
  0x74   :  { %v376_v31 = vunpack.c.l.s8.bf16 %v269_v29  ;;  %v378_v32 = vunpack.c.l.s8.bf16 %v271_v30 }
  0x76   :  { %453 = vmatpush1.bf16.msra.mxu0 %v352_v33  ;;  %535 = vmatpush1.bf16.msra.mxu1 %v354_v34  ;;  %v381_v33 = vunpack.c.h.s8.bf16 %v270_v23  ;;  %v383_v34 = vunpack.c.h.s8.bf16 %v272_v24  ;;  %v5331_v23 = vsub.s32 2, %v5306_v44 }
  0x77   :  { %454 = vmatprep.subr.bf16.mxu0 %v357_v35  ;;  %536 = vmatprep.subr.bf16.mxu1 %v359_v36  ;;  %v274_v35 = vld [vmem:[#allocation2 + $0x168] sm:$0xff]  ;;  %v276_v36 = vld [vmem:[#allocation2 + $0x178] sm:$0xff] }
  0x78   :  { %v385_v39 = vunpack.c.l.s8.bf16 %v274_v35  ;;  %v387_v40 = vunpack.c.l.s8.bf16 %v276_v36 }
  0x7a   :  { %455 = vmatpush1.bf16.msra.mxu0 %v356_v37  ;;  %537 = vmatpush1.bf16.msra.mxu1 %v358_v38  ;;  %v380_v37 = vunpack.c.h.s8.bf16 %v269_v29  ;;  %v382_v38 = vunpack.c.h.s8.bf16 %v271_v30  ;;  %v106_v30 = vrot.slane %v5314_v46, %v5331_v23 }
  0x7b   :  { %465 = vmatprep.subr.bf16.mxu0 %v361_v41  ;;  %547 = vmatprep.subr.bf16.mxu1 %v363_v42  ;;  %v273_v41 = vld [vmem:[#allocation2 + $0x160] sm:$0xff]  ;;  %v275_v42 = vld [vmem:[#allocation2 + $0x170] sm:$0xff] }
  0x7c   :  { %v384_v43 = vunpack.c.l.s8.bf16 %v273_v41 }
 0x110   :  { %v173_v51 = vpop.f32.mrb[0].mxu0  ;;  %v5328_v57 = vpop.f32.mrb[0].mxu1 }
 0x111   :  { %v174_v53 = vadd.f32 %v173_v51, %v98_v49  ;;  %v175_v54 = vpop.f32.mrb[1].mxu0  ;;  %v216_v62 = vpop.f32.mrb[1].mxu1  ;;  %v386_v49 = vunpack.c.l.s8.bf16 %v275_v42  ;;  %v391_v51 = vunpack.c.h.s8.bf16 %v276_v36 }
 0x112   :  { %v176_v55 = vadd.f32 %v175_v54, %v102_v50  ;;  %v177_v56 = vpop.f32.mrb[2].mxu0  ;;  %v217_v0 = vadd.f32 %v216_v62, %v110_v52  ;;  %v218_v1 = vpop.f32.mrb[2].mxu1  ;;  %v389_v50 = vunpack.c.h.s8.bf16 %v274_v35  ;;  %v278_v52 = vld [vmem:[#allocation2 + $0x188] sm:$0xff]  ;;  %v388_v54 = vunpack.c.h.s8.bf16 %v273_v41  ;;  %v650_v41 = vld [vmem:[#allocation2 + $0x218] sm:$0xff] }
 0x113   :  { %v221_v58 = vmax.f32 %v174_v53, 0.0  ;;  %v178_v59 = vpop.f32.mrb[3].mxu0  ;;  %v219_v2 = vpop.f32.mrb[3].mxu1  ;;  %v280_v53 = vld [vmem:[#allocation2 + $0x198] sm:$0xff]  ;;  %v393_v56 = vunpack.c.l.s8.bf16 %v278_v52  ;;  %v394_v62 = vunpack.c.l.s8.bf16 %v279_v60  ;;  %v282_v1 = vld [vmem:[#allocation2 + $0x1a8] sm:$0xff] }
 0x114   :  { %v222_v63 = vmax.f32 %v176_v55, 0.0  ;;  %v224_v6 = vmax.f32 %v217_v0, 0.0  ;;  %v390_v55 = vunpack.c.h.s8.bf16 %v275_v42  ;;  %v277_v59 = vld [vmem:[#allocation2 + $0x180] sm:$0xff]  ;;  %v399_v0 = vunpack.c.h.s8.bf16 %v280_v53  ;;  %v284_v2 = vld [vmem:[#allocation2 + $0x1b8] sm:$0xff] }
 0x115   :  { %v225_v7 = vpack.c.bf16 %v221_v58, %v221_v58  ;;  %v395_v58 = vunpack.c.l.s8.bf16 %v280_v53  ;;  %v392_v61 = vunpack.c.l.s8.bf16 %v277_v59  ;;  %v405_v11 = vunpack.c.h.s8.bf16 %v282_v1 }
 0x116   :  { %v226_v3 = vpack.c.bf16 %v222_v63, %v222_v63  ;;  %v228_v12 = vpack.c.bf16 %v224_v6, %v224_v6  ;;  %v397_v63 = vunpack.c.h.s8.bf16 %v278_v52  ;;  %v403_v6 = vunpack.c.l.s8.bf16 %v284_v2  ;;  %v649_v52 = vld [vmem:[#allocation2 + $0x210] sm:$0xff] }
 0x117   :  { %v717_v53 = vunpack.c.l.s8.bf16 %v649_v52 }
 0x118   :  { %456 = vmatprep.mubr.bf16.mxu0 %v226_v3  ;;  %538 = vmatprep.mubr.bf16.mxu1 %v226_v3  ;;  %v396_v3 = vunpack.c.h.s8.bf16 %v277_v59  ;;  %v654_v59 = vld [vmem:[#allocation2 + $0x238] sm:$0xff] }
 0x119   :  { %457 = vmatmul.mubr.bf16.vlgmr.msra.gmra.mrb[4].mxu0 %v225_v7  ;;  %539 = vmatmul.mubr.bf16.vlgmr.msra.gmra.mrb[4].mxu1 %v225_v7  ;;  %v281_v7 = vld [vmem:[#allocation2 + $0x1a0] sm:$0xff] }
 0x11a   :  { %466 = vmatpush1.bf16.msra.mxu0 %v360_v4  ;;  %548 = vmatpush1.bf16.msra.mxu1 %v362_v5  ;;  %v398_v4 = vunpack.c.h.s8.bf16 %v279_v60  ;;  %v401_v5 = vunpack.c.l.s8.bf16 %v282_v1  ;;  %v653_v1 = vld [vmem:[#allocation2 + $0x230] sm:$0xff] }
 0x11b   :  { %467 = vmatprep.subr.bf16.mxu0 %v365_v8  ;;  %549 = vmatprep.subr.bf16.mxu1 %v367_v9  ;;  %v283_v8 = vld [vmem:[#allocation2 + $0x1b0] sm:$0xff]  ;;  %v400_v9 = vunpack.c.l.s8.bf16 %v281_v7 }
 0x11c   :  { %497 = vmatprep.mubr.bf16.mxu0 %v228_v12  ;;  %579 = vmatprep.mubr.bf16.mxu1 %v228_v12  ;;  %v402_v10 = vunpack.c.l.s8.bf16 %v283_v8  ;;  %v407_v12 = vunpack.c.h.s8.bf16 %v284_v2 }
 0x11e   :  { %468 = vmatpush1.bf16.msra.mxu0 %v364_v13  ;;  %550 = vmatpush1.bf16.msra.mxu1 %v366_v14  ;;  %v286_v13 = vld [vmem:[#allocation2 + $0x1c8] sm:$0xff]  ;;  %v288_v14 = vld [vmem:[#allocation2 + $0x1d8] sm:$0xff] }
 0x11f   :  { %469 = vmatprep.subr.bf16.mxu0 %v369_v15  ;;  %551 = vmatprep.subr.bf16.mxu1 %v371_v16  ;;  %v404_v15 = vunpack.c.h.s8.bf16 %v281_v7  ;;  %v406_v16 = vunpack.c.h.s8.bf16 %v283_v8  ;;  %v409_v17 = vunpack.c.l.s8.bf16 %v286_v13  ;;  %v411_v18 = vunpack.c.l.s8.bf16 %v288_v14  ;;  %v658_v7 = vld [vmem:[#allocation2 + $0x258] sm:$0xff] }
 0x120   :  { %v413_v24 = vunpack.c.h.s8.bf16 %v286_v13  ;;  %v657_v13 = vld [vmem:[#allocation2 + $0x250] sm:$0xff] }
 0x122   :  { %470 = vmatpush1.bf16.msra.mxu0 %v368_v19  ;;  %552 = vmatpush1.bf16.msra.mxu1 %v370_v20  ;;  %v285_v19 = vld [vmem:[#allocation2 + $0x1c0] sm:$0xff]  ;;  %v287_v20 = vld [vmem:[#allocation2 + $0x1d0] sm:$0xff] }
 0x123   :  { %471 = vmatprep.subr.bf16.mxu0 %v373_v21  ;;  %553 = vmatprep.subr.bf16.mxu1 %v375_v22  ;;  %v408_v21 = vunpack.c.l.s8.bf16 %v285_v19  ;;  %v410_v22 = vunpack.c.l.s8.bf16 %v287_v20  ;;  %v414_v29 = vunpack.c.h.s8.bf16 %v287_v20 }
 0x126   :  { %472 = vmatpush1.bf16.msra.mxu0 %v372_v25  ;;  %554 = vmatpush1.bf16.msra.mxu1 %v374_v26  ;;  %v415_v25 = vunpack.c.h.s8.bf16 %v288_v14  ;;  %v290_v26 = vld [vmem:[#allocation2 + $0x1e8] sm:$0xff] }
 0x127   :  { %473 = vmatprep.subr.bf16.mxu0 %v377_v27  ;;  %555 = vmatprep.subr.bf16.mxu1 %v379_v28  ;;  %v292_v27 = vld [vmem:[#allocation2 + $0x1f8] sm:$0xff]  ;;  %v412_v28 = vunpack.c.h.s8.bf16 %v285_v19 }
 0x128   :  { %v662_v19 = vld [vmem:[#allocation2 + $0x278] sm:$0xff] }
 0x12a   :  { %474 = vmatpush1.bf16.msra.mxu0 %v376_v31  ;;  %556 = vmatpush1.bf16.msra.mxu1 %v378_v32  ;;  %v417_v31 = vunpack.c.l.s8.bf16 %v290_v26  ;;  %v419_v32 = vunpack.c.l.s8.bf16 %v292_v27 }
 0x12b   :  { %475 = vmatprep.subr.bf16.mxu0 %v381_v33  ;;  %557 = vmatprep.subr.bf16.mxu1 %v383_v34  ;;  %v289_v33 = vld [vmem:[#allocation2 + $0x1e0] sm:$0xff]  ;;  %v291_v34 = vld [vmem:[#allocation2 + $0x1f0] sm:$0xff] }
 0x12c   :  { %v416_v35 = vunpack.c.l.s8.bf16 %v289_v33  ;;  %v418_v36 = vunpack.c.l.s8.bf16 %v291_v34  ;;  %v420_v46 = vunpack.c.h.s8.bf16 %v289_v33  ;;  %v422_v42 = vunpack.c.h.s8.bf16 %v291_v34 }
 0x12e   :  { %476 = vmatpush1.bf16.msra.mxu0 %v380_v37  ;;  %558 = vmatpush1.bf16.msra.mxu1 %v382_v38  ;;  %v215_v37 = vadd.f32 %v5328_v57, %v106_v30  ;;  %v421_v38 = vunpack.c.h.s8.bf16 %v290_v26  ;;  %v661_v26 = vld [vmem:[#allocation2 + $0x270] sm:$0xff]  ;;  %v746_v30 = vunpack.c.h.s8.bf16 %v662_v19 }
 0x12f   :  { %477 = vmatprep.subr.bf16.mxu0 %v385_v39  ;;  %559 = vmatprep.subr.bf16.mxu1 %v387_v40  ;;  %v423_v39 = vunpack.c.h.s8.bf16 %v292_v27  ;;  %v648_v40 = vld [vmem:[#allocation2 + $0x208] sm:$0xff]  ;;  %v745_v34 = vunpack.c.h.s8.bf16 %v661_v26 }
 0x132   :  { %478 = vmatpush1.bf16.msra.mxu0 %v384_v43  ;;  %560 = vmatpush1.bf16.msra.mxu1 %v386_v49  ;;  %v223_v43 = vmax.f32 %v215_v37, 0.0  ;;  %v716_v49 = vunpack.c.l.s8.bf16 %v648_v40  ;;  %v663_v37 = vld [vmem:[#allocation2 + $0x280] sm:$0xff] }
 0x133   :  { %479 = vmatprep.subr.bf16.mxu0 %v389_v50  ;;  %561 = vmatprep.subr.bf16.mxu1 %v391_v51  ;;  %v718_v50 = vunpack.c.l.s8.bf16 %v650_v41  ;;  %v647_v51 = vld [vmem:[#allocation2 + $0x200] sm:$0xff] }
 0x134   :  { %v715_v57 = vunpack.c.l.s8.bf16 %v647_v51  ;;  %v719_v60 = vunpack.c.h.s8.bf16 %v647_v51 }
 0x136   :  { %480 = vmatpush1.bf16.msra.mxu0 %v388_v54  ;;  %562 = vmatpush1.bf16.msra.mxu1 %v390_v55  ;;  %v227_v54 = vpack.c.bf16 %v223_v43, %v223_v43  ;;  %v720_v55 = vunpack.c.h.s8.bf16 %v648_v40  ;;  %v670_v43 = vld [vmem:[#allocation2 + $0x2b8] sm:$0xff] }
 0x137   :  { %481 = vmatprep.subr.bf16.mxu0 %v393_v56  ;;  %563 = vmatprep.subr.bf16.mxu1 %v395_v58  ;;  %v722_v56 = vunpack.c.h.s8.bf16 %v650_v41  ;;  %v652_v58 = vld [vmem:[#allocation2 + $0x228] sm:$0xff] }
 0x13a   :  { %482 = vmatpush1.bf16.msra.mxu0 %v392_v61  ;;  %564 = vmatpush1.bf16.msra.mxu1 %v394_v62  ;;  %v721_v61 = vunpack.c.h.s8.bf16 %v649_v52  ;;  %v724_v62 = vunpack.c.l.s8.bf16 %v652_v58  ;;  %v758_v52 = vunpack.c.l.s8.bf16 %v670_v43 }
 0x13b   :  { %483 = vmatprep.subr.bf16.mxu0 %v397_v63  ;;  %565 = vmatprep.subr.bf16.mxu1 %v399_v0  ;;  %v726_v63 = vunpack.c.l.s8.bf16 %v654_v59  ;;  %v651_v0 = vld [vmem:[#allocation2 + $0x220] sm:$0xff] }
 0x13c   :  { %v723_v2 = vunpack.c.l.s8.bf16 %v651_v0  ;;  %v727_v8 = vunpack.c.h.s8.bf16 %v651_v0 }
 0x13e   :  { %484 = vmatpush1.bf16.msra.mxu0 %v396_v3  ;;  %566 = vmatpush1.bf16.msra.mxu1 %v398_v4  ;;  %v725_v3 = vunpack.c.l.s8.bf16 %v653_v1  ;;  %v728_v4 = vunpack.c.h.s8.bf16 %v652_v58  ;;  %v762_v58 = vunpack.c.h.s8.bf16 %v670_v43 }
 0x13f   :  { %485 = vmatprep.subr.bf16.mxu0 %v401_v5  ;;  %567 = vmatprep.subr.bf16.mxu1 %v403_v6  ;;  %v730_v5 = vunpack.c.h.s8.bf16 %v654_v59  ;;  %v656_v6 = vld [vmem:[#allocation2 + $0x248] sm:$0xff] }
 0x140   :  { %v672_v59 = vld [vmem:[#allocation2 + $0x2c8] sm:$0xff] }
 0x142   :  { %486 = vmatpush1.bf16.msra.mxu0 %v400_v9  ;;  %568 = vmatpush1.bf16.msra.mxu1 %v402_v10  ;;  %v729_v9 = vunpack.c.h.s8.bf16 %v653_v1  ;;  %v732_v10 = vunpack.c.l.s8.bf16 %v656_v6  ;;  %v671_v1 = vld [vmem:[#allocation2 + $0x2c0] sm:$0xff] }
 0x143   :  { %487 = vmatprep.subr.bf16.mxu0 %v405_v11  ;;  %569 = vmatprep.subr.bf16.mxu1 %v407_v12  ;;  %v734_v11 = vunpack.c.l.s8.bf16 %v658_v7  ;;  %v655_v12 = vld [vmem:[#allocation2 + $0x240] sm:$0xff] }
 0x144   :  { %v731_v14 = vunpack.c.l.s8.bf16 %v655_v12  ;;  %v735_v20 = vunpack.c.h.s8.bf16 %v655_v12 }
 0x146   :  { %488 = vmatpush1.bf16.msra.mxu0 %v404_v15  ;;  %570 = vmatpush1.bf16.msra.mxu1 %v406_v16  ;;  %v733_v15 = vunpack.c.l.s8.bf16 %v657_v13  ;;  %v736_v16 = vunpack.c.h.s8.bf16 %v656_v6 }
 0x147   :  { %489 = vmatprep.subr.bf16.mxu0 %v409_v17  ;;  %571 = vmatprep.subr.bf16.mxu1 %v411_v18  ;;  %v738_v17 = vunpack.c.h.s8.bf16 %v658_v7  ;;  %v660_v18 = vld [vmem:[#allocation2 + $0x268] sm:$0xff]  ;;  %v767_v7 = vunpack.c.h.s8.bf16 %v671_v1 }
 0x14a   :  { %490 = vmatpush1.bf16.msra.mxu0 %v408_v21  ;;  %572 = vmatpush1.bf16.msra.mxu1 %v410_v22  ;;  %v737_v21 = vunpack.c.h.s8.bf16 %v657_v13  ;;  %v740_v22 = vunpack.c.l.s8.bf16 %v660_v18  ;;  %v675_v13 = vld [vmem:[#allocation2 + $0x2e0] sm:$0xff] }
 0x14b   :  { %491 = vmatprep.subr.bf16.mxu0 %v413_v24  ;;  %573 = vmatprep.subr.bf16.mxu1 %v415_v25  ;;  %v742_v24 = vunpack.c.l.s8.bf16 %v662_v19  ;;  %v659_v25 = vld [vmem:[#allocation2 + $0x260] sm:$0xff]  ;;  %v775_v19 = vunpack.c.h.s8.bf16 %v675_v13 }
 0x14c   :  { %v739_v27 = vunpack.c.l.s8.bf16 %v659_v25  ;;  %v743_v33 = vunpack.c.h.s8.bf16 %v659_v25 }
 0x14e   :  { %492 = vmatpush1.bf16.msra.mxu0 %v412_v28  ;;  %574 = vmatpush1.bf16.msra.mxu1 %v414_v29  ;;  %v741_v28 = vunpack.c.l.s8.bf16 %v661_v26  ;;  %v744_v29 = vunpack.c.h.s8.bf16 %v660_v18  ;;  %v293_v26 = vld [vmem:[%s5770_s4] ss:$4 sm:$0xf] }
 0x14f   :  { %493 = vmatprep.subr.bf16.mxu0 %v417_v31  ;;  %575 = vmatprep.subr.bf16.mxu1 %v419_v32  ;;  %v664_v31 = vld [vmem:[#allocation2 + $0x288] sm:$0xff]  ;;  %v666_v32 = vld [vmem:[#allocation2 + $0x298] sm:$0xff] }
 0x150   :  { %v752_v41 = vunpack.c.h.s8.bf16 %v664_v31 }
 0x152   :  { %494 = vmatpush1.bf16.msra.mxu0 %v416_v35  ;;  %576 = vmatpush1.bf16.msra.mxu1 %v418_v36  ;;  %v748_v35 = vunpack.c.l.s8.bf16 %v664_v31  ;;  %v750_v36 = vunpack.c.l.s8.bf16 %v666_v32  ;;  %v604_v31 = vrot.slane %v293_v26, %v5320_v48 }
 0x153   :  { %495 = vmatprep.subr.bf16.mxu0 %v421_v38  ;;  %577 = vmatprep.subr.bf16.mxu1 %v423_v39  ;;  %v665_v38 = vld [vmem:[#allocation2 + $0x290] sm:$0xff]  ;;  %v747_v39 = vunpack.c.l.s8.bf16 %v663_v37 }
 0x154   :  { %v749_v40 = vunpack.c.l.s8.bf16 %v665_v38 }
 0x156   :  { %496 = vmatpush1.bf16.msra.mxu0 %v420_v46  ;;  %578 = vmatpush1.bf16.msra.mxu1 %v422_v42  ;;  %v754_v46 = vunpack.c.h.s8.bf16 %v666_v32  ;;  %v668_v42 = vld [vmem:[#allocation2 + $0x2a8] sm:$0xff] }
 0x157   :  { %843 = vmatprep.subr.bf16.mxu0 %v716_v49  ;;  %925 = vmatprep.subr.bf16.mxu1 %v718_v50  ;;  %v751_v49 = vunpack.c.h.s8.bf16 %v663_v37  ;;  %v753_v50 = vunpack.c.h.s8.bf16 %v665_v38  ;;  %v756_v51 = vunpack.c.l.s8.bf16 %v668_v42 }
 0x159   :  { %498 = vmatmul.mubr.bf16.vlgmr.msra.gmra.mrb[4].mxu0 %v227_v54  ;;  %580 = vmatmul.mubr.bf16.vlgmr.msra.gmra.mrb[4].mxu1 %v227_v54 }
 0x15a   :  { %844 = vmatpush1.bf16.msra.mxu0 %v715_v57  ;;  %926 = vmatpush1.bf16.msra.mxu1 %v717_v53  ;;  %v667_v57 = vld [vmem:[#allocation2 + $0x2a0] sm:$0xff]  ;;  %v669_v53 = vld [vmem:[#allocation2 + $0x2b0] sm:$0xff] }
 0x15b   :  { %845 = vmatprep.subr.bf16.mxu0 %v720_v55  ;;  %927 = vmatprep.subr.bf16.mxu1 %v722_v56  ;;  %v755_v54 = vunpack.c.l.s8.bf16 %v667_v57  ;;  %v757_v55 = vunpack.c.l.s8.bf16 %v669_v53  ;;  %v760_v56 = vunpack.c.h.s8.bf16 %v668_v42 }
 0x15e   :  { %846 = vmatpush1.bf16.msra.mxu0 %v719_v60  ;;  %928 = vmatpush1.bf16.msra.mxu1 %v721_v61  ;;  %v674_v60 = vld [vmem:[#allocation2 + $0x2d8] sm:$0xff]  ;;  %v759_v61 = vunpack.c.h.s8.bf16 %v667_v57 }
 0x15f   :  { %847 = vmatprep.subr.bf16.mxu0 %v724_v62  ;;  %929 = vmatprep.subr.bf16.mxu1 %v726_v63  ;;  %v761_v62 = vunpack.c.h.s8.bf16 %v669_v53  ;;  %v764_v63 = vunpack.c.l.s8.bf16 %v672_v59  ;;  %v766_v0 = vunpack.c.l.s8.bf16 %v674_v60  ;;  %v770_v6 = vunpack.c.h.s8.bf16 %v674_v60 }
 0x162   :  { %848 = vmatpush1.bf16.msra.mxu0 %v723_v2  ;;  %930 = vmatpush1.bf16.msra.mxu1 %v725_v3  ;;  %v673_v2 = vld [vmem:[#allocation2 + $0x2d0] sm:$0xff]  ;;  %v763_v3 = vunpack.c.l.s8.bf16 %v671_v1 }
 0x163   :  { %849 = vmatprep.subr.bf16.mxu0 %v728_v4  ;;  %931 = vmatprep.subr.bf16.mxu1 %v730_v5  ;;  %v765_v4 = vunpack.c.l.s8.bf16 %v673_v2  ;;  %v768_v5 = vunpack.c.h.s8.bf16 %v672_v59 }
 0x166   :  { %850 = vmatpush1.bf16.msra.mxu0 %v727_v8  ;;  %932 = vmatpush1.bf16.msra.mxu1 %v729_v9  ;;  %v769_v8 = vunpack.c.h.s8.bf16 %v673_v2  ;;  %v676_v9 = vld [vmem:[#allocation2 + $0x2e8] sm:$0xff] }
 0x167   :  { %851 = vmatprep.subr.bf16.mxu0 %v732_v10  ;;  %933 = vmatprep.subr.bf16.mxu1 %v734_v11  ;;  %v678_v10 = vld [vmem:[#allocation2 + $0x2f8] sm:$0xff]  ;;  %v772_v11 = vunpack.c.l.s8.bf16 %v676_v9 }
 0x168   :  { %v774_v12 = vunpack.c.l.s8.bf16 %v678_v10  ;;  %v778_v18 = vunpack.c.h.s8.bf16 %v678_v10  ;;  %v683_v10 = vld [vmem:[#allocation2 + $0x320] sm:$0xff] }
 0x16a   :  { %852 = vmatpush1.bf16.msra.mxu0 %v731_v14  ;;  %934 = vmatpush1.bf16.msra.mxu1 %v733_v15  ;;  %v677_v14 = vld [vmem:[#allocation2 + $0x2f0] sm:$0xff]  ;;  %v771_v15 = vunpack.c.l.s8.bf16 %v675_v13 }
 0x16b   :  { %853 = vmatprep.subr.bf16.mxu0 %v736_v16  ;;  %935 = vmatprep.subr.bf16.mxu1 %v738_v17  ;;  %v773_v16 = vunpack.c.l.s8.bf16 %v677_v14  ;;  %v776_v17 = vunpack.c.h.s8.bf16 %v676_v9 }
 0x16e   :  { %854 = vmatpush1.bf16.msra.mxu0 %v735_v20  ;;  %936 = vmatpush1.bf16.msra.mxu1 %v737_v21  ;;  %v777_v20 = vunpack.c.h.s8.bf16 %v677_v14  ;;  %v680_v21 = vld [vmem:[#allocation2 + $0x308] sm:$0xff] }
 0x16f   :  { %855 = vmatprep.subr.bf16.mxu0 %v740_v22  ;;  %937 = vmatprep.subr.bf16.mxu1 %v742_v24  ;;  %v682_v22 = vld [vmem:[#allocation2 + $0x318] sm:$0xff]  ;;  %v780_v24 = vunpack.c.l.s8.bf16 %v680_v21  ;;  %v784_v1 = vunpack.c.h.s8.bf16 %v680_v21 }
 0x170   :  { %v782_v25 = vunpack.c.l.s8.bf16 %v682_v22  ;;  %v786_v2 = vunpack.c.h.s8.bf16 %v682_v22  ;;  %v687_v22 = vld [vmem:[#allocation2 + $0x340] sm:$0xff] }
 0x172   :  { %856 = vmatpush1.bf16.msra.mxu0 %v739_v27  ;;  %938 = vmatpush1.bf16.msra.mxu1 %v741_v28  ;;  %v4697_v27 = vld [vmem:[%s5768_s2 + $0x1] ss:$4 sm:$0xf]  ;;  %v592_v28 = vrot.slane %v293_v26, %v5309_v45 }
 0x173   :  { %857 = vmatprep.subr.bf16.mxu0 %v744_v29  ;;  %939 = vmatprep.subr.bf16.mxu1 %v746_v30  ;;  %v600_v29 = vrot.slane %v293_v26, %v5331_v23  ;;  %v596_v30 = vrot.slane %v293_v26, %v5317_v47  ;;  %v617_v32 = vrot.slane %v4697_v27, %v5309_v45 }
 0x174   :  { %v629_v37 = vrot.slane %v4697_v27, %v5320_v48 }
 0x176   :  { %858 = vmatpush1.bf16.msra.mxu0 %v743_v33  ;;  %940 = vmatpush1.bf16.msra.mxu1 %v745_v34  ;;  %v625_v33 = vrot.slane %v4697_v27, %v5331_v23 }
 0x177   :  { %859 = vmatprep.subr.bf16.mxu0 %v748_v35  ;;  %941 = vmatprep.subr.bf16.mxu1 %v750_v36  ;;  %v621_v36 = vrot.slane %v4697_v27, %v5317_v47 }
 0x17a   :  { %860 = vmatpush1.bf16.msra.mxu0 %v747_v39  ;;  %942 = vmatpush1.bf16.msra.mxu1 %v749_v40 }
 0x17b   :  { %861 = vmatprep.subr.bf16.mxu0 %v752_v41  ;;  %943 = vmatprep.subr.bf16.mxu1 %v754_v46 }
 0x17e   :  { %862 = vmatpush1.bf16.msra.mxu0 %v751_v49  ;;  %944 = vmatpush1.bf16.msra.mxu1 %v753_v50 }
 0x17f   :  { %863 = vmatprep.subr.bf16.mxu0 %v756_v51  ;;  %945 = vmatprep.subr.bf16.mxu1 %v758_v52 }
 0x182   :  { %864 = vmatpush1.bf16.msra.mxu0 %v755_v54  ;;  %946 = vmatpush1.bf16.msra.mxu1 %v757_v55 }
 0x183   :  { %865 = vmatprep.subr.bf16.mxu0 %v760_v56  ;;  %947 = vmatprep.subr.bf16.mxu1 %v762_v58  ;;  %v679_v56 = vld [vmem:[#allocation2 + $0x300] sm:$0xff]  ;;  %v681_v58 = vld [vmem:[#allocation2 + $0x310] sm:$0xff] }
 0x186   :  { %866 = vmatpush1.bf16.msra.mxu0 %v759_v61  ;;  %948 = vmatpush1.bf16.msra.mxu1 %v761_v62  ;;  %v779_v62 = vunpack.c.l.s8.bf16 %v679_v56 }
 0x187   :  { %867 = vmatprep.subr.bf16.mxu0 %v764_v63  ;;  %949 = vmatprep.subr.bf16.mxu1 %v766_v0  ;;  %v781_v63 = vunpack.c.l.s8.bf16 %v681_v58 }
 0x18a   :  { %868 = vmatpush1.bf16.msra.mxu0 %v763_v3  ;;  %950 = vmatpush1.bf16.msra.mxu1 %v765_v4  ;;  %v684_v3 = vld [vmem:[#allocation2 + $0x328] sm:$0xff]  ;;  %v686_v4 = vld [vmem:[#allocation2 + $0x338] sm:$0xff] }
 0x18b   :  { %869 = vmatprep.subr.bf16.mxu0 %v768_v5  ;;  %951 = vmatprep.subr.bf16.mxu1 %v770_v6  ;;  %v783_v6 = vunpack.c.h.s8.bf16 %v679_v56  ;;  %v790_v9 = vunpack.c.l.s8.bf16 %v686_v4  ;;  %v792_v14 = vunpack.c.h.s8.bf16 %v684_v3 }
 0x18e   :  { %870 = vmatpush1.bf16.msra.mxu0 %v767_v7  ;;  %952 = vmatpush1.bf16.msra.mxu1 %v769_v8  ;;  %v785_v7 = vunpack.c.h.s8.bf16 %v681_v58  ;;  %v788_v8 = vunpack.c.l.s8.bf16 %v684_v3  ;;  %v700_v58 = vld [vmem:[#allocation2 + $0x3a8] sm:$0xff] }
 0x18f   :  { %871 = vmatprep.subr.bf16.mxu0 %v772_v11  ;;  %953 = vmatprep.subr.bf16.mxu1 %v774_v12  ;;  %v685_v11 = vld [vmem:[#allocation2 + $0x330] sm:$0xff]  ;;  %v787_v12 = vunpack.c.l.s8.bf16 %v683_v10 }
 0x190   :  { %v789_v13 = vunpack.c.l.s8.bf16 %v685_v11 }
 0x192   :  { %872 = vmatpush1.bf16.msra.mxu0 %v771_v15  ;;  %954 = vmatpush1.bf16.msra.mxu1 %v773_v16  ;;  %v794_v15 = vunpack.c.h.s8.bf16 %v686_v4  ;;  %v688_v16 = vld [vmem:[#allocation2 + $0x348] sm:$0xff]  ;;  %v824_v4 = vunpack.c.h.s8.bf16 %v700_v58 }
 0x193   :  { %873 = vmatprep.subr.bf16.mxu0 %v776_v17  ;;  %955 = vmatprep.subr.bf16.mxu1 %v778_v18  ;;  %v690_v17 = vld [vmem:[#allocation2 + $0x358] sm:$0xff]  ;;  %v791_v18 = vunpack.c.h.s8.bf16 %v683_v10  ;;  %v800_v27 = vunpack.c.h.s8.bf16 %v688_v16 }
 0x194   :  { %v798_v21 = vunpack.c.l.s8.bf16 %v690_v17 }
 0x196   :  { %874 = vmatpush1.bf16.msra.mxu0 %v775_v19  ;;  %956 = vmatpush1.bf16.msra.mxu1 %v777_v20  ;;  %v793_v19 = vunpack.c.h.s8.bf16 %v685_v11  ;;  %v796_v20 = vunpack.c.l.s8.bf16 %v688_v16 }
 0x197   :  { %884 = vmatprep.subr.bf16.mxu0 %v780_v24  ;;  %966 = vmatprep.subr.bf16.mxu1 %v782_v25  ;;  %v689_v24 = vld [vmem:[#allocation2 + $0x350] sm:$0xff]  ;;  %v795_v25 = vunpack.c.l.s8.bf16 %v687_v22 }
 0x198   :  { %v797_v26 = vunpack.c.l.s8.bf16 %v689_v24 }
 0x22c   :  { %v499_v34 = vpop.f32.mrb[4].mxu0  ;;  %v581_v35 = vpop.f32.mrb[4].mxu1 }
 0x22d   :  { %v609_v38 = vmul.f32 %v592_v28, %v499_v34  ;;  %v611_v39 = vmul.f32 %v600_v29, %v581_v35  ;;  %v501_v40 = vpop.f32.mrb[5].mxu0  ;;  %v583_v41 = vpop.f32.mrb[5].mxu1  ;;  %v802_v28 = vunpack.c.h.s8.bf16 %v690_v17  ;;  %v692_v29 = vld [vmem:[#allocation2 + $0x368] sm:$0xff]  ;;  %v691_v35 = vld [vmem:[#allocation2 + $0x360] sm:$0xff] }
 0x22e   :  { %v610_v46 = vmul.f32 %v596_v30, %v501_v40  ;;  %v612_v42 = vmul.f32 %v604_v31, %v583_v41  ;;  %v503_v43 = vpop.f32.mrb[6].mxu0  ;;  %v585_v49 = vpop.f32.mrb[6].mxu1  ;;  %v694_v30 = vld [vmem:[#allocation2 + $0x378] sm:$0xff]  ;;  %v799_v31 = vunpack.c.h.s8.bf16 %v687_v22  ;;  %v696_v41 = vld [vmem:[#allocation2 + $0x388] sm:$0xff] }
 0x22f   :  { %v634_v50 = vadd.f32 %v617_v32, %v609_v38  ;;  %v5350_v51 = vadd.f32 %v625_v33, %v611_v39  ;;  %v504_v52 = vpop.f32.mrb[7].mxu0  ;;  %v586_v57 = vpop.f32.mrb[7].mxu1  ;;  %v801_v32 = vunpack.c.h.s8.bf16 %v689_v24  ;;  %v804_v33 = vunpack.c.l.s8.bf16 %v692_v29 }
 0x230   :  { %v635_v53 = vadd.f32 %v621_v36, %v610_v46  ;;  %v637_v54 = vadd.f32 %v629_v37, %v612_v42  ;;  %v806_v34 = vunpack.c.l.s8.bf16 %v694_v30  ;;  %v693_v36 = vld [vmem:[#allocation2 + $0x370] sm:$0xff]  ;;  %v803_v37 = vunpack.c.l.s8.bf16 %v691_v35  ;;  %v698_v46 = vld [vmem:[#allocation2 + $0x398] sm:$0xff]  ;;  %v695_v52 = vld [vmem:[#allocation2 + $0x380] sm:$0xff] }
 0x231   :  { %v638_v55 = vmax.f32 %v634_v50, 0.0  ;;  %v805_v38 = vunpack.c.l.s8.bf16 %v693_v36  ;;  %v808_v39 = vunpack.c.h.s8.bf16 %v692_v29  ;;  %v810_v40 = vunpack.c.h.s8.bf16 %v694_v30  ;;  %v697_v57 = vld [vmem:[#allocation2 + $0x390] sm:$0xff] }
 0x232   :  { %v639_v59 = vmax.f32 %v635_v53, 0.0  ;;  %v641_v60 = vmax.f32 %v637_v54, 0.0  ;;  %v807_v42 = vunpack.c.h.s8.bf16 %v691_v35  ;;  %v809_v43 = vunpack.c.h.s8.bf16 %v693_v36 }
 0x233   :  { %v642_v0 = vpack.c.bf16 %v638_v55, %v638_v55  ;;  %v812_v49 = vunpack.c.l.s8.bf16 %v696_v41  ;;  %v814_v50 = vunpack.c.l.s8.bf16 %v698_v46  ;;  %v811_v53 = vunpack.c.l.s8.bf16 %v695_v52 }
 0x234   :  { %v643_v61 = vpack.c.bf16 %v639_v59, %v639_v59  ;;  %v645_v5 = vpack.c.bf16 %v641_v60, %v641_v60  ;;  %v813_v54 = vunpack.c.l.s8.bf16 %v697_v57  ;;  %v816_v55 = vunpack.c.h.s8.bf16 %v696_v41  ;;  %v702_v59 = vld [vmem:[#allocation2 + $0x3b8] sm:$0xff] }
 0x235   :  { %v818_v56 = vunpack.c.h.s8.bf16 %v698_v46  ;;  %v815_v60 = vunpack.c.h.s8.bf16 %v695_v52  ;;  %v640_v35 = vmax.f32 %v5350_v51, 0.0 }
 0x236   :  { %875 = vmatprep.mubr.bf16.mxu0 %v643_v61  ;;  %957 = vmatprep.mubr.bf16.mxu1 %v643_v61  ;;  %v817_v61 = vunpack.c.h.s8.bf16 %v697_v57 }
 0x237   :  { %876 = vmatmul.mubr.bf16.vlgmr.msra.gmra.mrb[8].mxu0 %v642_v0  ;;  %958 = vmatmul.mubr.bf16.vlgmr.msra.gmra.mrb[8].mxu1 %v642_v0  ;;  %v699_v0 = vld [vmem:[#allocation2 + $0x3a0] sm:$0xff]  ;;  %v644_v46 = vpack.c.bf16 %v640_v35, %v640_v35  ;;  %v1089_v35 = vld [vmem:[#allocation2 + $0x4b8] sm:$0xff] }
 0x238   :  { %885 = vmatpush1.bf16.msra.mxu0 %v779_v62  ;;  %967 = vmatpush1.bf16.msra.mxu1 %v781_v63  ;;  %v820_v62 = vunpack.c.l.s8.bf16 %v700_v58  ;;  %v822_v63 = vunpack.c.l.s8.bf16 %v702_v59 }
 0x239   :  { %916 = vmatprep.mubr.bf16.mxu0 %v645_v5  ;;  %998 = vmatprep.mubr.bf16.mxu1 %v645_v5  ;;  %v826_v5 = vunpack.c.h.s8.bf16 %v702_v59 }
 0x23a   :  { %886 = vmatprep.subr.bf16.mxu0 %v784_v1  ;;  %968 = vmatprep.subr.bf16.mxu1 %v786_v2  ;;  %v701_v1 = vld [vmem:[#allocation2 + $0x3b0] sm:$0xff]  ;;  %v819_v2 = vunpack.c.l.s8.bf16 %v699_v0 }
 0x23b   :  { %v821_v3 = vunpack.c.l.s8.bf16 %v701_v1 }
 0x23c   :  { %887 = vmatpush1.bf16.msra.mxu0 %v783_v6  ;;  %969 = vmatpush1.bf16.msra.mxu1 %v785_v7  ;;  %v704_v6 = vld [vmem:[#allocation2 + $0x3c8] sm:$0xff]  ;;  %v706_v7 = vld [vmem:[#allocation2 + $0x3d8] sm:$0xff] }
 0x23d   :  { %888 = vmatprep.subr.bf16.mxu0 %v788_v8  ;;  %970 = vmatprep.subr.bf16.mxu1 %v790_v9  ;;  %v823_v8 = vunpack.c.h.s8.bf16 %v699_v0  ;;  %v825_v9 = vunpack.c.h.s8.bf16 %v701_v1  ;;  %v828_v10 = vunpack.c.l.s8.bf16 %v704_v6  ;;  %v830_v11 = vunpack.c.l.s8.bf16 %v706_v7 }
 0x23e   :  { %v832_v16 = vunpack.c.h.s8.bf16 %v704_v6  ;;  %v834_v17 = vunpack.c.h.s8.bf16 %v706_v7 }
 0x240   :  { %889 = vmatpush1.bf16.msra.mxu0 %v787_v12  ;;  %971 = vmatpush1.bf16.msra.mxu1 %v789_v13  ;;  %v703_v12 = vld [vmem:[#allocation2 + $0x3c0] sm:$0xff]  ;;  %v705_v13 = vld [vmem:[#allocation2 + $0x3d0] sm:$0xff] }
 0x241   :  { %890 = vmatprep.subr.bf16.mxu0 %v792_v14  ;;  %972 = vmatprep.subr.bf16.mxu1 %v794_v15  ;;  %v827_v14 = vunpack.c.l.s8.bf16 %v703_v12  ;;  %v829_v15 = vunpack.c.l.s8.bf16 %v705_v13 }
 0x244   :  { %891 = vmatpush1.bf16.msra.mxu0 %v791_v18  ;;  %973 = vmatpush1.bf16.msra.mxu1 %v793_v19  ;;  %v708_v18 = vld [vmem:[#allocation2 + $0x3e8] sm:$0xff]  ;;  %v710_v19 = vld [vmem:[#allocation2 + $0x3f8] sm:$0xff] }
 0x245   :  { %892 = vmatprep.subr.bf16.mxu0 %v796_v20  ;;  %974 = vmatprep.subr.bf16.mxu1 %v798_v21  ;;  %v831_v20 = vunpack.c.h.s8.bf16 %v703_v12  ;;  %v833_v21 = vunpack.c.h.s8.bf16 %v705_v13  ;;  %v836_v22 = vunpack.c.l.s8.bf16 %v708_v18  ;;  %v838_v24 = vunpack.c.l.s8.bf16 %v710_v19 }
 0x246   :  { %v840_v29 = vunpack.c.h.s8.bf16 %v708_v18  ;;  %v842_v30 = vunpack.c.h.s8.bf16 %v710_v19 }
 0x248   :  { %893 = vmatpush1.bf16.msra.mxu0 %v795_v25  ;;  %975 = vmatpush1.bf16.msra.mxu1 %v797_v26  ;;  %v707_v25 = vld [vmem:[#allocation2 + $0x3e0] sm:$0xff]  ;;  %v709_v26 = vld [vmem:[#allocation2 + $0x3f0] sm:$0xff] }
 0x249   :  { %894 = vmatprep.subr.bf16.mxu0 %v800_v27  ;;  %976 = vmatprep.subr.bf16.mxu1 %v802_v28  ;;  %v835_v27 = vunpack.c.l.s8.bf16 %v707_v25  ;;  %v837_v28 = vunpack.c.l.s8.bf16 %v709_v26 }
 0x24c   :  { %895 = vmatpush1.bf16.msra.mxu0 %v799_v31  ;;  %977 = vmatpush1.bf16.msra.mxu1 %v801_v32  ;;  %v1067_v31 = vld [vmem:[#allocation2 + $0x408] sm:$0xff]  ;;  %v1069_v32 = vld [vmem:[#allocation2 + $0x418] sm:$0xff] }
 0x24d   :  { %896 = vmatprep.subr.bf16.mxu0 %v804_v33  ;;  %978 = vmatprep.subr.bf16.mxu1 %v806_v34  ;;  %v839_v33 = vunpack.c.h.s8.bf16 %v707_v25  ;;  %v841_v34 = vunpack.c.h.s8.bf16 %v709_v26  ;;  %v1135_v36 = vunpack.c.l.s8.bf16 %v1067_v31 }
 0x250   :  { %897 = vmatpush1.bf16.msra.mxu0 %v803_v37  ;;  %979 = vmatpush1.bf16.msra.mxu1 %v805_v38  ;;  %v1137_v37 = vunpack.c.l.s8.bf16 %v1069_v32  ;;  %v1066_v38 = vld [vmem:[#allocation2 + $0x400] sm:$0xff] }
 0x251   :  { %898 = vmatprep.subr.bf16.mxu0 %v808_v39  ;;  %980 = vmatprep.subr.bf16.mxu1 %v810_v40  ;;  %v1068_v39 = vld [vmem:[#allocation2 + $0x410] sm:$0xff]  ;;  %v1134_v40 = vunpack.c.l.s8.bf16 %v1066_v38  ;;  %v1138_v51 = vunpack.c.h.s8.bf16 %v1066_v38 }
 0x252   :  { %v1136_v41 = vunpack.c.l.s8.bf16 %v1068_v39  ;;  %v1140_v52 = vunpack.c.h.s8.bf16 %v1068_v39  ;;  %v1177_v39 = vunpack.c.l.s8.bf16 %v1089_v35 }
 0x254   :  { %899 = vmatpush1.bf16.msra.mxu0 %v807_v42  ;;  %981 = vmatpush1.bf16.msra.mxu1 %v809_v43  ;;  %v1139_v42 = vunpack.c.h.s8.bf16 %v1067_v31  ;;  %v1141_v43 = vunpack.c.h.s8.bf16 %v1069_v32 }
 0x255   :  { %900 = vmatprep.subr.bf16.mxu0 %v812_v49  ;;  %982 = vmatprep.subr.bf16.mxu1 %v814_v50  ;;  %v1071_v49 = vld [vmem:[#allocation2 + $0x428] sm:$0xff]  ;;  %v1073_v50 = vld [vmem:[#allocation2 + $0x438] sm:$0xff] }
 0x256   :  { %v1143_v57 = vunpack.c.l.s8.bf16 %v1071_v49  ;;  %v1147_v59 = vunpack.c.h.s8.bf16 %v1071_v49  ;;  %v1181_v49 = vunpack.c.h.s8.bf16 %v1089_v35 }
 0x258   :  { %901 = vmatpush1.bf16.msra.mxu0 %v811_v53  ;;  %983 = vmatpush1.bf16.msra.mxu1 %v813_v54  ;;  %v1145_v53 = vunpack.c.l.s8.bf16 %v1073_v50  ;;  %v1070_v54 = vld [vmem:[#allocation2 + $0x420] sm:$0xff] }
 0x259   :  { %902 = vmatprep.subr.bf16.mxu0 %v816_v55  ;;  %984 = vmatprep.subr.bf16.mxu1 %v818_v56  ;;  %v1072_v55 = vld [vmem:[#allocation2 + $0x430] sm:$0xff]  ;;  %v1142_v56 = vunpack.c.l.s8.bf16 %v1070_v54 }
 0x25a   :  { %v1144_v58 = vunpack.c.l.s8.bf16 %v1072_v55  ;;  %v1148_v0 = vunpack.c.h.s8.bf16 %v1072_v55  ;;  %v1090_v55 = vld [vmem:[#allocation2 + $0x4c0] sm:$0xff] }
 0x25c   :  { %903 = vmatpush1.bf16.msra.mxu0 %v815_v60  ;;  %985 = vmatpush1.bf16.msra.mxu1 %v817_v61  ;;  %v1149_v60 = vunpack.c.h.s8.bf16 %v1073_v50  ;;  %v1075_v61 = vld [vmem:[#allocation2 + $0x448] sm:$0xff] }
 0x25d   :  { %904 = vmatprep.subr.bf16.mxu0 %v820_v62  ;;  %986 = vmatprep.subr.bf16.mxu1 %v822_v63  ;;  %v1077_v62 = vld [vmem:[#allocation2 + $0x458] sm:$0xff]  ;;  %v1146_v63 = vunpack.c.h.s8.bf16 %v1070_v54  ;;  %v1151_v1 = vunpack.c.l.s8.bf16 %v1075_v61  ;;  %v1155_v7 = vunpack.c.h.s8.bf16 %v1075_v61  ;;  %v1091_v50 = vld [vmem:[#allocation2 + $0x4c8] sm:$0xff] }
 0x260   :  { %905 = vmatpush1.bf16.msra.mxu0 %v819_v2  ;;  %987 = vmatpush1.bf16.msra.mxu1 %v821_v3  ;;  %v1153_v2 = vunpack.c.l.s8.bf16 %v1077_v62  ;;  %v1074_v3 = vld [vmem:[#allocation2 + $0x440] sm:$0xff] }
 0x261   :  { %906 = vmatprep.subr.bf16.mxu0 %v824_v4  ;;  %988 = vmatprep.subr.bf16.mxu1 %v826_v5  ;;  %v1076_v4 = vld [vmem:[#allocation2 + $0x450] sm:$0xff]  ;;  %v1150_v5 = vunpack.c.l.s8.bf16 %v1074_v3 }
 0x262   :  { %v1152_v6 = vunpack.c.l.s8.bf16 %v1076_v4  ;;  %v1156_v12 = vunpack.c.h.s8.bf16 %v1076_v4  ;;  %v1094_v4 = vld [vmem:[#allocation2 + $0x4e0] sm:$0xff] }
 0x264   :  { %907 = vmatpush1.bf16.msra.mxu0 %v823_v8  ;;  %989 = vmatpush1.bf16.msra.mxu1 %v825_v9  ;;  %v1157_v8 = vunpack.c.h.s8.bf16 %v1077_v62  ;;  %v1079_v9 = vld [vmem:[#allocation2 + $0x468] sm:$0xff]  ;;  %v1186_v62 = vunpack.c.h.s8.bf16 %v1090_v55 }
 0x265   :  { %908 = vmatprep.subr.bf16.mxu0 %v828_v10  ;;  %990 = vmatprep.subr.bf16.mxu1 %v830_v11  ;;  %v1081_v10 = vld [vmem:[#allocation2 + $0x478] sm:$0xff]  ;;  %v1154_v11 = vunpack.c.h.s8.bf16 %v1074_v3  ;;  %v1159_v13 = vunpack.c.l.s8.bf16 %v1079_v9  ;;  %v1163_v19 = vunpack.c.h.s8.bf16 %v1079_v9 }
 0x268   :  { %909 = vmatpush1.bf16.msra.mxu0 %v827_v14  ;;  %991 = vmatpush1.bf16.msra.mxu1 %v829_v15  ;;  %v1161_v14 = vunpack.c.l.s8.bf16 %v1081_v10  ;;  %v1078_v15 = vld [vmem:[#allocation2 + $0x460] sm:$0xff] }
 0x269   :  { %910 = vmatprep.subr.bf16.mxu0 %v832_v16  ;;  %992 = vmatprep.subr.bf16.mxu1 %v834_v17  ;;  %v1080_v16 = vld [vmem:[#allocation2 + $0x470] sm:$0xff]  ;;  %v1158_v17 = vunpack.c.l.s8.bf16 %v1078_v15 }
 0x26a   :  { %v1160_v18 = vunpack.c.l.s8.bf16 %v1080_v16  ;;  %v1164_v25 = vunpack.c.h.s8.bf16 %v1080_v16  ;;  %v4698_v16 = vld [vmem:[%s5770_s4 + $0x1] ss:$4 sm:$0xf] }
 0x26c   :  { %911 = vmatpush1.bf16.msra.mxu0 %v831_v20  ;;  %993 = vmatpush1.bf16.msra.mxu1 %v833_v21  ;;  %v1165_v20 = vunpack.c.h.s8.bf16 %v1081_v10  ;;  %v1083_v21 = vld [vmem:[#allocation2 + $0x488] sm:$0xff]  ;;  %v1194_v10 = vunpack.c.h.s8.bf16 %v1094_v4 }
 0x26d   :  { %912 = vmatprep.subr.bf16.mxu0 %v836_v22  ;;  %994 = vmatprep.subr.bf16.mxu1 %v838_v24  ;;  %v1085_v22 = vld [vmem:[#allocation2 + $0x498] sm:$0xff]  ;;  %v1162_v24 = vunpack.c.h.s8.bf16 %v1078_v15  ;;  %v1167_v26 = vunpack.c.l.s8.bf16 %v1083_v21  ;;  %v1171_v32 = vunpack.c.h.s8.bf16 %v1083_v21  ;;  %v1023_v21 = vrot.slane %v4698_v16, %v5320_v48 }
 0x270   :  { %913 = vmatpush1.bf16.msra.mxu0 %v835_v27  ;;  %995 = vmatpush1.bf16.msra.mxu1 %v837_v28  ;;  %v1169_v27 = vunpack.c.l.s8.bf16 %v1085_v22  ;;  %v1082_v28 = vld [vmem:[#allocation2 + $0x480] sm:$0xff] }
 0x271   :  { %914 = vmatprep.subr.bf16.mxu0 %v840_v29  ;;  %996 = vmatprep.subr.bf16.mxu1 %v842_v30  ;;  %v1084_v29 = vld [vmem:[#allocation2 + $0x490] sm:$0xff]  ;;  %v1166_v30 = vunpack.c.l.s8.bf16 %v1082_v28 }
 0x272   :  { %v1168_v31 = vunpack.c.l.s8.bf16 %v1084_v29 }
 0x274   :  { %915 = vmatpush1.bf16.msra.mxu0 %v839_v33  ;;  %997 = vmatpush1.bf16.msra.mxu1 %v841_v34  ;;  %v1173_v33 = vunpack.c.h.s8.bf16 %v1085_v22  ;;  %v1087_v34 = vld [vmem:[#allocation2 + $0x4a8] sm:$0xff] }
 0x275   :  { %1262 = vmatprep.subr.bf16.mxu0 %v1135_v36  ;;  %1344 = vmatprep.subr.bf16.mxu1 %v1137_v37  ;;  %v1170_v36 = vunpack.c.h.s8.bf16 %v1082_v28  ;;  %v1172_v37 = vunpack.c.h.s8.bf16 %v1084_v29  ;;  %v1175_v38 = vunpack.c.l.s8.bf16 %v1087_v34 }
 0x277   :  { %917 = vmatmul.mubr.bf16.vlgmr.msra.gmra.mrb[8].mxu0 %v644_v46  ;;  %999 = vmatmul.mubr.bf16.vlgmr.msra.gmra.mrb[8].mxu1 %v644_v46 }
 0x278   :  { %1263 = vmatpush1.bf16.msra.mxu0 %v1134_v40  ;;  %1345 = vmatpush1.bf16.msra.mxu1 %v1136_v41  ;;  %v1086_v40 = vld [vmem:[#allocation2 + $0x4a0] sm:$0xff]  ;;  %v1088_v41 = vld [vmem:[#allocation2 + $0x4b0] sm:$0xff] }
 0x279   :  { %1264 = vmatprep.subr.bf16.mxu0 %v1139_v42  ;;  %1346 = vmatprep.subr.bf16.mxu1 %v1141_v43  ;;  %v1174_v46 = vunpack.c.l.s8.bf16 %v1086_v40  ;;  %v1176_v42 = vunpack.c.l.s8.bf16 %v1088_v41  ;;  %v1179_v43 = vunpack.c.h.s8.bf16 %v1087_v34 }
 0x27c   :  { %1265 = vmatpush1.bf16.msra.mxu0 %v1138_v51  ;;  %1347 = vmatpush1.bf16.msra.mxu1 %v1140_v52  ;;  %v1093_v51 = vld [vmem:[#allocation2 + $0x4d8] sm:$0xff]  ;;  %v1178_v52 = vunpack.c.h.s8.bf16 %v1086_v40 }
 0x27d   :  { %1266 = vmatprep.subr.bf16.mxu0 %v1143_v57  ;;  %1348 = vmatprep.subr.bf16.mxu1 %v1145_v53  ;;  %v1180_v57 = vunpack.c.h.s8.bf16 %v1088_v41  ;;  %v1183_v53 = vunpack.c.l.s8.bf16 %v1091_v50  ;;  %v1185_v54 = vunpack.c.l.s8.bf16 %v1093_v51  ;;  %v1189_v61 = vunpack.c.h.s8.bf16 %v1093_v51 }
 0x280   :  { %1267 = vmatpush1.bf16.msra.mxu0 %v1142_v56  ;;  %1349 = vmatpush1.bf16.msra.mxu1 %v1144_v58  ;;  %v1092_v56 = vld [vmem:[#allocation2 + $0x4d0] sm:$0xff]  ;;  %v1182_v58 = vunpack.c.l.s8.bf16 %v1090_v55 }
 0x281   :  { %1268 = vmatprep.subr.bf16.mxu0 %v1147_v59  ;;  %1350 = vmatprep.subr.bf16.mxu1 %v1149_v60  ;;  %v1184_v59 = vunpack.c.l.s8.bf16 %v1092_v56  ;;  %v1187_v60 = vunpack.c.h.s8.bf16 %v1091_v50 }
 0x284   :  { %1269 = vmatpush1.bf16.msra.mxu0 %v1146_v63  ;;  %1351 = vmatpush1.bf16.msra.mxu1 %v1148_v0  ;;  %v1188_v63 = vunpack.c.h.s8.bf16 %v1092_v56  ;;  %v1095_v0 = vld [vmem:[#allocation2 + $0x4e8] sm:$0xff] }
 0x285   :  { %1270 = vmatprep.subr.bf16.mxu0 %v1151_v1  ;;  %1352 = vmatprep.subr.bf16.mxu1 %v1153_v2  ;;  %v1097_v1 = vld [vmem:[#allocation2 + $0x4f8] sm:$0xff]  ;;  %v1191_v2 = vunpack.c.l.s8.bf16 %v1095_v0 }
 0x286   :  { %v1193_v3 = vunpack.c.l.s8.bf16 %v1097_v1  ;;  %v1197_v9 = vunpack.c.h.s8.bf16 %v1097_v1  ;;  %v1102_v1 = vld [vmem:[#allocation2 + $0x520] sm:$0xff] }
 0x288   :  { %1271 = vmatpush1.bf16.msra.mxu0 %v1150_v5  ;;  %1353 = vmatpush1.bf16.msra.mxu1 %v1152_v6  ;;  %v1096_v5 = vld [vmem:[#allocation2 + $0x4f0] sm:$0xff]  ;;  %v1190_v6 = vunpack.c.l.s8.bf16 %v1094_v4 }
 0x289   :  { %1272 = vmatprep.subr.bf16.mxu0 %v1155_v7  ;;  %1354 = vmatprep.subr.bf16.mxu1 %v1157_v8  ;;  %v1192_v7 = vunpack.c.l.s8.bf16 %v1096_v5  ;;  %v1195_v8 = vunpack.c.h.s8.bf16 %v1095_v0 }
 0x28c   :  { %1273 = vmatpush1.bf16.msra.mxu0 %v1154_v11  ;;  %1355 = vmatpush1.bf16.msra.mxu1 %v1156_v12  ;;  %v1196_v11 = vunpack.c.h.s8.bf16 %v1096_v5  ;;  %v1099_v12 = vld [vmem:[#allocation2 + $0x508] sm:$0xff] }
 0x28d   :  { %1274 = vmatprep.subr.bf16.mxu0 %v1159_v13  ;;  %1356 = vmatprep.subr.bf16.mxu1 %v1161_v14  ;;  %v1101_v13 = vld [vmem:[#allocation2 + $0x518] sm:$0xff]  ;;  %v1199_v14 = vunpack.c.l.s8.bf16 %v1099_v12  ;;  %v1203_v55 = vunpack.c.h.s8.bf16 %v1099_v12 }
 0x28e   :  { %v1201_v15 = vunpack.c.l.s8.bf16 %v1101_v13  ;;  %v1205_v56 = vunpack.c.h.s8.bf16 %v1101_v13  ;;  %v1106_v13 = vld [vmem:[#allocation2 + $0x540] sm:$0xff] }
 0x290   :  { %1275 = vmatpush1.bf16.msra.mxu0 %v1158_v17  ;;  %1357 = vmatpush1.bf16.msra.mxu1 %v1160_v18  ;;  %v4699_v17 = vld [vmem:[%s5768_s2 + $0x2] ss:$4 sm:$0xf]  ;;  %v1011_v18 = vrot.slane %v4698_v16, %v5309_v45 }
 0x291   :  { %1276 = vmatprep.subr.bf16.mxu0 %v1163_v19  ;;  %1358 = vmatprep.subr.bf16.mxu1 %v1165_v20  ;;  %v1019_v19 = vrot.slane %v4698_v16, %v5331_v23  ;;  %v1015_v20 = vrot.slane %v4698_v16, %v5317_v47  ;;  %v1036_v22 = vrot.slane %v4699_v17, %v5309_v45 }
 0x292   :  { %v1048_v28 = vrot.slane %v4699_v17, %v5320_v48 }
 0x294   :  { %1277 = vmatpush1.bf16.msra.mxu0 %v1162_v24  ;;  %1359 = vmatpush1.bf16.msra.mxu1 %v1164_v25  ;;  %v1044_v24 = vrot.slane %v4699_v17, %v5331_v23 }
 0x295   :  { %1278 = vmatprep.subr.bf16.mxu0 %v1167_v26  ;;  %1360 = vmatprep.subr.bf16.mxu1 %v1169_v27  ;;  %v1040_v27 = vrot.slane %v4699_v17, %v5317_v47 }
 0x298   :  { %1279 = vmatpush1.bf16.msra.mxu0 %v1166_v30  ;;  %1361 = vmatpush1.bf16.msra.mxu1 %v1168_v31 }
 0x299   :  { %1280 = vmatprep.subr.bf16.mxu0 %v1171_v32  ;;  %1362 = vmatprep.subr.bf16.mxu1 %v1173_v33 }
 0x29c   :  { %1281 = vmatpush1.bf16.msra.mxu0 %v1170_v36  ;;  %1363 = vmatpush1.bf16.msra.mxu1 %v1172_v37 }
 0x29d   :  { %1282 = vmatprep.subr.bf16.mxu0 %v1175_v38  ;;  %1364 = vmatprep.subr.bf16.mxu1 %v1177_v39 }
 0x2a0   :  { %1283 = vmatpush1.bf16.msra.mxu0 %v1174_v46  ;;  %1365 = vmatpush1.bf16.msra.mxu1 %v1176_v42 }
 0x2a1   :  { %1284 = vmatprep.subr.bf16.mxu0 %v1179_v43  ;;  %1366 = vmatprep.subr.bf16.mxu1 %v1181_v49  ;;  %v1098_v43 = vld [vmem:[#allocation2 + $0x500] sm:$0xff]  ;;  %v1100_v49 = vld [vmem:[#allocation2 + $0x510] sm:$0xff] }
 0x2a4   :  { %1285 = vmatpush1.bf16.msra.mxu0 %v1178_v52  ;;  %1367 = vmatpush1.bf16.msra.mxu1 %v1180_v57  ;;  %v1198_v57 = vunpack.c.l.s8.bf16 %v1098_v43 }
 0x2a5   :  { %1286 = vmatprep.subr.bf16.mxu0 %v1183_v53  ;;  %1368 = vmatprep.subr.bf16.mxu1 %v1185_v54  ;;  %v1200_v53 = vunpack.c.l.s8.bf16 %v1100_v49 }
 0x2a8   :  { %1287 = vmatpush1.bf16.msra.mxu0 %v1182_v58  ;;  %1369 = vmatpush1.bf16.msra.mxu1 %v1184_v59  ;;  %v1103_v58 = vld [vmem:[#allocation2 + $0x528] sm:$0xff]  ;;  %v1105_v59 = vld [vmem:[#allocation2 + $0x538] sm:$0xff] }
 0x2a9   :  { %1288 = vmatprep.subr.bf16.mxu0 %v1187_v60  ;;  %1370 = vmatprep.subr.bf16.mxu1 %v1189_v61  ;;  %v1202_v61 = vunpack.c.h.s8.bf16 %v1098_v43  ;;  %v1209_v0 = vunpack.c.l.s8.bf16 %v1105_v59  ;;  %v1211_v5 = vunpack.c.h.s8.bf16 %v1103_v58 }
 0x2ac   :  { %1289 = vmatpush1.bf16.msra.mxu0 %v1186_v62  ;;  %1371 = vmatpush1.bf16.msra.mxu1 %v1188_v63  ;;  %v1204_v62 = vunpack.c.h.s8.bf16 %v1100_v49  ;;  %v1207_v63 = vunpack.c.l.s8.bf16 %v1103_v58  ;;  %v1119_v49 = vld [vmem:[#allocation2 + $0x5a8] sm:$0xff] }
 0x2ad   :  { %1290 = vmatprep.subr.bf16.mxu0 %v1191_v2  ;;  %1372 = vmatprep.subr.bf16.mxu1 %v1193_v3  ;;  %v1104_v2 = vld [vmem:[#allocation2 + $0x530] sm:$0xff]  ;;  %v1206_v3 = vunpack.c.l.s8.bf16 %v1102_v1 }
 0x2ae   :  { %v1208_v4 = vunpack.c.l.s8.bf16 %v1104_v2 }
 0x2b0   :  { %1291 = vmatpush1.bf16.msra.mxu0 %v1190_v6  ;;  %1373 = vmatpush1.bf16.msra.mxu1 %v1192_v7  ;;  %v1213_v6 = vunpack.c.h.s8.bf16 %v1105_v59  ;;  %v1107_v7 = vld [vmem:[#allocation2 + $0x548] sm:$0xff]  ;;  %v1243_v59 = vunpack.c.h.s8.bf16 %v1119_v49 }
 0x2b1   :  { %1292 = vmatprep.subr.bf16.mxu0 %v1195_v8  ;;  %1374 = vmatprep.subr.bf16.mxu1 %v1197_v9  ;;  %v1109_v8 = vld [vmem:[#allocation2 + $0x558] sm:$0xff]  ;;  %v1210_v9 = vunpack.c.h.s8.bf16 %v1102_v1  ;;  %v1219_v17 = vunpack.c.h.s8.bf16 %v1107_v7 }
 0x2b2   :  { %v1217_v12 = vunpack.c.l.s8.bf16 %v1109_v8 }
 0x2b4   :  { %1293 = vmatpush1.bf16.msra.mxu0 %v1194_v10  ;;  %1375 = vmatpush1.bf16.msra.mxu1 %v1196_v11  ;;  %v1212_v10 = vunpack.c.h.s8.bf16 %v1104_v2  ;;  %v1215_v11 = vunpack.c.l.s8.bf16 %v1107_v7 }
 0x2b5   :  { %1303 = vmatprep.subr.bf16.mxu0 %v1199_v14  ;;  %1385 = vmatprep.subr.bf16.mxu1 %v1201_v15  ;;  %v1108_v14 = vld [vmem:[#allocation2 + $0x550] sm:$0xff]  ;;  %v1214_v15 = vunpack.c.l.s8.bf16 %v1106_v13 }
 0x2b6   :  { %v1216_v16 = vunpack.c.l.s8.bf16 %v1108_v14 }
 0x34a   :  { %v918_v25 = vpop.f32.mrb[8].mxu0  ;;  %v1000_v26 = vpop.f32.mrb[8].mxu1 }
 0x34b   :  { %v1028_v29 = vmul.f32 %v1011_v18, %v918_v25  ;;  %v1030_v30 = vmul.f32 %v1019_v19, %v1000_v26  ;;  %v920_v31 = vpop.f32.mrb[9].mxu0  ;;  %v1002_v32 = vpop.f32.mrb[9].mxu1  ;;  %v1221_v18 = vunpack.c.h.s8.bf16 %v1109_v8  ;;  %v1111_v19 = vld [vmem:[#allocation2 + $0x568] sm:$0xff]  ;;  %v1110_v26 = vld [vmem:[#allocation2 + $0x560] sm:$0xff] }
 0x34c   :  { %v1029_v33 = vmul.f32 %v1015_v20, %v920_v31  ;;  %v1031_v34 = vmul.f32 %v1023_v21, %v1002_v32  ;;  %v922_v35 = vpop.f32.mrb[10].mxu0  ;;  %v1004_v36 = vpop.f32.mrb[10].mxu1  ;;  %v1113_v20 = vld [vmem:[#allocation2 + $0x578] sm:$0xff]  ;;  %v1218_v21 = vunpack.c.h.s8.bf16 %v1106_v13  ;;  %v1115_v32 = vld [vmem:[#allocation2 + $0x588] sm:$0xff] }
 0x34d   :  { %v1053_v37 = vadd.f32 %v1036_v22, %v1028_v29  ;;  %v5367_v38 = vadd.f32 %v1044_v24, %v1030_v30  ;;  %v923_v39 = vpop.f32.mrb[11].mxu0  ;;  %v1005_v40 = vpop.f32.mrb[11].mxu1  ;;  %v1220_v22 = vunpack.c.h.s8.bf16 %v1108_v14  ;;  %v1223_v24 = vunpack.c.l.s8.bf16 %v1111_v19 }
 0x34e   :  { %v1054_v41 = vadd.f32 %v1040_v27, %v1029_v33  ;;  %v1056_v46 = vadd.f32 %v1048_v28, %v1031_v34  ;;  %v1225_v25 = vunpack.c.l.s8.bf16 %v1113_v20  ;;  %v1112_v27 = vld [vmem:[#allocation2 + $0x570] sm:$0xff]  ;;  %v1222_v28 = vunpack.c.l.s8.bf16 %v1110_v26  ;;  %v1117_v33 = vld [vmem:[#allocation2 + $0x598] sm:$0xff]  ;;  %v1114_v39 = vld [vmem:[#allocation2 + $0x580] sm:$0xff] }
 0x34f   :  { %v1057_v42 = vmax.f32 %v1053_v37, 0.0  ;;  %v1224_v29 = vunpack.c.l.s8.bf16 %v1112_v27  ;;  %v1227_v30 = vunpack.c.h.s8.bf16 %v1111_v19  ;;  %v1229_v31 = vunpack.c.h.s8.bf16 %v1113_v20  ;;  %v1116_v40 = vld [vmem:[#allocation2 + $0x590] sm:$0xff] }
 0x350   :  { %v1058_v50 = vmax.f32 %v1054_v41, 0.0  ;;  %v1060_v51 = vmax.f32 %v1056_v46, 0.0  ;;  %v1226_v34 = vunpack.c.h.s8.bf16 %v1110_v26  ;;  %v1228_v35 = vunpack.c.h.s8.bf16 %v1112_v27 }
 0x351   :  { %v1061_v54 = vpack.c.bf16 %v1057_v42, %v1057_v42  ;;  %v1231_v36 = vunpack.c.l.s8.bf16 %v1115_v32  ;;  %v1233_v37 = vunpack.c.l.s8.bf16 %v1117_v33  ;;  %v1230_v41 = vunpack.c.l.s8.bf16 %v1114_v39 }
 0x352   :  { %v1062_v52 = vpack.c.bf16 %v1058_v50, %v1058_v50  ;;  %v1064_v60 = vpack.c.bf16 %v1060_v51, %v1060_v51  ;;  %v1232_v46 = vunpack.c.l.s8.bf16 %v1116_v40  ;;  %v1235_v42 = vunpack.c.h.s8.bf16 %v1115_v32  ;;  %v1121_v50 = vld [vmem:[#allocation2 + $0x5b8] sm:$0xff] }
 0x353   :  { %v1237_v43 = vunpack.c.h.s8.bf16 %v1117_v33  ;;  %v1234_v51 = vunpack.c.h.s8.bf16 %v1114_v39  ;;  %v1059_v26 = vmax.f32 %v5367_v38, 0.0 }
 0x354   :  { %1294 = vmatprep.mubr.bf16.mxu0 %v1062_v52  ;;  %1376 = vmatprep.mubr.bf16.mxu1 %v1062_v52  ;;  %v1236_v52 = vunpack.c.h.s8.bf16 %v1116_v40 }
 0x355   :  { %1295 = vmatmul.mubr.bf16.vlgmr.msra.gmra.mrb[12].mxu0 %v1061_v54  ;;  %1377 = vmatmul.mubr.bf16.vlgmr.msra.gmra.mrb[12].mxu1 %v1061_v54  ;;  %v1118_v54 = vld [vmem:[#allocation2 + $0x5a0] sm:$0xff]  ;;  %v1063_v33 = vpack.c.bf16 %v1059_v26, %v1059_v26  ;;  %v1527_v26 = vld [vmem:[#allocation5 + $0x158] sm:$0xff] }
 0x356   :  { %1304 = vmatpush1.bf16.msra.mxu0 %v1198_v57  ;;  %1386 = vmatpush1.bf16.msra.mxu1 %v1200_v53  ;;  %v1239_v57 = vunpack.c.l.s8.bf16 %v1119_v49  ;;  %v1241_v53 = vunpack.c.l.s8.bf16 %v1121_v50 }
 0x357   :  { %1335 = vmatprep.mubr.bf16.mxu0 %v1064_v60  ;;  %1417 = vmatprep.mubr.bf16.mxu1 %v1064_v60  ;;  %v1245_v60 = vunpack.c.h.s8.bf16 %v1121_v50 }
 0x358   :  { %1305 = vmatprep.subr.bf16.mxu0 %v1203_v55  ;;  %1387 = vmatprep.subr.bf16.mxu1 %v1205_v56  ;;  %v1120_v55 = vld [vmem:[#allocation2 + $0x5b0] sm:$0xff]  ;;  %v1238_v56 = vunpack.c.l.s8.bf16 %v1118_v54 }
 0x359   :  { %v1240_v58 = vunpack.c.l.s8.bf16 %v1120_v55 }
 0x35a   :  { %1306 = vmatpush1.bf16.msra.mxu0 %v1202_v61  ;;  %1388 = vmatpush1.bf16.msra.mxu1 %v1204_v62  ;;  %v1123_v61 = vld [vmem:[#allocation2 + $0x5c8] sm:$0xff]  ;;  %v1125_v62 = vld [vmem:[#allocation2 + $0x5d8] sm:$0xff] }
 0x35b   :  { %1307 = vmatprep.subr.bf16.mxu0 %v1207_v63  ;;  %1389 = vmatprep.subr.bf16.mxu1 %v1209_v0  ;;  %v1242_v63 = vunpack.c.h.s8.bf16 %v1118_v54  ;;  %v1244_v0 = vunpack.c.h.s8.bf16 %v1120_v55  ;;  %v1247_v1 = vunpack.c.l.s8.bf16 %v1123_v61  ;;  %v1249_v2 = vunpack.c.l.s8.bf16 %v1125_v62 }
 0x35c   :  { %v1251_v7 = vunpack.c.h.s8.bf16 %v1123_v61  ;;  %v1253_v8 = vunpack.c.h.s8.bf16 %v1125_v62 }
 0x35e   :  { %1308 = vmatpush1.bf16.msra.mxu0 %v1206_v3  ;;  %1390 = vmatpush1.bf16.msra.mxu1 %v1208_v4  ;;  %v1122_v3 = vld [vmem:[#allocation2 + $0x5c0] sm:$0xff]  ;;  %v1124_v4 = vld [vmem:[#allocation2 + $0x5d0] sm:$0xff] }
 0x35f   :  { %1309 = vmatprep.subr.bf16.mxu0 %v1211_v5  ;;  %1391 = vmatprep.subr.bf16.mxu1 %v1213_v6  ;;  %v1246_v5 = vunpack.c.l.s8.bf16 %v1122_v3  ;;  %v1248_v6 = vunpack.c.l.s8.bf16 %v1124_v4 }
 0x362   :  { %1310 = vmatpush1.bf16.msra.mxu0 %v1210_v9  ;;  %1392 = vmatpush1.bf16.msra.mxu1 %v1212_v10  ;;  %v1127_v9 = vld [vmem:[#allocation2 + $0x5e8] sm:$0xff]  ;;  %v1129_v10 = vld [vmem:[#allocation2 + $0x5f8] sm:$0xff] }
 0x363   :  { %1311 = vmatprep.subr.bf16.mxu0 %v1215_v11  ;;  %1393 = vmatprep.subr.bf16.mxu1 %v1217_v12  ;;  %v1250_v11 = vunpack.c.h.s8.bf16 %v1122_v3  ;;  %v1252_v12 = vunpack.c.h.s8.bf16 %v1124_v4  ;;  %v1255_v13 = vunpack.c.l.s8.bf16 %v1127_v9  ;;  %v1257_v14 = vunpack.c.l.s8.bf16 %v1129_v10 }
 0x364   :  { %v1259_v19 = vunpack.c.h.s8.bf16 %v1127_v9  ;;  %v1261_v20 = vunpack.c.h.s8.bf16 %v1129_v10 }
 0x366   :  { %1312 = vmatpush1.bf16.msra.mxu0 %v1214_v15  ;;  %1394 = vmatpush1.bf16.msra.mxu1 %v1216_v16  ;;  %v1126_v15 = vld [vmem:[#allocation2 + $0x5e0] sm:$0xff]  ;;  %v1128_v16 = vld [vmem:[#allocation2 + $0x5f0] sm:$0xff] }
 0x367   :  { %1313 = vmatprep.subr.bf16.mxu0 %v1219_v17  ;;  %1395 = vmatprep.subr.bf16.mxu1 %v1221_v18  ;;  %v1254_v17 = vunpack.c.l.s8.bf16 %v1126_v15  ;;  %v1256_v18 = vunpack.c.l.s8.bf16 %v1128_v16 }
 0x36a   :  { %1314 = vmatpush1.bf16.msra.mxu0 %v1218_v21  ;;  %1396 = vmatpush1.bf16.msra.mxu1 %v1220_v22  ;;  %v1485_v21 = vld [vmem:[#allocation5 + $0x8] sm:$0xff]  ;;  %v1487_v22 = vld [vmem:[#allocation5 + $0x18] sm:$0xff] }
 0x36b   :  { %1315 = vmatprep.subr.bf16.mxu0 %v1223_v24  ;;  %1397 = vmatprep.subr.bf16.mxu1 %v1225_v25  ;;  %v1258_v24 = vunpack.c.h.s8.bf16 %v1126_v15  ;;  %v1260_v25 = vunpack.c.h.s8.bf16 %v1128_v16  ;;  %v1615_v27 = vunpack.c.l.s8.bf16 %v1485_v21 }
 0x36e   :  { %1316 = vmatpush1.bf16.msra.mxu0 %v1222_v28  ;;  %1398 = vmatpush1.bf16.msra.mxu1 %v1224_v29  ;;  %v1617_v28 = vunpack.c.l.s8.bf16 %v1487_v22  ;;  %v1484_v29 = vld [vmem:[#allocation5] sm:$0xff] }
 0x36f   :  { %1317 = vmatprep.subr.bf16.mxu0 %v1227_v30  ;;  %1399 = vmatprep.subr.bf16.mxu1 %v1229_v31  ;;  %v1486_v30 = vld [vmem:[#allocation5 + $0x10] sm:$0xff]  ;;  %v1614_v31 = vunpack.c.l.s8.bf16 %v1484_v29  ;;  %v1622_v38 = vunpack.c.h.s8.bf16 %v1484_v29 }
 0x370   :  { %v1616_v32 = vunpack.c.l.s8.bf16 %v1486_v30  ;;  %v1624_v39 = vunpack.c.h.s8.bf16 %v1486_v30  ;;  %v1697_v30 = vunpack.c.l.s8.bf16 %v1527_v26 }
 0x372   :  { %1318 = vmatpush1.bf16.msra.mxu0 %v1226_v34  ;;  %1400 = vmatpush1.bf16.msra.mxu1 %v1228_v35  ;;  %v1623_v34 = vunpack.c.h.s8.bf16 %v1485_v21  ;;  %v1625_v35 = vunpack.c.h.s8.bf16 %v1487_v22 }
 0x373   :  { %1319 = vmatprep.subr.bf16.mxu0 %v1231_v36  ;;  %1401 = vmatprep.subr.bf16.mxu1 %v1233_v37  ;;  %v1493_v36 = vld [vmem:[#allocation5 + $0x48] sm:$0xff]  ;;  %v1495_v37 = vld [vmem:[#allocation5 + $0x58] sm:$0xff] }
 0x374   :  { %v1631_v40 = vunpack.c.l.s8.bf16 %v1493_v36  ;;  %v1639_v50 = vunpack.c.h.s8.bf16 %v1493_v36  ;;  %v1705_v36 = vunpack.c.h.s8.bf16 %v1527_v26 }
 0x376   :  { %1320 = vmatpush1.bf16.msra.mxu0 %v1230_v41  ;;  %1402 = vmatpush1.bf16.msra.mxu1 %v1232_v46  ;;  %v1633_v41 = vunpack.c.l.s8.bf16 %v1495_v37  ;;  %v1492_v46 = vld [vmem:[#allocation5 + $0x40] sm:$0xff] }
 0x377   :  { %1321 = vmatprep.subr.bf16.mxu0 %v1235_v42  ;;  %1403 = vmatprep.subr.bf16.mxu1 %v1237_v43  ;;  %v1494_v42 = vld [vmem:[#allocation5 + $0x50] sm:$0xff]  ;;  %v1630_v43 = vunpack.c.l.s8.bf16 %v1492_v46 }
 0x378   :  { %v1632_v49 = vunpack.c.l.s8.bf16 %v1494_v42  ;;  %v1640_v54 = vunpack.c.h.s8.bf16 %v1494_v42  ;;  %v1532_v42 = vld [vmem:[#allocation5 + $0x180] sm:$0xff] }
 0x37a   :  { %1322 = vmatpush1.bf16.msra.mxu0 %v1234_v51  ;;  %1404 = vmatpush1.bf16.msra.mxu1 %v1236_v52  ;;  %v1641_v51 = vunpack.c.h.s8.bf16 %v1495_v37  ;;  %v1501_v52 = vld [vmem:[#allocation5 + $0x88] sm:$0xff] }
 0x37b   :  { %1323 = vmatprep.subr.bf16.mxu0 %v1239_v57  ;;  %1405 = vmatprep.subr.bf16.mxu1 %v1241_v53  ;;  %v1503_v57 = vld [vmem:[#allocation5 + $0x98] sm:$0xff]  ;;  %v1638_v53 = vunpack.c.h.s8.bf16 %v1492_v46  ;;  %v1647_v55 = vunpack.c.l.s8.bf16 %v1501_v52  ;;  %v1655_v62 = vunpack.c.h.s8.bf16 %v1501_v52  ;;  %v1533_v37 = vld [vmem:[#allocation5 + $0x188] sm:$0xff] }
 0x37e   :  { %1324 = vmatpush1.bf16.msra.mxu0 %v1238_v56  ;;  %1406 = vmatpush1.bf16.msra.mxu1 %v1240_v58  ;;  %v1649_v56 = vunpack.c.l.s8.bf16 %v1503_v57  ;;  %v1500_v58 = vld [vmem:[#allocation5 + $0x80] sm:$0xff] }
 0x37f   :  { %1325 = vmatprep.subr.bf16.mxu0 %v1243_v59  ;;  %1407 = vmatprep.subr.bf16.mxu1 %v1245_v60  ;;  %v1502_v59 = vld [vmem:[#allocation5 + $0x90] sm:$0xff]  ;;  %v1646_v60 = vunpack.c.l.s8.bf16 %v1500_v58 }
 0x380   :  { %v1648_v61 = vunpack.c.l.s8.bf16 %v1502_v59  ;;  %v1656_v3 = vunpack.c.h.s8.bf16 %v1502_v59  ;;  %v1540_v59 = vld [vmem:[#allocation5 + $0x1c0] sm:$0xff] }
 0x382   :  { %1326 = vmatpush1.bf16.msra.mxu0 %v1242_v63  ;;  %1408 = vmatpush1.bf16.msra.mxu1 %v1244_v0  ;;  %v1657_v63 = vunpack.c.h.s8.bf16 %v1503_v57  ;;  %v1509_v0 = vld [vmem:[#allocation5 + $0xc8] sm:$0xff]  ;;  %v1718_v57 = vunpack.c.h.s8.bf16 %v1532_v42 }
 0x383   :  { %1327 = vmatprep.subr.bf16.mxu0 %v1247_v1  ;;  %1409 = vmatprep.subr.bf16.mxu1 %v1249_v2  ;;  %v1511_v1 = vld [vmem:[#allocation5 + $0xd8] sm:$0xff]  ;;  %v1654_v2 = vunpack.c.h.s8.bf16 %v1500_v58  ;;  %v1663_v4 = vunpack.c.l.s8.bf16 %v1509_v0  ;;  %v1671_v10 = vunpack.c.h.s8.bf16 %v1509_v0 }
 0x386   :  { %1328 = vmatpush1.bf16.msra.mxu0 %v1246_v5  ;;  %1410 = vmatpush1.bf16.msra.mxu1 %v1248_v6  ;;  %v1665_v5 = vunpack.c.l.s8.bf16 %v1511_v1  ;;  %v1508_v6 = vld [vmem:[#allocation5 + $0xc0] sm:$0xff] }
 0x387   :  { %1329 = vmatprep.subr.bf16.mxu0 %v1251_v7  ;;  %1411 = vmatprep.subr.bf16.mxu1 %v1253_v8  ;;  %v1510_v7 = vld [vmem:[#allocation5 + $0xd0] sm:$0xff]  ;;  %v1662_v8 = vunpack.c.l.s8.bf16 %v1508_v6 }
 0x388   :  { %v1664_v9 = vunpack.c.l.s8.bf16 %v1510_v7  ;;  %v1672_v15 = vunpack.c.h.s8.bf16 %v1510_v7  ;;  %v4700_v7 = vld [vmem:[%s5770_s4 + $0x2] ss:$4 sm:$0xf] }
 0x38a   :  { %1330 = vmatpush1.bf16.msra.mxu0 %v1250_v11  ;;  %1412 = vmatpush1.bf16.msra.mxu1 %v1252_v12  ;;  %v1673_v11 = vunpack.c.h.s8.bf16 %v1511_v1  ;;  %v1517_v12 = vld [vmem:[#allocation5 + $0x108] sm:$0xff]  ;;  %v1734_v1 = vunpack.c.h.s8.bf16 %v1540_v59 }
 0x38b   :  { %1331 = vmatprep.subr.bf16.mxu0 %v1255_v13  ;;  %1413 = vmatprep.subr.bf16.mxu1 %v1257_v14  ;;  %v1519_v13 = vld [vmem:[#allocation5 + $0x118] sm:$0xff]  ;;  %v1670_v14 = vunpack.c.h.s8.bf16 %v1508_v6  ;;  %v1679_v16 = vunpack.c.l.s8.bf16 %v1517_v12  ;;  %v1687_v22 = vunpack.c.h.s8.bf16 %v1517_v12  ;;  %v1442_v12 = vrot.slane %v4700_v7, %v5320_v48 }
 0x38e   :  { %1332 = vmatpush1.bf16.msra.mxu0 %v1254_v17  ;;  %1414 = vmatpush1.bf16.msra.mxu1 %v1256_v18  ;;  %v1681_v17 = vunpack.c.l.s8.bf16 %v1519_v13  ;;  %v1516_v18 = vld [vmem:[#allocation5 + $0x100] sm:$0xff] }
 0x38f   :  { %1333 = vmatprep.subr.bf16.mxu0 %v1259_v19  ;;  %1415 = vmatprep.subr.bf16.mxu1 %v1261_v20  ;;  %v1518_v19 = vld [vmem:[#allocation5 + $0x110] sm:$0xff]  ;;  %v1678_v20 = vunpack.c.l.s8.bf16 %v1516_v18 }
 0x390   :  { %v1680_v21 = vunpack.c.l.s8.bf16 %v1518_v19 }
 0x392   :  { %1334 = vmatpush1.bf16.msra.mxu0 %v1258_v24  ;;  %1416 = vmatpush1.bf16.msra.mxu1 %v1260_v25  ;;  %v1689_v24 = vunpack.c.h.s8.bf16 %v1519_v13  ;;  %v1525_v25 = vld [vmem:[#allocation5 + $0x148] sm:$0xff] }
 0x393   :  { %1870 = vmatprep.subr.bf16.mxu0 %v1615_v27  ;;  %1952 = vmatprep.subr.bf16.mxu1 %v1617_v28  ;;  %v1686_v27 = vunpack.c.h.s8.bf16 %v1516_v18  ;;  %v1688_v28 = vunpack.c.h.s8.bf16 %v1518_v19  ;;  %v1695_v29 = vunpack.c.l.s8.bf16 %v1525_v25 }
 0x395   :  { %1336 = vmatmul.mubr.bf16.vlgmr.msra.gmra.mrb[12].mxu0 %v1063_v33  ;;  %1418 = vmatmul.mubr.bf16.vlgmr.msra.gmra.mrb[12].mxu1 %v1063_v33 }
 0x396   :  { %1871 = vmatpush1.bf16.msra.mxu0 %v1614_v31  ;;  %1953 = vmatpush1.bf16.msra.mxu1 %v1616_v32  ;;  %v1524_v31 = vld [vmem:[#allocation5 + $0x140] sm:$0xff]  ;;  %v1526_v32 = vld [vmem:[#allocation5 + $0x150] sm:$0xff] }
 0x397   :  { %1872 = vmatprep.subr.bf16.mxu0 %v1623_v34  ;;  %1954 = vmatprep.subr.bf16.mxu1 %v1625_v35  ;;  %v1694_v33 = vunpack.c.l.s8.bf16 %v1524_v31  ;;  %v1696_v34 = vunpack.c.l.s8.bf16 %v1526_v32  ;;  %v1703_v35 = vunpack.c.h.s8.bf16 %v1525_v25 }
 0x39a   :  { %1873 = vmatpush1.bf16.msra.mxu0 %v1622_v38  ;;  %1955 = vmatpush1.bf16.msra.mxu1 %v1624_v39  ;;  %v1535_v38 = vld [vmem:[#allocation5 + $0x198] sm:$0xff]  ;;  %v1702_v39 = vunpack.c.h.s8.bf16 %v1524_v31 }
 0x39b   :  { %1874 = vmatprep.subr.bf16.mxu0 %v1631_v40  ;;  %1956 = vmatprep.subr.bf16.mxu1 %v1633_v41  ;;  %v1704_v40 = vunpack.c.h.s8.bf16 %v1526_v32  ;;  %v1711_v41 = vunpack.c.l.s8.bf16 %v1533_v37  ;;  %v1713_v46 = vunpack.c.l.s8.bf16 %v1535_v38  ;;  %v1721_v52 = vunpack.c.h.s8.bf16 %v1535_v38 }
 0x39e   :  { %1875 = vmatpush1.bf16.msra.mxu0 %v1630_v43  ;;  %1957 = vmatpush1.bf16.msra.mxu1 %v1632_v49  ;;  %v1534_v43 = vld [vmem:[#allocation5 + $0x190] sm:$0xff]  ;;  %v1710_v49 = vunpack.c.l.s8.bf16 %v1532_v42 }
 0x39f   :  { %1876 = vmatprep.subr.bf16.mxu0 %v1639_v50  ;;  %1958 = vmatprep.subr.bf16.mxu1 %v1641_v51  ;;  %v1712_v50 = vunpack.c.l.s8.bf16 %v1534_v43  ;;  %v1719_v51 = vunpack.c.h.s8.bf16 %v1533_v37 }
 0x3a2   :  { %1877 = vmatpush1.bf16.msra.mxu0 %v1638_v53  ;;  %1959 = vmatpush1.bf16.msra.mxu1 %v1640_v54  ;;  %v1720_v53 = vunpack.c.h.s8.bf16 %v1534_v43  ;;  %v1541_v54 = vld [vmem:[#allocation5 + $0x1c8] sm:$0xff] }
 0x3a3   :  { %1878 = vmatprep.subr.bf16.mxu0 %v1647_v55  ;;  %1960 = vmatprep.subr.bf16.mxu1 %v1649_v56  ;;  %v1543_v55 = vld [vmem:[#allocation5 + $0x1d8] sm:$0xff]  ;;  %v1727_v56 = vunpack.c.l.s8.bf16 %v1541_v54 }
 0x3a4   :  { %v1729_v58 = vunpack.c.l.s8.bf16 %v1543_v55  ;;  %v1737_v0 = vunpack.c.h.s8.bf16 %v1543_v55  ;;  %v1556_v55 = vld [vmem:[#allocation5 + $0x240] sm:$0xff] }
 0x3a6   :  { %1879 = vmatpush1.bf16.msra.mxu0 %v1646_v60  ;;  %1961 = vmatpush1.bf16.msra.mxu1 %v1648_v61  ;;  %v1542_v60 = vld [vmem:[#allocation5 + $0x1d0] sm:$0xff]  ;;  %v1726_v61 = vunpack.c.l.s8.bf16 %v1540_v59 }
 0x3a7   :  { %1880 = vmatprep.subr.bf16.mxu0 %v1655_v62  ;;  %1962 = vmatprep.subr.bf16.mxu1 %v1657_v63  ;;  %v1728_v62 = vunpack.c.l.s8.bf16 %v1542_v60  ;;  %v1735_v63 = vunpack.c.h.s8.bf16 %v1541_v54 }
 0x3aa   :  { %1881 = vmatpush1.bf16.msra.mxu0 %v1654_v2  ;;  %1963 = vmatpush1.bf16.msra.mxu1 %v1656_v3  ;;  %v1736_v2 = vunpack.c.h.s8.bf16 %v1542_v60  ;;  %v1549_v3 = vld [vmem:[#allocation5 + $0x208] sm:$0xff] }
 0x3ab   :  { %1882 = vmatprep.subr.bf16.mxu0 %v1663_v4  ;;  %1964 = vmatprep.subr.bf16.mxu1 %v1665_v5  ;;  %v1551_v4 = vld [vmem:[#allocation5 + $0x218] sm:$0xff]  ;;  %v1743_v5 = vunpack.c.l.s8.bf16 %v1549_v3  ;;  %v1751_v42 = vunpack.c.h.s8.bf16 %v1549_v3 }
 0x3ac   :  { %v1745_v6 = vunpack.c.l.s8.bf16 %v1551_v4  ;;  %v1753_v43 = vunpack.c.h.s8.bf16 %v1551_v4  ;;  %v1564_v4 = vld [vmem:[#allocation5 + $0x280] sm:$0xff] }
 0x3ae   :  { %1883 = vmatpush1.bf16.msra.mxu0 %v1662_v8  ;;  %1965 = vmatpush1.bf16.msra.mxu1 %v1664_v9  ;;  %v4701_v8 = vld [vmem:[%s5768_s2 + $0x3] ss:$4 sm:$0xf]  ;;  %v1430_v9 = vrot.slane %v4700_v7, %v5309_v45 }
 0x3af   :  { %1884 = vmatprep.subr.bf16.mxu0 %v1671_v10  ;;  %1966 = vmatprep.subr.bf16.mxu1 %v1673_v11  ;;  %v1438_v10 = vrot.slane %v4700_v7, %v5331_v23  ;;  %v1434_v11 = vrot.slane %v4700_v7, %v5317_v47  ;;  %v1455_v13 = vrot.slane %v4701_v8, %v5309_v45 }
 0x3b0   :  { %v1467_v18 = vrot.slane %v4701_v8, %v5320_v48 }
 0x3b2   :  { %1885 = vmatpush1.bf16.msra.mxu0 %v1670_v14  ;;  %1967 = vmatpush1.bf16.msra.mxu1 %v1672_v15  ;;  %v1463_v14 = vrot.slane %v4701_v8, %v5331_v23 }
 0x3b3   :  { %1886 = vmatprep.subr.bf16.mxu0 %v1679_v16  ;;  %1968 = vmatprep.subr.bf16.mxu1 %v1681_v17  ;;  %v1459_v17 = vrot.slane %v4701_v8, %v5317_v47 }
 0x3b6   :  { %1887 = vmatpush1.bf16.msra.mxu0 %v1678_v20  ;;  %1969 = vmatpush1.bf16.msra.mxu1 %v1680_v21 }
 0x3b7   :  { %1888 = vmatprep.subr.bf16.mxu0 %v1687_v22  ;;  %1970 = vmatprep.subr.bf16.mxu1 %v1689_v24 }
 0x3ba   :  { %1889 = vmatpush1.bf16.msra.mxu0 %v1686_v27  ;;  %1971 = vmatpush1.bf16.msra.mxu1 %v1688_v28 }
 0x3bb   :  { %1890 = vmatprep.subr.bf16.mxu0 %v1695_v29  ;;  %1972 = vmatprep.subr.bf16.mxu1 %v1697_v30 }
 0x3be   :  { %1891 = vmatpush1.bf16.msra.mxu0 %v1694_v33  ;;  %1973 = vmatpush1.bf16.msra.mxu1 %v1696_v34 }
 0x3bf   :  { %1892 = vmatprep.subr.bf16.mxu0 %v1703_v35  ;;  %1974 = vmatprep.subr.bf16.mxu1 %v1705_v36  ;;  %v1548_v35 = vld [vmem:[#allocation5 + $0x200] sm:$0xff]  ;;  %v1550_v36 = vld [vmem:[#allocation5 + $0x210] sm:$0xff] }
 0x3c2   :  { %1893 = vmatpush1.bf16.msra.mxu0 %v1702_v39  ;;  %1975 = vmatpush1.bf16.msra.mxu1 %v1704_v40  ;;  %v1742_v40 = vunpack.c.l.s8.bf16 %v1548_v35 }
 0x3c3   :  { %1894 = vmatprep.subr.bf16.mxu0 %v1711_v41  ;;  %1976 = vmatprep.subr.bf16.mxu1 %v1713_v46  ;;  %v1744_v41 = vunpack.c.l.s8.bf16 %v1550_v36 }
 0x3c6   :  { %1895 = vmatpush1.bf16.msra.mxu0 %v1710_v49  ;;  %1977 = vmatpush1.bf16.msra.mxu1 %v1712_v50  ;;  %v1557_v49 = vld [vmem:[#allocation5 + $0x248] sm:$0xff]  ;;  %v1559_v50 = vld [vmem:[#allocation5 + $0x258] sm:$0xff] }
 0x3c7   :  { %1896 = vmatprep.subr.bf16.mxu0 %v1719_v51  ;;  %1978 = vmatprep.subr.bf16.mxu1 %v1721_v52  ;;  %v1750_v52 = vunpack.c.h.s8.bf16 %v1548_v35  ;;  %v1761_v54 = vunpack.c.l.s8.bf16 %v1559_v50  ;;  %v1767_v60 = vunpack.c.h.s8.bf16 %v1557_v49 }
 0x3ca   :  { %1897 = vmatpush1.bf16.msra.mxu0 %v1718_v57  ;;  %1979 = vmatpush1.bf16.msra.mxu1 %v1720_v53  ;;  %v1752_v57 = vunpack.c.h.s8.bf16 %v1550_v36  ;;  %v1759_v53 = vunpack.c.l.s8.bf16 %v1557_v49  ;;  %v1589_v36 = vld [vmem:[#allocation5 + $0x348] sm:$0xff]  ;;  %v1590_v49 = vld [vmem:[#allocation5 + $0x350] sm:$0xff] }
 0x3cb   :  { %1898 = vmatprep.subr.bf16.mxu0 %v1727_v56  ;;  %1980 = vmatprep.subr.bf16.mxu1 %v1729_v58  ;;  %v1558_v56 = vld [vmem:[#allocation5 + $0x250] sm:$0xff]  ;;  %v1758_v58 = vunpack.c.l.s8.bf16 %v1556_v55 }
 0x3cc   :  { %v1760_v59 = vunpack.c.l.s8.bf16 %v1558_v56 }
 0x3ce   :  { %1899 = vmatpush1.bf16.msra.mxu0 %v1726_v61  ;;  %1981 = vmatpush1.bf16.msra.mxu1 %v1728_v62  ;;  %v1769_v61 = vunpack.c.h.s8.bf16 %v1559_v50  ;;  %v1565_v62 = vld [vmem:[#allocation5 + $0x288] sm:$0xff] }
 0x3cf   :  { %1900 = vmatprep.subr.bf16.mxu0 %v1735_v63  ;;  %1982 = vmatprep.subr.bf16.mxu1 %v1737_v0  ;;  %v1567_v63 = vld [vmem:[#allocation5 + $0x298] sm:$0xff]  ;;  %v1766_v0 = vunpack.c.h.s8.bf16 %v1556_v55  ;;  %v1783_v8 = vunpack.c.h.s8.bf16 %v1565_v62 }
 0x3d0   :  { %v1777_v3 = vunpack.c.l.s8.bf16 %v1567_v63  ;;  %v1599_v55 = vld [vmem:[#allocation5 + $0x398] sm:$0xff] }
 0x3d2   :  { %1901 = vmatpush1.bf16.msra.mxu0 %v1734_v1  ;;  %1983 = vmatpush1.bf16.msra.mxu1 %v1736_v2  ;;  %v1768_v1 = vunpack.c.h.s8.bf16 %v1558_v56  ;;  %v1775_v2 = vunpack.c.l.s8.bf16 %v1565_v62  ;;  %v1598_v62 = vld [vmem:[#allocation5 + $0x390] sm:$0xff] }
 0x3d3   :  { %1911 = vmatprep.subr.bf16.mxu0 %v1743_v5  ;;  %1993 = vmatprep.subr.bf16.mxu1 %v1745_v6  ;;  %v1566_v5 = vld [vmem:[#allocation5 + $0x290] sm:$0xff]  ;;  %v1774_v6 = vunpack.c.l.s8.bf16 %v1564_v4 }
 0x3d4   :  { %v1776_v7 = vunpack.c.l.s8.bf16 %v1566_v5 }
 0x468   :  { %v1337_v15 = vpop.f32.mrb[12].mxu0  ;;  %v1419_v16 = vpop.f32.mrb[12].mxu1 }
 0x469   :  { %v1447_v19 = vmul.f32 %v1430_v9, %v1337_v15  ;;  %v1449_v20 = vmul.f32 %v1438_v10, %v1419_v16  ;;  %v1339_v21 = vpop.f32.mrb[13].mxu0  ;;  %v1421_v22 = vpop.f32.mrb[13].mxu1  ;;  %v1785_v9 = vunpack.c.h.s8.bf16 %v1567_v63  ;;  %v1573_v10 = vld [vmem:[#allocation5 + $0x2c8] sm:$0xff]  ;;  %v1572_v16 = vld [vmem:[#allocation5 + $0x2c0] sm:$0xff] }
 0x46a   :  { %v1448_v24 = vmul.f32 %v1434_v11, %v1339_v21  ;;  %v1450_v25 = vmul.f32 %v1442_v12, %v1421_v22  ;;  %v1341_v26 = vpop.f32.mrb[14].mxu0  ;;  %v1423_v27 = vpop.f32.mrb[14].mxu1  ;;  %v1575_v11 = vld [vmem:[#allocation5 + $0x2d8] sm:$0xff]  ;;  %v1782_v12 = vunpack.c.h.s8.bf16 %v1564_v4  ;;  %v1581_v22 = vld [vmem:[#allocation5 + $0x308] sm:$0xff] }
 0x46b   :  { %v1472_v28 = vadd.f32 %v1455_v13, %v1447_v19  ;;  %v5384_v29 = vadd.f32 %v1463_v14, %v1449_v20  ;;  %v1342_v30 = vpop.f32.mrb[15].mxu0  ;;  %v1424_v31 = vpop.f32.mrb[15].mxu1  ;;  %v1784_v13 = vunpack.c.h.s8.bf16 %v1566_v5  ;;  %v1791_v14 = vunpack.c.l.s8.bf16 %v1573_v10  ;;  %v1607_v4 = vld [vmem:[#allocation5 + $0x3d8] sm:$0xff] }
 0x46c   :  { %v1473_v32 = vadd.f32 %v1459_v17, %v1448_v24  ;;  %v1475_v33 = vadd.f32 %v1467_v18, %v1450_v25  ;;  %v1793_v15 = vunpack.c.l.s8.bf16 %v1575_v11  ;;  %v1574_v17 = vld [vmem:[#allocation5 + $0x2d0] sm:$0xff]  ;;  %v1790_v18 = vunpack.c.l.s8.bf16 %v1572_v16  ;;  %v1583_v24 = vld [vmem:[#allocation5 + $0x318] sm:$0xff]  ;;  %v1580_v30 = vld [vmem:[#allocation5 + $0x300] sm:$0xff] }
 0x46d   :  { %v1476_v34 = vmax.f32 %v1472_v28, 0.0  ;;  %v1792_v19 = vunpack.c.l.s8.bf16 %v1574_v17  ;;  %v1799_v20 = vunpack.c.h.s8.bf16 %v1573_v10  ;;  %v1801_v21 = vunpack.c.h.s8.bf16 %v1575_v11  ;;  %v1582_v31 = vld [vmem:[#allocation5 + $0x310] sm:$0xff] }
 0x46e   :  { %v1477_v37 = vmax.f32 %v1473_v32, 0.0  ;;  %v1479_v38 = vmax.f32 %v1475_v33, 0.0  ;;  %v1798_v25 = vunpack.c.h.s8.bf16 %v1572_v16  ;;  %v1800_v26 = vunpack.c.h.s8.bf16 %v1574_v17  ;;  %v1606_v10 = vld [vmem:[#allocation5 + $0x3d0] sm:$0xff]  ;;  %v1491_v16 = vld [vmem:[#allocation5 + $0x38] sm:$0xff] }
 0x46f   :  { %v5388_v46 = vpack.c.bf16 %v1476_v34, %v1476_v34  ;;  %v1807_v27 = vunpack.c.l.s8.bf16 %v1581_v22  ;;  %v1809_v28 = vunpack.c.l.s8.bf16 %v1583_v24  ;;  %v1806_v32 = vunpack.c.l.s8.bf16 %v1580_v30 }
 0x470   :  { %v5386_v39 = vpack.c.bf16 %v1477_v37, %v1477_v37  ;;  %v5392_v51 = vpack.c.bf16 %v1479_v38, %v1479_v38  ;;  %v1808_v33 = vunpack.c.l.s8.bf16 %v1582_v31  ;;  %v1815_v34 = vunpack.c.h.s8.bf16 %v1581_v22  ;;  %v1591_v37 = vld [vmem:[#allocation5 + $0x358] sm:$0xff]  ;;  %v1488_v22 = vld [vmem:[#allocation5 + $0x20] sm:$0xff] }
 0x471   :  { %v1817_v35 = vunpack.c.h.s8.bf16 %v1583_v24  ;;  %v1814_v38 = vunpack.c.h.s8.bf16 %v1580_v30  ;;  %v1490_v24 = vld [vmem:[#allocation5 + $0x30] sm:$0xff]  ;;  %v1629_v30 = vunpack.c.h.s8.bf16 %v1491_v16 }
 0x472   :  { %1902 = vmatprep.mubr.bf16.mxu0 %v5386_v39  ;;  %1984 = vmatprep.mubr.bf16.mxu1 %v5386_v39 }
 0x473   :  { %1903 = vmatmul.mubr.bf16.vlgmr.msra.gmra.mrb[16].mxu0 %v5388_v46  ;;  %1985 = vmatmul.mubr.bf16.vlgmr.msra.gmra.mrb[16].mxu1 %v5388_v46 }
 0x474   :  { %1912 = vmatpush1.bf16.msra.mxu0 %v1742_v40  ;;  %1994 = vmatpush1.bf16.msra.mxu1 %v1744_v41  ;;  %v1816_v40 = vunpack.c.h.s8.bf16 %v1582_v31  ;;  %v1823_v41 = vunpack.c.l.s8.bf16 %v1589_v36  ;;  %v1497_v31 = vld [vmem:[#allocation5 + $0x68] sm:$0xff] }
 0x475   :  { %1943 = vmatprep.mubr.bf16.mxu0 %v5392_v51  ;;  %2025 = vmatprep.mubr.bf16.mxu1 %v5392_v51 }
 0x476   :  { %1913 = vmatprep.subr.bf16.mxu0 %v1751_v42  ;;  %1995 = vmatprep.subr.bf16.mxu1 %v1753_v43  ;;  %v1825_v42 = vunpack.c.l.s8.bf16 %v1591_v37  ;;  %v1588_v43 = vld [vmem:[#allocation5 + $0x340] sm:$0xff] }
 0x477   :  { %v1822_v50 = vunpack.c.l.s8.bf16 %v1588_v43  ;;  %v1830_v56 = vunpack.c.h.s8.bf16 %v1588_v43  ;;  %v1505_v43 = vld [vmem:[#allocation5 + $0xa8] sm:$0xff] }
 0x478   :  { %1914 = vmatpush1.bf16.msra.mxu0 %v1750_v52  ;;  %1996 = vmatpush1.bf16.msra.mxu1 %v1752_v57  ;;  %v1824_v52 = vunpack.c.l.s8.bf16 %v1590_v49  ;;  %v1831_v57 = vunpack.c.h.s8.bf16 %v1589_v36 }
 0x479   :  { %1915 = vmatprep.subr.bf16.mxu0 %v1759_v53  ;;  %1997 = vmatprep.subr.bf16.mxu1 %v1761_v54  ;;  %v1833_v53 = vunpack.c.h.s8.bf16 %v1591_v37  ;;  %v1597_v54 = vld [vmem:[#allocation5 + $0x388] sm:$0xff]  ;;  %v1498_v37 = vld [vmem:[#allocation5 + $0x70] sm:$0xff] }
 0x47c   :  { %1916 = vmatpush1.bf16.msra.mxu0 %v1758_v58  ;;  %1998 = vmatpush1.bf16.msra.mxu1 %v1760_v59  ;;  %v1832_v58 = vunpack.c.h.s8.bf16 %v1590_v49  ;;  %v1839_v59 = vunpack.c.l.s8.bf16 %v1597_v54  ;;  %v1507_v49 = vld [vmem:[#allocation5 + $0xb8] sm:$0xff] }
 0x47d   :  { %1917 = vmatprep.subr.bf16.mxu0 %v1767_v60  ;;  %1999 = vmatprep.subr.bf16.mxu1 %v1769_v61  ;;  %v1841_v60 = vunpack.c.l.s8.bf16 %v1599_v55  ;;  %v1596_v61 = vld [vmem:[#allocation5 + $0x380] sm:$0xff] }
 0x47e   :  { %v1838_v63 = vunpack.c.l.s8.bf16 %v1596_v61  ;;  %v1846_v5 = vunpack.c.h.s8.bf16 %v1596_v61  ;;  %v1515_v61 = vld [vmem:[#allocation5 + $0xf8] sm:$0xff] }
 0x480   :  { %1918 = vmatpush1.bf16.msra.mxu0 %v1766_v0  ;;  %2000 = vmatpush1.bf16.msra.mxu1 %v1768_v1  ;;  %v1840_v0 = vunpack.c.l.s8.bf16 %v1598_v62  ;;  %v1847_v1 = vunpack.c.h.s8.bf16 %v1597_v54  ;;  %v1506_v54 = vld [vmem:[#allocation5 + $0xb0] sm:$0xff] }
 0x481   :  { %1919 = vmatprep.subr.bf16.mxu0 %v1775_v2  ;;  %2001 = vmatprep.subr.bf16.mxu1 %v1777_v3  ;;  %v1849_v2 = vunpack.c.h.s8.bf16 %v1599_v55  ;;  %v1605_v3 = vld [vmem:[#allocation5 + $0x3c8] sm:$0xff] }
 0x484   :  { %1920 = vmatpush1.bf16.msra.mxu0 %v1774_v6  ;;  %2002 = vmatpush1.bf16.msra.mxu1 %v1776_v7  ;;  %v1848_v6 = vunpack.c.h.s8.bf16 %v1598_v62  ;;  %v1855_v7 = vunpack.c.l.s8.bf16 %v1605_v3 }
 0x485   :  { %1921 = vmatprep.subr.bf16.mxu0 %v1783_v8  ;;  %2003 = vmatprep.subr.bf16.mxu1 %v1785_v9  ;;  %v1857_v8 = vunpack.c.l.s8.bf16 %v1607_v4  ;;  %v1604_v9 = vld [vmem:[#allocation5 + $0x3c0] sm:$0xff] }
 0x486   :  { %v1854_v11 = vunpack.c.l.s8.bf16 %v1604_v9  ;;  %v1862_v17 = vunpack.c.h.s8.bf16 %v1604_v9  ;;  %v1523_v9 = vld [vmem:[#allocation5 + $0x138] sm:$0xff] }
 0x488   :  { %1922 = vmatpush1.bf16.msra.mxu0 %v1782_v12  ;;  %2004 = vmatpush1.bf16.msra.mxu1 %v1784_v13  ;;  %v1856_v12 = vunpack.c.l.s8.bf16 %v1606_v10  ;;  %v1863_v13 = vunpack.c.h.s8.bf16 %v1605_v3  ;;  %v1514_v3 = vld [vmem:[#allocation5 + $0xf0] sm:$0xff] }
 0x489   :  { %1923 = vmatprep.subr.bf16.mxu0 %v1791_v14  ;;  %2005 = vmatprep.subr.bf16.mxu1 %v1793_v15  ;;  %v1865_v14 = vunpack.c.h.s8.bf16 %v1607_v4  ;;  %v1489_v15 = vld [vmem:[#allocation5 + $0x28] sm:$0xff] }
 0x48c   :  { %1924 = vmatpush1.bf16.msra.mxu0 %v1790_v18  ;;  %2006 = vmatpush1.bf16.msra.mxu1 %v1792_v19  ;;  %v1864_v18 = vunpack.c.h.s8.bf16 %v1606_v10  ;;  %v1478_v19 = vmax.f32 %v5384_v29, 0.0  ;;  %v1499_v29 = vld [vmem:[#allocation5 + $0x78] sm:$0xff] }
 0x48d   :  { %1925 = vmatprep.subr.bf16.mxu0 %v1799_v20  ;;  %2007 = vmatprep.subr.bf16.mxu1 %v1801_v21  ;;  %v1619_v20 = vunpack.c.l.s8.bf16 %v1489_v15  ;;  %v1621_v21 = vunpack.c.l.s8.bf16 %v1491_v16  ;;  %v1637_v36 = vunpack.c.l.s8.bf16 %v1499_v29 }
 0x490   :  { %1926 = vmatpush1.bf16.msra.mxu0 %v1798_v25  ;;  %2008 = vmatpush1.bf16.msra.mxu1 %v1800_v26  ;;  %v1618_v25 = vunpack.c.l.s8.bf16 %v1488_v22  ;;  %v5399_v26 = vpack.c.bf16 %v1478_v19, %v1478_v19  ;;  %v1693_v19 = vunpack.c.h.s8.bf16 %v1523_v9 }
 0x491   :  { %1927 = vmatprep.subr.bf16.mxu0 %v1807_v27  ;;  %2009 = vmatprep.subr.bf16.mxu1 %v1809_v28  ;;  %v1620_v27 = vunpack.c.l.s8.bf16 %v1490_v24  ;;  %v1627_v28 = vunpack.c.h.s8.bf16 %v1489_v15  ;;  %v1522_v15 = vld [vmem:[#allocation5 + $0x130] sm:$0xff] }
 0x494   :  { %1928 = vmatpush1.bf16.msra.mxu0 %v1806_v32  ;;  %2010 = vmatpush1.bf16.msra.mxu1 %v1808_v33  ;;  %v1626_v32 = vunpack.c.h.s8.bf16 %v1488_v22  ;;  %v1628_v33 = vunpack.c.h.s8.bf16 %v1490_v24  ;;  %v1692_v24 = vunpack.c.h.s8.bf16 %v1522_v15 }
 0x495   :  { %1929 = vmatprep.subr.bf16.mxu0 %v1815_v34  ;;  %2011 = vmatprep.subr.bf16.mxu1 %v1817_v35  ;;  %v1635_v34 = vunpack.c.l.s8.bf16 %v1497_v31  ;;  %v1496_v35 = vld [vmem:[#allocation5 + $0x60] sm:$0xff] }
 0x498   :  { %1930 = vmatpush1.bf16.msra.mxu0 %v1814_v38  ;;  %2012 = vmatpush1.bf16.msra.mxu1 %v1816_v40  ;;  %v1634_v38 = vunpack.c.l.s8.bf16 %v1496_v35  ;;  %v1636_v40 = vunpack.c.l.s8.bf16 %v1498_v37 }
 0x499   :  { %1931 = vmatprep.subr.bf16.mxu0 %v1823_v41  ;;  %2013 = vmatprep.subr.bf16.mxu1 %v1825_v42  ;;  %v1643_v41 = vunpack.c.h.s8.bf16 %v1497_v31  ;;  %v1645_v42 = vunpack.c.h.s8.bf16 %v1499_v29 }
 0x49c   :  { %1932 = vmatpush1.bf16.msra.mxu0 %v1822_v50  ;;  %2014 = vmatpush1.bf16.msra.mxu1 %v1824_v52  ;;  %v1642_v50 = vunpack.c.h.s8.bf16 %v1496_v35  ;;  %v1651_v52 = vunpack.c.l.s8.bf16 %v1505_v43  ;;  %v1539_v35 = vld [vmem:[#allocation5 + $0x1b8] sm:$0xff] }
 0x49d   :  { %1933 = vmatprep.subr.bf16.mxu0 %v1831_v57  ;;  %2015 = vmatprep.subr.bf16.mxu1 %v1833_v53  ;;  %v1504_v57 = vld [vmem:[#allocation5 + $0xa0] sm:$0xff]  ;;  %v1653_v53 = vunpack.c.l.s8.bf16 %v1507_v49 }
 0x49e   :  { %v1650_v55 = vunpack.c.l.s8.bf16 %v1504_v57  ;;  %v1658_v62 = vunpack.c.h.s8.bf16 %v1504_v57  ;;  %v1547_v57 = vld [vmem:[#allocation5 + $0x1f8] sm:$0xff] }
 0x4a0   :  { %1934 = vmatpush1.bf16.msra.mxu0 %v1830_v56  ;;  %2016 = vmatpush1.bf16.msra.mxu1 %v1832_v58  ;;  %v1652_v56 = vunpack.c.l.s8.bf16 %v1506_v54  ;;  %v1659_v58 = vunpack.c.h.s8.bf16 %v1505_v43 }
 0x4a1   :  { %1935 = vmatprep.subr.bf16.mxu0 %v1839_v59  ;;  %2017 = vmatprep.subr.bf16.mxu1 %v1841_v60  ;;  %v1661_v59 = vunpack.c.h.s8.bf16 %v1507_v49  ;;  %v1513_v60 = vld [vmem:[#allocation5 + $0xe8] sm:$0xff] }
 0x4a4   :  { %1936 = vmatpush1.bf16.msra.mxu0 %v1838_v63  ;;  %2018 = vmatpush1.bf16.msra.mxu1 %v1840_v0  ;;  %v1660_v63 = vunpack.c.h.s8.bf16 %v1506_v54  ;;  %v1667_v0 = vunpack.c.l.s8.bf16 %v1513_v60 }
 0x4a5   :  { %1937 = vmatprep.subr.bf16.mxu0 %v1847_v1  ;;  %2019 = vmatprep.subr.bf16.mxu1 %v1849_v2  ;;  %v1512_v1 = vld [vmem:[#allocation5 + $0xe0] sm:$0xff]  ;;  %v1669_v2 = vunpack.c.l.s8.bf16 %v1515_v61 }
 0x4a6   :  { %v1666_v4 = vunpack.c.l.s8.bf16 %v1512_v1  ;;  %v1674_v10 = vunpack.c.h.s8.bf16 %v1512_v1  ;;  %v1555_v1 = vld [vmem:[#allocation5 + $0x238] sm:$0xff] }
 0x4a8   :  { %1938 = vmatpush1.bf16.msra.mxu0 %v1846_v5  ;;  %2020 = vmatpush1.bf16.msra.mxu1 %v1848_v6  ;;  %v1668_v5 = vunpack.c.l.s8.bf16 %v1514_v3  ;;  %v1675_v6 = vunpack.c.h.s8.bf16 %v1513_v60 }
 0x4a9   :  { %1939 = vmatprep.subr.bf16.mxu0 %v1855_v7  ;;  %2021 = vmatprep.subr.bf16.mxu1 %v1857_v8  ;;  %v1677_v7 = vunpack.c.h.s8.bf16 %v1515_v61  ;;  %v1521_v8 = vld [vmem:[#allocation5 + $0x128] sm:$0xff] }
 0x4ac   :  { %1940 = vmatpush1.bf16.msra.mxu0 %v1854_v11  ;;  %2022 = vmatpush1.bf16.msra.mxu1 %v1856_v12  ;;  %v1676_v11 = vunpack.c.h.s8.bf16 %v1514_v3  ;;  %v1683_v12 = vunpack.c.l.s8.bf16 %v1521_v8 }
 0x4ad   :  { %1941 = vmatprep.subr.bf16.mxu0 %v1863_v13  ;;  %2023 = vmatprep.subr.bf16.mxu1 %v1865_v14  ;;  %v1520_v13 = vld [vmem:[#allocation5 + $0x120] sm:$0xff]  ;;  %v1685_v14 = vunpack.c.l.s8.bf16 %v1523_v9 }
 0x4ae   :  { %v1682_v16 = vunpack.c.l.s8.bf16 %v1520_v13  ;;  %v1690_v22 = vunpack.c.h.s8.bf16 %v1520_v13  ;;  %v1563_v13 = vld [vmem:[#allocation5 + $0x278] sm:$0xff] }
 0x4b0   :  { %1942 = vmatpush1.bf16.msra.mxu0 %v1862_v17  ;;  %2024 = vmatpush1.bf16.msra.mxu1 %v1864_v18  ;;  %v1684_v17 = vunpack.c.l.s8.bf16 %v1522_v15  ;;  %v1691_v18 = vunpack.c.h.s8.bf16 %v1521_v8 }
 0x4b1   :  { %2034 = vmatprep.subr.bf16.mxu0 %v1619_v20  ;;  %2116 = vmatprep.subr.bf16.mxu1 %v1621_v21  ;;  %v1529_v20 = vld [vmem:[#allocation5 + $0x168] sm:$0xff]  ;;  %v1531_v21 = vld [vmem:[#allocation5 + $0x178] sm:$0xff] }
 0x4b3   :  { %1944 = vmatmul.mubr.bf16.vlgmr.msra.gmra.mrb[16].mxu0 %v5399_v26  ;;  %2026 = vmatmul.mubr.bf16.vlgmr.msra.gmra.mrb[16].mxu1 %v5399_v26 }
 0x4b4   :  { %2035 = vmatpush1.bf16.msra.mxu0 %v1618_v25  ;;  %2066 = vmatprep.mubr.bf16.mxu0 %v5386_v39  ;;  %v1699_v25 = vunpack.c.l.s8.bf16 %v1529_v20 }
 0x4b5   :  { %2117 = vmatpush1.bf16.msra.mxu1 %v1620_v27  ;;  %2148 = vmatprep.mubr.bf16.mxu1 %v5386_v39  ;;  %v1644_v39 = vunpack.c.h.s8.bf16 %v1498_v37  ;;  %v1528_v27 = vld [vmem:[#allocation5 + $0x160] sm:$0xff] }
 0x4b6   :  { %2036 = vmatprep.subr.bf16.mxu0 %v1627_v28  ;;  %2118 = vmatprep.subr.bf16.mxu1 %v1629_v30  ;;  %v1701_v28 = vunpack.c.l.s8.bf16 %v1531_v21  ;;  %v1530_v30 = vld [vmem:[#allocation5 + $0x170] sm:$0xff]  ;;  %v1698_v31 = vunpack.c.l.s8.bf16 %v1528_v27 }
 0x4b7   :  { %v1700_v29 = vunpack.c.l.s8.bf16 %v1530_v30  ;;  %v1708_v37 = vunpack.c.h.s8.bf16 %v1530_v30  ;;  %v1568_v30 = vld [vmem:[#allocation5 + $0x2a0] sm:$0xff] }
 0x4b8   :  { %2037 = vmatpush1.bf16.msra.mxu0 %v1626_v32  ;;  %v1707_v32 = vunpack.c.h.s8.bf16 %v1529_v20 }
 0x4b9   :  { %2119 = vmatpush1.bf16.msra.mxu1 %v1628_v33  ;;  %2038 = vmatprep.subr.bf16.mxu0 %v1635_v34  ;;  %v1709_v33 = vunpack.c.h.s8.bf16 %v1531_v21  ;;  %v1537_v34 = vld [vmem:[#allocation5 + $0x1a8] sm:$0xff] }
 0x4ba   :  { %2120 = vmatprep.subr.bf16.mxu1 %v1637_v36  ;;  %v1706_v36 = vunpack.c.h.s8.bf16 %v1528_v27 }
 0x4bc   :  { %2039 = vmatpush1.bf16.msra.mxu0 %v1634_v38  ;;  %v1715_v38 = vunpack.c.l.s8.bf16 %v1537_v34 }
 0x4bd   :  { %2121 = vmatpush1.bf16.msra.mxu1 %v1636_v40  ;;  %2040 = vmatprep.subr.bf16.mxu0 %v1643_v41  ;;  %v1536_v40 = vld [vmem:[#allocation5 + $0x1a0] sm:$0xff]  ;;  %v1717_v41 = vunpack.c.l.s8.bf16 %v1539_v35 }
 0x4be   :  { %2122 = vmatprep.subr.bf16.mxu1 %v1645_v42  ;;  %v1538_v42 = vld [vmem:[#allocation5 + $0x1b0] sm:$0xff]  ;;  %v1714_v43 = vunpack.c.l.s8.bf16 %v1536_v40 }
 0x4bf   :  { %v1716_v49 = vunpack.c.l.s8.bf16 %v1538_v42  ;;  %v1724_v54 = vunpack.c.h.s8.bf16 %v1538_v42  ;;  %v1576_v42 = vld [vmem:[#allocation5 + $0x2e0] sm:$0xff] }
 0x4c0   :  { %2041 = vmatpush1.bf16.msra.mxu0 %v1642_v50  ;;  %v1723_v50 = vunpack.c.h.s8.bf16 %v1537_v34 }
 0x4c1   :  { %2123 = vmatpush1.bf16.msra.mxu1 %v1644_v39  ;;  %2042 = vmatprep.subr.bf16.mxu0 %v1651_v52  ;;  %v1725_v39 = vunpack.c.h.s8.bf16 %v1539_v35  ;;  %v1545_v52 = vld [vmem:[#allocation5 + $0x1e8] sm:$0xff] }
 0x4c2   :  { %2124 = vmatprep.subr.bf16.mxu1 %v1653_v53  ;;  %v1722_v53 = vunpack.c.h.s8.bf16 %v1536_v40 }
 0x4c4   :  { %2043 = vmatpush1.bf16.msra.mxu0 %v1650_v55  ;;  %v1731_v55 = vunpack.c.l.s8.bf16 %v1545_v52 }
 0x4c5   :  { %2125 = vmatpush1.bf16.msra.mxu1 %v1652_v56  ;;  %2044 = vmatprep.subr.bf16.mxu0 %v1659_v58  ;;  %v1544_v56 = vld [vmem:[#allocation5 + $0x1e0] sm:$0xff]  ;;  %v1733_v58 = vunpack.c.l.s8.bf16 %v1547_v57 }
 0x4c6   :  { %2126 = vmatprep.subr.bf16.mxu1 %v1661_v59  ;;  %v1546_v59 = vld [vmem:[#allocation5 + $0x1f0] sm:$0xff]  ;;  %v1730_v60 = vunpack.c.l.s8.bf16 %v1544_v56 }
 0x4c7   :  { %v1732_v61 = vunpack.c.l.s8.bf16 %v1546_v59  ;;  %v1740_v3 = vunpack.c.h.s8.bf16 %v1546_v59  ;;  %v1584_v59 = vld [vmem:[#allocation5 + $0x320] sm:$0xff] }
 0x4c8   :  { %2045 = vmatpush1.bf16.msra.mxu0 %v1658_v62  ;;  %v1739_v62 = vunpack.c.h.s8.bf16 %v1545_v52 }
 0x4c9   :  { %2127 = vmatpush1.bf16.msra.mxu1 %v1660_v63  ;;  %2046 = vmatprep.subr.bf16.mxu0 %v1667_v0  ;;  %v1741_v63 = vunpack.c.h.s8.bf16 %v1547_v57  ;;  %v1553_v0 = vld [vmem:[#allocation5 + $0x228] sm:$0xff] }
 0x4ca   :  { %2128 = vmatprep.subr.bf16.mxu1 %v1669_v2  ;;  %v1738_v2 = vunpack.c.h.s8.bf16 %v1544_v56 }
 0x4cc   :  { %2047 = vmatpush1.bf16.msra.mxu0 %v1666_v4  ;;  %v1747_v4 = vunpack.c.l.s8.bf16 %v1553_v0 }
 0x4cd   :  { %2129 = vmatpush1.bf16.msra.mxu1 %v1668_v5  ;;  %2048 = vmatprep.subr.bf16.mxu0 %v1675_v6  ;;  %v1552_v5 = vld [vmem:[#allocation5 + $0x220] sm:$0xff]  ;;  %v1749_v6 = vunpack.c.l.s8.bf16 %v1555_v1 }
 0x4ce   :  { %2130 = vmatprep.subr.bf16.mxu1 %v1677_v7  ;;  %v1554_v7 = vld [vmem:[#allocation5 + $0x230] sm:$0xff]  ;;  %v1746_v8 = vunpack.c.l.s8.bf16 %v1552_v5 }
 0x4cf   :  { %v1748_v9 = vunpack.c.l.s8.bf16 %v1554_v7  ;;  %v1756_v15 = vunpack.c.h.s8.bf16 %v1554_v7  ;;  %v1592_v7 = vld [vmem:[#allocation5 + $0x360] sm:$0xff] }
 0x4d0   :  { %2049 = vmatpush1.bf16.msra.mxu0 %v1674_v10  ;;  %v1755_v10 = vunpack.c.h.s8.bf16 %v1553_v0 }
 0x4d1   :  { %2131 = vmatpush1.bf16.msra.mxu1 %v1676_v11  ;;  %2050 = vmatprep.subr.bf16.mxu0 %v1683_v12  ;;  %v1561_v11 = vld [vmem:[#allocation5 + $0x268] sm:$0xff]  ;;  %v1757_v12 = vunpack.c.h.s8.bf16 %v1555_v1 }
 0x4d2   :  { %2132 = vmatprep.subr.bf16.mxu1 %v1685_v14  ;;  %v1754_v14 = vunpack.c.h.s8.bf16 %v1552_v5 }
 0x4d4   :  { %2051 = vmatpush1.bf16.msra.mxu0 %v1682_v16  ;;  %v1763_v16 = vunpack.c.l.s8.bf16 %v1561_v11 }
 0x4d5   :  { %2133 = vmatpush1.bf16.msra.mxu1 %v1684_v17  ;;  %2052 = vmatprep.subr.bf16.mxu0 %v1691_v18  ;;  %v1560_v17 = vld [vmem:[#allocation5 + $0x260] sm:$0xff]  ;;  %v1765_v18 = vunpack.c.l.s8.bf16 %v1563_v13 }
 0x4d6   :  { %2134 = vmatprep.subr.bf16.mxu1 %v1693_v19  ;;  %v1562_v19 = vld [vmem:[#allocation5 + $0x270] sm:$0xff]  ;;  %v1762_v20 = vunpack.c.l.s8.bf16 %v1560_v17  ;;  %v1770_v27 = vunpack.c.h.s8.bf16 %v1560_v17 }
 0x4d7   :  { %v1764_v21 = vunpack.c.l.s8.bf16 %v1562_v19 }
 0x4d8   :  { %2053 = vmatpush1.bf16.msra.mxu0 %v1690_v22  ;;  %v1773_v22 = vunpack.c.h.s8.bf16 %v1563_v13 }
 0x4d9   :  { %2135 = vmatpush1.bf16.msra.mxu1 %v1692_v24  ;;  %2054 = vmatprep.subr.bf16.mxu0 %v1699_v25  ;;  %v1569_v24 = vld [vmem:[#allocation5 + $0x2a8] sm:$0xff]  ;;  %v1571_v25 = vld [vmem:[#allocation5 + $0x2b8] sm:$0xff] }
 0x4da   :  { %2136 = vmatprep.subr.bf16.mxu1 %v1701_v28  ;;  %v1772_v28 = vunpack.c.h.s8.bf16 %v1562_v19  ;;  %v1787_v34 = vunpack.c.h.s8.bf16 %v1569_v24  ;;  %v1789_v35 = vunpack.c.h.s8.bf16 %v1571_v25  ;;  %v1600_v19 = vld [vmem:[#allocation5 + $0x3a0] sm:$0xff] }
 0x4dc   :  { %2055 = vmatpush1.bf16.msra.mxu0 %v1698_v31  ;;  %v1781_v31 = vunpack.c.l.s8.bf16 %v1571_v25 }
 0x4dd   :  { %2137 = vmatpush1.bf16.msra.mxu1 %v1700_v29  ;;  %2056 = vmatprep.subr.bf16.mxu0 %v1707_v32  ;;  %v1570_v29 = vld [vmem:[#allocation5 + $0x2b0] sm:$0xff]  ;;  %v1778_v32 = vunpack.c.l.s8.bf16 %v1568_v30 }
 0x4de   :  { %2138 = vmatprep.subr.bf16.mxu1 %v1709_v33  ;;  %v1780_v33 = vunpack.c.l.s8.bf16 %v1570_v29  ;;  %v1788_v40 = vunpack.c.h.s8.bf16 %v1570_v29  ;;  %v1608_v29 = vld [vmem:[#allocation5 + $0x3e0] sm:$0xff] }
 0x4e0   :  { %2057 = vmatpush1.bf16.msra.mxu0 %v1706_v36  ;;  %v1577_v36 = vld [vmem:[#allocation5 + $0x2e8] sm:$0xff] }
 0x4e1   :  { %2139 = vmatpush1.bf16.msra.mxu1 %v1708_v37  ;;  %2058 = vmatprep.subr.bf16.mxu0 %v1715_v38  ;;  %v1579_v37 = vld [vmem:[#allocation5 + $0x2f8] sm:$0xff]  ;;  %v1786_v38 = vunpack.c.h.s8.bf16 %v1568_v30  ;;  %v1803_v52 = vunpack.c.h.s8.bf16 %v1577_v36 }
 0x4e2   :  { %2140 = vmatprep.subr.bf16.mxu1 %v1717_v41  ;;  %v1795_v41 = vunpack.c.l.s8.bf16 %v1577_v36  ;;  %v1805_v57 = vunpack.c.h.s8.bf16 %v1579_v37 }
 0x4e4   :  { %2059 = vmatpush1.bf16.msra.mxu0 %v1714_v43  ;;  %v1797_v43 = vunpack.c.l.s8.bf16 %v1579_v37 }
 0x4e5   :  { %2141 = vmatpush1.bf16.msra.mxu1 %v1716_v49  ;;  %2060 = vmatprep.subr.bf16.mxu0 %v1723_v50  ;;  %v1578_v49 = vld [vmem:[#allocation5 + $0x2f0] sm:$0xff]  ;;  %v1794_v50 = vunpack.c.l.s8.bf16 %v1576_v42 }
 0x4e6   :  { %2142 = vmatprep.subr.bf16.mxu1 %v1725_v39  ;;  %v1796_v39 = vunpack.c.l.s8.bf16 %v1578_v49  ;;  %v1804_v56 = vunpack.c.h.s8.bf16 %v1578_v49  ;;  %v2312_v49 = vld [vmem:[#allocation7] sm:$0xff] }
 0x4e8   :  { %2061 = vmatpush1.bf16.msra.mxu0 %v1722_v53  ;;  %v1585_v53 = vld [vmem:[#allocation5 + $0x328] sm:$0xff] }
 0x4e9   :  { %2143 = vmatpush1.bf16.msra.mxu1 %v1724_v54  ;;  %2062 = vmatprep.subr.bf16.mxu0 %v1731_v55  ;;  %v1587_v54 = vld [vmem:[#allocation5 + $0x338] sm:$0xff]  ;;  %v1802_v55 = vunpack.c.h.s8.bf16 %v1576_v42  ;;  %v1819_v0 = vunpack.c.h.s8.bf16 %v1585_v53 }
 0x4ea   :  { %2144 = vmatprep.subr.bf16.mxu1 %v1733_v58  ;;  %v1811_v58 = vunpack.c.l.s8.bf16 %v1585_v53  ;;  %v1821_v1 = vunpack.c.h.s8.bf16 %v1587_v54 }
 0x4ec   :  { %2063 = vmatpush1.bf16.msra.mxu0 %v1730_v60  ;;  %v1813_v60 = vunpack.c.l.s8.bf16 %v1587_v54 }
 0x4ed   :  { %2145 = vmatpush1.bf16.msra.mxu1 %v1732_v61  ;;  %2064 = vmatprep.subr.bf16.mxu0 %v1739_v62  ;;  %v1586_v61 = vld [vmem:[#allocation5 + $0x330] sm:$0xff]  ;;  %v1810_v62 = vunpack.c.l.s8.bf16 %v1584_v59 }
 0x4ee   :  { %2146 = vmatprep.subr.bf16.mxu1 %v1741_v63  ;;  %v1812_v63 = vunpack.c.l.s8.bf16 %v1586_v61  ;;  %v1820_v5 = vunpack.c.h.s8.bf16 %v1586_v61  ;;  %v2316_v61 = vld [vmem:[#allocation7 + $0x20] sm:$0xff] }
 0x4f0   :  { %2065 = vmatpush1.bf16.msra.mxu0 %v1738_v2  ;;  %v1593_v2 = vld [vmem:[#allocation5 + $0x368] sm:$0xff] }
 0x4f1   :  { %2147 = vmatpush1.bf16.msra.mxu1 %v1740_v3  ;;  %2075 = vmatprep.subr.bf16.mxu0 %v1747_v4  ;;  %v1595_v3 = vld [vmem:[#allocation5 + $0x378] sm:$0xff]  ;;  %v1818_v4 = vunpack.c.h.s8.bf16 %v1584_v59 }
 0x4f2   :  { %2157 = vmatprep.subr.bf16.mxu1 %v1749_v6  ;;  %v1827_v6 = vunpack.c.l.s8.bf16 %v1593_v2  ;;  %v1837_v13 = vunpack.c.h.s8.bf16 %v1595_v3 }
 0x4f3   :  { %2067 = vmatmul.mubr.bf16.vlgmr.msra.gmra.mrb[20].mxu0 %v5388_v46 }
 0x4f4   :  { %2149 = vmatmul.mubr.bf16.vlgmr.msra.gmra.mrb[20].mxu1 %v5388_v46  ;;  %2076 = vmatpush1.bf16.msra.mxu0 %v1746_v8  ;;  %v1771_v46 = vunpack.c.h.s8.bf16 %v1561_v11  ;;  %v1829_v8 = vunpack.c.l.s8.bf16 %v1595_v3 }
 0x4f5   :  { %2107 = vmatprep.mubr.bf16.mxu0 %v5392_v51  ;;  %2158 = vmatpush1.bf16.msra.mxu1 %v1748_v9  ;;  %v1594_v9 = vld [vmem:[#allocation5 + $0x370] sm:$0xff] }
 0x4f6   :  { %2189 = vmatprep.mubr.bf16.mxu1 %v5392_v51  ;;  %2077 = vmatprep.subr.bf16.mxu0 %v1755_v10  ;;  %v1779_v51 = vunpack.c.l.s8.bf16 %v1569_v24  ;;  %v1826_v10 = vunpack.c.l.s8.bf16 %v1592_v7  ;;  %v1828_v11 = vunpack.c.l.s8.bf16 %v1594_v9  ;;  %v1836_v17 = vunpack.c.h.s8.bf16 %v1594_v9 }
 0x4f7   :  { %2159 = vmatprep.subr.bf16.mxu1 %v1757_v12  ;;  %v1835_v12 = vunpack.c.h.s8.bf16 %v1593_v2 }
 0x4f8   :  { %2078 = vmatpush1.bf16.msra.mxu0 %v1754_v14  ;;  %v1601_v14 = vld [vmem:[#allocation5 + $0x3a8] sm:$0xff] }
 0x4f9   :  { %2160 = vmatpush1.bf16.msra.mxu1 %v1756_v15  ;;  %2079 = vmatprep.subr.bf16.mxu0 %v1763_v16  ;;  %v1603_v15 = vld [vmem:[#allocation5 + $0x3b8] sm:$0xff]  ;;  %v1834_v16 = vunpack.c.h.s8.bf16 %v1592_v7  ;;  %v1851_v24 = vunpack.c.h.s8.bf16 %v1601_v14 }
 0x4fa   :  { %2161 = vmatprep.subr.bf16.mxu1 %v1765_v18  ;;  %v1843_v18 = vunpack.c.l.s8.bf16 %v1601_v14  ;;  %v1853_v25 = vunpack.c.h.s8.bf16 %v1603_v15 }
 0x4fc   :  { %2080 = vmatpush1.bf16.msra.mxu0 %v1762_v20  ;;  %v1845_v20 = vunpack.c.l.s8.bf16 %v1603_v15  ;;  %v2325_v15 = vld [vmem:[#allocation7 + $0x68] sm:$0xff] }
 0x4fd   :  { %2162 = vmatpush1.bf16.msra.mxu1 %v1764_v21  ;;  %2081 = vmatprep.subr.bf16.mxu0 %v1771_v46  ;;  %v1602_v21 = vld [vmem:[#allocation5 + $0x3b0] sm:$0xff]  ;;  %v1842_v46 = vunpack.c.l.s8.bf16 %v1600_v19 }
 0x4fe   :  { %2163 = vmatprep.subr.bf16.mxu1 %v1773_v22  ;;  %v1844_v22 = vunpack.c.l.s8.bf16 %v1602_v21  ;;  %v1852_v30 = vunpack.c.h.s8.bf16 %v1602_v21 }
 0x500   :  { %2082 = vmatpush1.bf16.msra.mxu0 %v1770_v27  ;;  %v1609_v27 = vld [vmem:[#allocation5 + $0x3e8] sm:$0xff] }
 0x501   :  { %2164 = vmatpush1.bf16.msra.mxu1 %v1772_v28  ;;  %2083 = vmatprep.subr.bf16.mxu0 %v1779_v51  ;;  %v1611_v28 = vld [vmem:[#allocation5 + $0x3f8] sm:$0xff]  ;;  %v1850_v51 = vunpack.c.h.s8.bf16 %v1600_v19  ;;  %v1867_v36 = vunpack.c.h.s8.bf16 %v1609_v27  ;;  %v2403_v19 = vunpack.c.l.s8.bf16 %v2325_v15 }
 0x502   :  { %2165 = vmatprep.subr.bf16.mxu1 %v1781_v31  ;;  %v1859_v31 = vunpack.c.l.s8.bf16 %v1609_v27  ;;  %v1869_v37 = vunpack.c.h.s8.bf16 %v1611_v28 }
 0x504   :  { %2084 = vmatpush1.bf16.msra.mxu0 %v1778_v32  ;;  %v1861_v32 = vunpack.c.l.s8.bf16 %v1611_v28  ;;  %v2329_v28 = vld [vmem:[#allocation7 + $0x88] sm:$0xff] }
 0x505   :  { %2166 = vmatpush1.bf16.msra.mxu1 %v1780_v33  ;;  %2085 = vmatprep.subr.bf16.mxu0 %v1787_v34  ;;  %v1610_v33 = vld [vmem:[#allocation5 + $0x3f0] sm:$0xff]  ;;  %v1858_v34 = vunpack.c.l.s8.bf16 %v1608_v29 }
 0x506   :  { %2167 = vmatprep.subr.bf16.mxu1 %v1789_v35  ;;  %v1860_v35 = vunpack.c.l.s8.bf16 %v1610_v33  ;;  %v1868_v42 = vunpack.c.h.s8.bf16 %v1610_v33 }
 0x508   :  { %2086 = vmatpush1.bf16.msra.mxu0 %v1786_v38  ;;  %v2313_v38 = vld [vmem:[#allocation7 + $0x8] sm:$0xff] }
 0x509   :  { %2168 = vmatpush1.bf16.msra.mxu1 %v1788_v40  ;;  %2087 = vmatprep.subr.bf16.mxu0 %v1795_v41  ;;  %v2315_v40 = vld [vmem:[#allocation7 + $0x18] sm:$0xff]  ;;  %v1866_v41 = vunpack.c.h.s8.bf16 %v1608_v29  ;;  %v2383_v53 = vunpack.c.h.s8.bf16 %v2313_v38  ;;  %v2411_v29 = vunpack.c.l.s8.bf16 %v2329_v28 }
 0x50a   :  { %2169 = vmatprep.subr.bf16.mxu1 %v1797_v43  ;;  %v2379_v43 = vunpack.c.l.s8.bf16 %v2313_v38  ;;  %v2385_v54 = vunpack.c.h.s8.bf16 %v2315_v40 }
 0x50c   :  { %2088 = vmatpush1.bf16.msra.mxu0 %v1794_v50  ;;  %v2381_v50 = vunpack.c.l.s8.bf16 %v2315_v40  ;;  %v2333_v40 = vld [vmem:[#allocation7 + $0xa8] sm:$0xff] }
 0x50d   :  { %2170 = vmatpush1.bf16.msra.mxu1 %v1796_v39  ;;  %2089 = vmatprep.subr.bf16.mxu0 %v1803_v52  ;;  %v2314_v39 = vld [vmem:[#allocation7 + $0x10] sm:$0xff]  ;;  %v2378_v52 = vunpack.c.l.s8.bf16 %v2312_v49 }
 0x50e   :  { %2171 = vmatprep.subr.bf16.mxu1 %v1805_v57  ;;  %v2380_v57 = vunpack.c.l.s8.bf16 %v2314_v39  ;;  %v2384_v59 = vunpack.c.h.s8.bf16 %v2314_v39 }
 0x510   :  { %2090 = vmatpush1.bf16.msra.mxu0 %v1802_v55  ;;  %v2317_v55 = vld [vmem:[#allocation7 + $0x28] sm:$0xff] }
 0x511   :  { %2172 = vmatpush1.bf16.msra.mxu1 %v1804_v56  ;;  %2091 = vmatprep.subr.bf16.mxu0 %v1811_v58  ;;  %v2319_v56 = vld [vmem:[#allocation7 + $0x38] sm:$0xff]  ;;  %v2382_v58 = vunpack.c.h.s8.bf16 %v2312_v49  ;;  %v2391_v2 = vunpack.c.h.s8.bf16 %v2317_v55  ;;  %v2419_v49 = vunpack.c.l.s8.bf16 %v2333_v40 }
 0x512   :  { %2173 = vmatprep.subr.bf16.mxu1 %v1813_v60  ;;  %v2387_v60 = vunpack.c.l.s8.bf16 %v2317_v55  ;;  %v2393_v3 = vunpack.c.h.s8.bf16 %v2319_v56 }
 0x514   :  { %2092 = vmatpush1.bf16.msra.mxu0 %v1810_v62  ;;  %v2389_v62 = vunpack.c.l.s8.bf16 %v2319_v56  ;;  %v2337_v56 = vld [vmem:[#allocation7 + $0xc8] sm:$0xff] }
 0x515   :  { %2174 = vmatpush1.bf16.msra.mxu1 %v1812_v63  ;;  %2093 = vmatprep.subr.bf16.mxu0 %v1819_v0  ;;  %v2318_v63 = vld [vmem:[#allocation7 + $0x30] sm:$0xff]  ;;  %v2386_v0 = vunpack.c.l.s8.bf16 %v2316_v61 }
 0x516   :  { %2175 = vmatprep.subr.bf16.mxu1 %v1821_v1  ;;  %v2388_v1 = vunpack.c.l.s8.bf16 %v2318_v63 }
 0x518   :  { %2094 = vmatpush1.bf16.msra.mxu0 %v1818_v4  ;;  %v2321_v4 = vld [vmem:[#allocation7 + $0x48] sm:$0xff] }
 0x519   :  { %2176 = vmatpush1.bf16.msra.mxu1 %v1820_v5  ;;  %2095 = vmatprep.subr.bf16.mxu0 %v1827_v6  ;;  %v2390_v5 = vunpack.c.h.s8.bf16 %v2316_v61  ;;  %v2392_v6 = vunpack.c.h.s8.bf16 %v2318_v63  ;;  %v2395_v7 = vunpack.c.l.s8.bf16 %v2321_v4  ;;  %v2427_v61 = vunpack.c.l.s8.bf16 %v2337_v56 }
 0x51a   :  { %2177 = vmatprep.subr.bf16.mxu1 %v1829_v8  ;;  %v2320_v8 = vld [vmem:[#allocation7 + $0x40] sm:$0xff] }
 0x51c   :  { %2096 = vmatpush1.bf16.msra.mxu0 %v1826_v10  ;;  %v2322_v10 = vld [vmem:[#allocation7 + $0x50] sm:$0xff] }
 0x51d   :  { %2178 = vmatpush1.bf16.msra.mxu1 %v1828_v11  ;;  %2097 = vmatprep.subr.bf16.mxu0 %v1835_v12  ;;  %v2394_v11 = vunpack.c.l.s8.bf16 %v2320_v8  ;;  %v2396_v12 = vunpack.c.l.s8.bf16 %v2322_v10 }
 0x51e   :  { %2179 = vmatprep.subr.bf16.mxu1 %v1837_v13  ;;  %v2399_v13 = vunpack.c.h.s8.bf16 %v2321_v4 }
 0x520   :  { %2098 = vmatpush1.bf16.msra.mxu0 %v1834_v16  ;;  %v2327_v16 = vld [vmem:[#allocation7 + $0x78] sm:$0xff] }
 0x521   :  { %2180 = vmatpush1.bf16.msra.mxu1 %v1836_v17  ;;  %2099 = vmatprep.subr.bf16.mxu0 %v1843_v18  ;;  %v2398_v17 = vunpack.c.h.s8.bf16 %v2320_v8  ;;  %v2400_v18 = vunpack.c.h.s8.bf16 %v2322_v10  ;;  %v2405_v21 = vunpack.c.l.s8.bf16 %v2327_v16  ;;  %v2409_v27 = vunpack.c.h.s8.bf16 %v2327_v16  ;;  %v5411_v16 = vld [vmem:[#allocation7 + $0x108] sm:$0xff] }
 0x522   :  { %2181 = vmatprep.subr.bf16.mxu1 %v1845_v20  ;;  %v2324_v20 = vld [vmem:[#allocation7 + $0x60] sm:$0xff] }
 0x524   :  { %2100 = vmatpush1.bf16.msra.mxu0 %v1842_v46  ;;  %v2326_v46 = vld [vmem:[#allocation7 + $0x70] sm:$0xff] }
 0x525   :  { %2182 = vmatpush1.bf16.msra.mxu1 %v1844_v22  ;;  %2101 = vmatprep.subr.bf16.mxu0 %v1851_v24  ;;  %v2402_v22 = vunpack.c.l.s8.bf16 %v2324_v20  ;;  %v2404_v24 = vunpack.c.l.s8.bf16 %v2326_v46 }
 0x526   :  { %2183 = vmatprep.subr.bf16.mxu1 %v1853_v25  ;;  %v2407_v25 = vunpack.c.h.s8.bf16 %v2325_v15 }
 0x528   :  { %2102 = vmatpush1.bf16.msra.mxu0 %v1850_v51  ;;  %v2331_v51 = vld [vmem:[#allocation7 + $0x98] sm:$0xff] }
 0x529   :  { %2184 = vmatpush1.bf16.msra.mxu1 %v1852_v30  ;;  %2103 = vmatprep.subr.bf16.mxu0 %v1859_v31  ;;  %v2406_v30 = vunpack.c.h.s8.bf16 %v2324_v20  ;;  %v2408_v31 = vunpack.c.h.s8.bf16 %v2326_v46  ;;  %v2413_v33 = vunpack.c.l.s8.bf16 %v2331_v51  ;;  %v2417_v38 = vunpack.c.h.s8.bf16 %v2331_v51  ;;  %v5420_v46 = vld [vmem:[%s5772_s6] sm:$0xff] }
 0x52a   :  { %2185 = vmatprep.subr.bf16.mxu1 %v1861_v32  ;;  %v2328_v32 = vld [vmem:[#allocation7 + $0x80] sm:$0xff]  ;;  %v2443_v20 = vunpack.c.l.s8.bf16 %v5411_v16 }
 0x52c   :  { %2104 = vmatpush1.bf16.msra.mxu0 %v1858_v34  ;;  %v2330_v34 = vld [vmem:[#allocation7 + $0x90] sm:$0xff] }
 0x52d   :  { %2186 = vmatpush1.bf16.msra.mxu1 %v1860_v35  ;;  %2105 = vmatprep.subr.bf16.mxu0 %v1867_v36  ;;  %v2410_v35 = vunpack.c.l.s8.bf16 %v2328_v32  ;;  %v2412_v36 = vunpack.c.l.s8.bf16 %v2330_v34 }
 0x52e   :  { %2187 = vmatprep.subr.bf16.mxu1 %v1869_v37  ;;  %v2415_v37 = vunpack.c.h.s8.bf16 %v2329_v28 }
 0x530   :  { %2106 = vmatpush1.bf16.msra.mxu0 %v1866_v41  ;;  %v2335_v41 = vld [vmem:[#allocation7 + $0xb8] sm:$0xff] }
 0x531   :  { %2188 = vmatpush1.bf16.msra.mxu1 %v1868_v42  ;;  %2506 = vmatprep.subr.bf16.mxu0 %v2379_v43  ;;  %v2414_v42 = vunpack.c.h.s8.bf16 %v2328_v32  ;;  %v2416_v43 = vunpack.c.h.s8.bf16 %v2330_v34  ;;  %v2421_v39 = vunpack.c.l.s8.bf16 %v2335_v41  ;;  %v2425_v55 = vunpack.c.h.s8.bf16 %v2335_v41 }
 0x532   :  { %2588 = vmatprep.subr.bf16.mxu1 %v2381_v50  ;;  %v2332_v50 = vld [vmem:[#allocation7 + $0xa0] sm:$0xff] }
 0x533   :  { %2108 = vmatmul.mubr.bf16.vlgmr.msra.gmra.mrb[20].mxu0 %v5399_v26 }
 0x534   :  { %2190 = vmatmul.mubr.bf16.vlgmr.msra.gmra.mrb[20].mxu1 %v5399_v26  ;;  %2507 = vmatpush1.bf16.msra.mxu0 %v2378_v52  ;;  %v2323_v26 = vld [vmem:[#allocation7 + $0x58] sm:$0xff]  ;;  %v2334_v52 = vld [vmem:[#allocation7 + $0xb0] sm:$0xff] }
 0x535   :  { %2589 = vmatpush1.bf16.msra.mxu1 %v2380_v57  ;;  %2508 = vmatprep.subr.bf16.mxu0 %v2383_v53  ;;  %v2397_v9 = vunpack.c.l.s8.bf16 %v2323_v26  ;;  %v2401_v14 = vunpack.c.h.s8.bf16 %v2323_v26  ;;  %v2418_v57 = vunpack.c.l.s8.bf16 %v2332_v50  ;;  %v2420_v53 = vunpack.c.l.s8.bf16 %v2334_v52  ;;  %v2341_v26 = vld [vmem:[#allocation7 + $0xe8] sm:$0xff] }
 0x536   :  { %2590 = vmatprep.subr.bf16.mxu1 %v2385_v54  ;;  %v2423_v54 = vunpack.c.h.s8.bf16 %v2333_v40  ;;  %v2435_v8 = vunpack.c.l.s8.bf16 %v2341_v26 }
 0x538   :  { %2509 = vmatpush1.bf16.msra.mxu0 %v2382_v58  ;;  %v2339_v58 = vld [vmem:[#allocation7 + $0xd8] sm:$0xff] }
 0x539   :  { %2591 = vmatpush1.bf16.msra.mxu1 %v2384_v59  ;;  %2510 = vmatprep.subr.bf16.mxu0 %v2387_v60  ;;  %v2422_v59 = vunpack.c.h.s8.bf16 %v2332_v50  ;;  %v2424_v60 = vunpack.c.h.s8.bf16 %v2334_v52  ;;  %v2429_v63 = vunpack.c.l.s8.bf16 %v2339_v58  ;;  %v2433_v4 = vunpack.c.h.s8.bf16 %v2339_v58  ;;  %v2346_v52 = vld [vmem:[#allocation7 + $0x110] sm:$0xff] }
 0x53a   :  { %2592 = vmatprep.subr.bf16.mxu1 %v2389_v62  ;;  %v2336_v62 = vld [vmem:[#allocation7 + $0xc0] sm:$0xff] }
 0x53c   :  { %2511 = vmatpush1.bf16.msra.mxu0 %v2386_v0  ;;  %v2338_v0 = vld [vmem:[#allocation7 + $0xd0] sm:$0xff] }
 0x53d   :  { %2593 = vmatpush1.bf16.msra.mxu1 %v2388_v1  ;;  %2512 = vmatprep.subr.bf16.mxu0 %v2391_v2  ;;  %v2426_v1 = vunpack.c.l.s8.bf16 %v2336_v62  ;;  %v2428_v2 = vunpack.c.l.s8.bf16 %v2338_v0 }
 0x53e   :  { %2594 = vmatprep.subr.bf16.mxu1 %v2393_v3  ;;  %v2431_v3 = vunpack.c.h.s8.bf16 %v2337_v56  ;;  %v2444_v56 = vunpack.c.l.s8.bf16 %v2346_v52 }
 0x540   :  { %2513 = vmatpush1.bf16.msra.mxu0 %v2390_v5  ;;  %v2343_v5 = vld [vmem:[#allocation7 + $0xf8] sm:$0xff] }
 0x541   :  { %2595 = vmatpush1.bf16.msra.mxu1 %v2392_v6  ;;  %2514 = vmatprep.subr.bf16.mxu0 %v2395_v7  ;;  %v2430_v6 = vunpack.c.h.s8.bf16 %v2336_v62  ;;  %v2432_v7 = vunpack.c.h.s8.bf16 %v2338_v0  ;;  %v2437_v10 = vunpack.c.l.s8.bf16 %v2343_v5  ;;  %v2441_v15 = vunpack.c.h.s8.bf16 %v2343_v5  ;;  %v2351_v62 = vld [vmem:[#allocation7 + $0x138] sm:$0xff] }
 0x542   :  { %2596 = vmatprep.subr.bf16.mxu1 %v2397_v9  ;;  %v2340_v9 = vld [vmem:[#allocation7 + $0xe0] sm:$0xff] }
 0x544   :  { %2515 = vmatpush1.bf16.msra.mxu0 %v2394_v11  ;;  %v2342_v11 = vld [vmem:[#allocation7 + $0xf0] sm:$0xff] }
 0x545   :  { %2597 = vmatpush1.bf16.msra.mxu1 %v2396_v12  ;;  %2516 = vmatprep.subr.bf16.mxu0 %v2399_v13  ;;  %v2434_v12 = vunpack.c.l.s8.bf16 %v2340_v9  ;;  %v2436_v13 = vunpack.c.l.s8.bf16 %v2342_v11 }
 0x546   :  { %2598 = vmatprep.subr.bf16.mxu1 %v2401_v14  ;;  %v2439_v14 = vunpack.c.h.s8.bf16 %v2341_v26  ;;  %v2350_v26 = vld [vmem:[#allocation7 + $0x130] sm:$0xff] }
 0x548   :  { %2517 = vmatpush1.bf16.msra.mxu0 %v2398_v17  ;;  %v5413_v17 = vld [vmem:[#allocation7 + $0x118] sm:$0xff] }
 0x549   :  { %2599 = vmatpush1.bf16.msra.mxu1 %v2400_v18  ;;  %2518 = vmatprep.subr.bf16.mxu0 %v2403_v19  ;;  %v2438_v18 = vunpack.c.h.s8.bf16 %v2340_v9  ;;  %v2440_v19 = vunpack.c.h.s8.bf16 %v2342_v11  ;;  %v2353_v9 = vld [vmem:[#allocation7 + $0x148] sm:$0xff] }
 0x54a   :  { %2600 = vmatprep.subr.bf16.mxu1 %v2405_v21  ;;  %v2445_v21 = vunpack.c.l.s8.bf16 %v5413_v17 }
 0x54c   :  { %2519 = vmatpush1.bf16.msra.mxu0 %v2402_v22  ;;  %v5425_v22 = vld [vmem:[%s5773_s7] sm:$0xff] }
 0x54d   :  { %2601 = vmatpush1.bf16.msra.mxu1 %v2404_v24  ;;  %2520 = vmatprep.subr.bf16.mxu0 %v2407_v25  ;;  %v2202_v24 = vrot.slane %v5420_v46, %v5309_v45  ;;  %v2206_v25 = vrot.slane %v5420_v46, %v5317_v47  ;;  %v2251_v28 = vrot.slane %v5425_v22, %v5309_v45 }
 0x54e   :  { %2602 = vmatprep.subr.bf16.mxu1 %v2409_v27  ;;  %v2214_v27 = vrot.slane %v5420_v46, %v5320_v48 }
 0x550   :  { %2521 = vmatpush1.bf16.msra.mxu0 %v2406_v30 }
 0x551   :  { %2603 = vmatpush1.bf16.msra.mxu1 %v2408_v31  ;;  %2522 = vmatprep.subr.bf16.mxu0 %v2411_v29  ;;  %v2255_v31 = vrot.slane %v5425_v22, %v5317_v47  ;;  %v2263_v29 = vrot.slane %v5425_v22, %v5320_v48 }
 0x552   :  { %2604 = vmatprep.subr.bf16.mxu1 %v2413_v33 }
 0x554   :  { %2523 = vmatpush1.bf16.msra.mxu0 %v2410_v35 }
 0x555   :  { %2605 = vmatpush1.bf16.msra.mxu1 %v2412_v36  ;;  %2524 = vmatprep.subr.bf16.mxu0 %v2415_v37 }
 0x556   :  { %2606 = vmatprep.subr.bf16.mxu1 %v2417_v38 }
 0x558   :  { %2525 = vmatpush1.bf16.msra.mxu0 %v2414_v42 }
 0x559   :  { %2607 = vmatpush1.bf16.msra.mxu1 %v2416_v43  ;;  %2526 = vmatprep.subr.bf16.mxu0 %v2419_v49 }
 0x55a   :  { %2608 = vmatprep.subr.bf16.mxu1 %v2421_v39  ;;  %v2344_v39 = vld [vmem:[#allocation7 + $0x100] sm:$0xff] }
 0x55b   :  { %v2446_v0 = vunpack.c.h.s8.bf16 %v2344_v39 }
 0x55c   :  { %2527 = vmatpush1.bf16.msra.mxu0 %v2418_v57 }
 0x55d   :  { %2609 = vmatpush1.bf16.msra.mxu1 %v2420_v53  ;;  %2528 = vmatprep.subr.bf16.mxu0 %v2423_v54 }
 0x55e   :  { %2610 = vmatprep.subr.bf16.mxu1 %v2425_v55  ;;  %v2442_v55 = vunpack.c.l.s8.bf16 %v2344_v39 }
 0x560   :  { %2529 = vmatpush1.bf16.msra.mxu0 %v2422_v59  ;;  %v2447_v59 = vunpack.c.h.s8.bf16 %v5411_v16  ;;  %v2354_v16 = vld [vmem:[#allocation7 + $0x150] sm:$0xff] }
 0x561   :  { %2611 = vmatpush1.bf16.msra.mxu1 %v2424_v60  ;;  %2530 = vmatprep.subr.bf16.mxu0 %v2427_v61  ;;  %v2449_v60 = vunpack.c.h.s8.bf16 %v5413_v17  ;;  %v2349_v61 = vld [vmem:[#allocation7 + $0x128] sm:$0xff] }
 0x562   :  { %2612 = vmatprep.subr.bf16.mxu1 %v2429_v63 }
 0x564   :  { %2531 = vmatpush1.bf16.msra.mxu0 %v2426_v1  ;;  %v2448_v1 = vunpack.c.h.s8.bf16 %v2346_v52 }
 0x565   :  { %2613 = vmatpush1.bf16.msra.mxu1 %v2428_v2  ;;  %2532 = vmatprep.subr.bf16.mxu0 %v2431_v3  ;;  %v2451_v2 = vunpack.c.l.s8.bf16 %v2349_v61  ;;  %v2453_v3 = vunpack.c.l.s8.bf16 %v2351_v62 }
 0x566   :  { %2614 = vmatprep.subr.bf16.mxu1 %v2433_v4  ;;  %v2348_v4 = vld [vmem:[#allocation7 + $0x120] sm:$0xff] }
 0x567   :  { %v2450_v5 = vunpack.c.l.s8.bf16 %v2348_v4  ;;  %v2454_v11 = vunpack.c.h.s8.bf16 %v2348_v4 }
 0x568   :  { %2533 = vmatpush1.bf16.msra.mxu0 %v2430_v6  ;;  %v2452_v6 = vunpack.c.l.s8.bf16 %v2350_v26 }
 0x569   :  { %2615 = vmatpush1.bf16.msra.mxu1 %v2432_v7  ;;  %2534 = vmatprep.subr.bf16.mxu0 %v2435_v8  ;;  %v2455_v7 = vunpack.c.h.s8.bf16 %v2349_v61  ;;  %v2457_v8 = vunpack.c.h.s8.bf16 %v2351_v62  ;;  %v2366_v61 = vld [vmem:[#allocation7 + $0x1b0] sm:$0xff] }
 0x56a   :  { %2616 = vmatprep.subr.bf16.mxu1 %v2437_v10  ;;  %v2355_v10 = vld [vmem:[#allocation7 + $0x158] sm:$0xff] }
 0x56c   :  { %2535 = vmatpush1.bf16.msra.mxu0 %v2434_v12  ;;  %v2456_v12 = vunpack.c.h.s8.bf16 %v2350_v26  ;;  %v2488_v26 = vunpack.c.h.s8.bf16 %v2366_v61 }
 0x56d   :  { %2617 = vmatpush1.bf16.msra.mxu1 %v2436_v13  ;;  %2536 = vmatprep.subr.bf16.mxu0 %v2439_v14  ;;  %v2459_v13 = vunpack.c.l.s8.bf16 %v2353_v9  ;;  %v2461_v14 = vunpack.c.l.s8.bf16 %v2355_v10 }
 0x56e   :  { %2618 = vmatprep.subr.bf16.mxu1 %v2441_v15  ;;  %v2352_v15 = vld [vmem:[#allocation7 + $0x140] sm:$0xff] }
 0x56f   :  { %v2458_v17 = vunpack.c.l.s8.bf16 %v2352_v15 }
 0x570   :  { %2537 = vmatpush1.bf16.msra.mxu0 %v2438_v18  ;;  %v2460_v18 = vunpack.c.l.s8.bf16 %v2354_v16 }
 0x571   :  { %2619 = vmatpush1.bf16.msra.mxu1 %v2440_v19  ;;  %2547 = vmatprep.subr.bf16.mxu0 %v2443_v20  ;;  %v2463_v19 = vunpack.c.h.s8.bf16 %v2353_v9  ;;  %v2465_v20 = vunpack.c.h.s8.bf16 %v2355_v10 }
 0x572   :  { %2629 = vmatprep.subr.bf16.mxu1 %v2445_v21  ;;  %v2357_v21 = vld [vmem:[#allocation7 + $0x168] sm:$0xff] }
 0x586   :  { %v1945_v51 = vpop.f32.mrb[16].mxu0  ;;  %v5435_v30 = vpop.f32.mrb[16].mxu1 }
 0x587   :  { %v2239_v32 = vmul.f32 %v2202_v24, %v1945_v51  ;;  %v1947_v33 = vpop.f32.mrb[17].mxu0  ;;  %v2029_v34 = vpop.f32.mrb[17].mxu1  ;;  %v2359_v24 = vld [vmem:[#allocation7 + $0x178] sm:$0xff] }
 0x588   :  { %v2240_v35 = vmul.f32 %v2206_v25, %v1947_v33  ;;  %v2242_v36 = vmul.f32 %v2214_v27, %v2029_v34  ;;  %v1949_v37 = vpop.f32.mrb[18].mxu0  ;;  %v2031_v38 = vpop.f32.mrb[18].mxu1  ;;  %v2462_v25 = vunpack.c.h.s8.bf16 %v2352_v15  ;;  %v2464_v27 = vunpack.c.h.s8.bf16 %v2354_v16  ;;  %v2375_v15 = vld [vmem:[#allocation7 + $0x1f8] sm:$0xff] }
 0x589   :  { %v2288_v40 = vadd.f32 %v2251_v28, %v2239_v32  ;;  %v1950_v41 = vpop.f32.mrb[19].mxu0  ;;  %v2032_v42 = vpop.f32.mrb[19].mxu1  ;;  %v2467_v28 = vunpack.c.l.s8.bf16 %v2357_v21  ;;  %v2469_v51 = vunpack.c.l.s8.bf16 %v2359_v24  ;;  %v2471_v34 = vunpack.c.h.s8.bf16 %v2357_v21  ;;  %v2363_v37 = vld [vmem:[#allocation7 + $0x198] sm:$0xff] }
 0x58a   :  { %v2289_v43 = vadd.f32 %v2255_v31, %v2240_v35  ;;  %v2291_v49 = vadd.f32 %v2263_v29, %v2242_v36  ;;  %v2356_v31 = vld [vmem:[#allocation7 + $0x160] sm:$0xff]  ;;  %v2358_v29 = vld [vmem:[#allocation7 + $0x170] sm:$0xff]  ;;  %v2473_v35 = vunpack.c.h.s8.bf16 %v2359_v24  ;;  %v2361_v36 = vld [vmem:[#allocation7 + $0x188] sm:$0xff]  ;;  %v2477_v42 = vunpack.c.l.s8.bf16 %v2363_v37 }
 0x58b   :  { %v2296_v50 = vmax.f32 %v2288_v40, 0.0  ;;  %v2466_v32 = vunpack.c.l.s8.bf16 %v2356_v31  ;;  %v2468_v33 = vunpack.c.l.s8.bf16 %v2358_v29  ;;  %v2470_v38 = vunpack.c.h.s8.bf16 %v2356_v31  ;;  %v2374_v24 = vld [vmem:[#allocation7 + $0x1f0] sm:$0xff] }
 0x58c   :  { %v2297_v57 = vmax.f32 %v2289_v43, 0.0  ;;  %v2299_v53 = vmax.f32 %v2291_v49, 0.0  ;;  %v2472_v40 = vunpack.c.h.s8.bf16 %v2358_v29  ;;  %v2475_v41 = vunpack.c.l.s8.bf16 %v2361_v36  ;;  %v2360_v43 = vld [vmem:[#allocation7 + $0x180] sm:$0xff]  ;;  %v2362_v49 = vld [vmem:[#allocation7 + $0x190] sm:$0xff]  ;;  %v2730_v29 = vld [vmem:[#allocation7 + $0x208] sm:$0xff] }
 0x58d   :  { %v2304_v58 = vpack.c.bf16 %v2296_v50, %v2296_v50  ;;  %v2474_v50 = vunpack.c.l.s8.bf16 %v2360_v43  ;;  %v2476_v39 = vunpack.c.l.s8.bf16 %v2362_v49  ;;  %v2479_v52 = vunpack.c.h.s8.bf16 %v2361_v36  ;;  %v2729_v36 = vld [vmem:[#allocation7 + $0x200] sm:$0xff] }
 0x58e   :  { %v2305_v54 = vpack.c.bf16 %v2297_v57, %v2297_v57  ;;  %v2307_v63 = vpack.c.bf16 %v2299_v53, %v2299_v53  ;;  %v2481_v57 = vunpack.c.h.s8.bf16 %v2363_v37  ;;  %v2365_v53 = vld [vmem:[#allocation7 + $0x1a8] sm:$0xff]  ;;  %v2501_v21 = vunpack.c.l.s8.bf16 %v2375_v15  ;;  %v2731_v37 = vld [vmem:[#allocation7 + $0x210] sm:$0xff] }
 0x58f   :  { %v2505_v31 = vunpack.c.h.s8.bf16 %v2375_v15  ;;  %v2743_v15 = vld [vmem:[#allocation7 + $0x270] sm:$0xff] }
 0x590   :  { %2538 = vmatprep.mubr.bf16.mxu0 %v2305_v54  ;;  %2620 = vmatprep.mubr.bf16.mxu1 %v2305_v54  ;;  %v2367_v54 = vld [vmem:[#allocation7 + $0x1b8] sm:$0xff] }
 0x591   :  { %2539 = vmatmul.mubr.bf16.vlgmr.msra.gmra.mrb[24].mxu0 %v2304_v58  ;;  %2621 = vmatmul.mubr.bf16.vlgmr.msra.gmra.mrb[24].mxu1 %v2304_v58  ;;  %v2483_v58 = vunpack.c.l.s8.bf16 %v2365_v53 }
 0x592   :  { %2548 = vmatpush1.bf16.msra.mxu0 %v2442_v55  ;;  %2630 = vmatpush1.bf16.msra.mxu1 %v2444_v56  ;;  %v2478_v55 = vunpack.c.h.s8.bf16 %v2360_v43  ;;  %v2480_v56 = vunpack.c.h.s8.bf16 %v2362_v49  ;;  %v2734_v49 = vld [vmem:[#allocation7 + $0x228] sm:$0xff] }
 0x593   :  { %2579 = vmatprep.mubr.bf16.mxu0 %v2307_v63  ;;  %2661 = vmatprep.mubr.bf16.mxu1 %v2307_v63  ;;  %v2484_v63 = vunpack.c.l.s8.bf16 %v2366_v61  ;;  %v2738_v61 = vld [vmem:[#allocation7 + $0x248] sm:$0xff] }
 0x594   :  { %2549 = vmatprep.subr.bf16.mxu0 %v2447_v59  ;;  %2631 = vmatprep.subr.bf16.mxu1 %v2449_v60  ;;  %v2485_v59 = vunpack.c.l.s8.bf16 %v2367_v54  ;;  %v2364_v60 = vld [vmem:[#allocation7 + $0x1a0] sm:$0xff] }
 0x595   :  { %v2482_v62 = vunpack.c.l.s8.bf16 %v2364_v60  ;;  %v2486_v4 = vunpack.c.h.s8.bf16 %v2364_v60 }
 0x596   :  { %2550 = vmatpush1.bf16.msra.mxu0 %v2446_v0  ;;  %2632 = vmatpush1.bf16.msra.mxu1 %v2448_v1  ;;  %v2487_v0 = vunpack.c.h.s8.bf16 %v2365_v53  ;;  %v2489_v1 = vunpack.c.h.s8.bf16 %v2367_v54  ;;  %v2733_v54 = vld [vmem:[#allocation7 + $0x220] sm:$0xff] }
 0x597   :  { %2551 = vmatprep.subr.bf16.mxu0 %v2451_v2  ;;  %2633 = vmatprep.subr.bf16.mxu1 %v2453_v3  ;;  %v2369_v2 = vld [vmem:[#allocation7 + $0x1c8] sm:$0xff]  ;;  %v2371_v3 = vld [vmem:[#allocation7 + $0x1d8] sm:$0xff] }
 0x59a   :  { %2552 = vmatpush1.bf16.msra.mxu0 %v2450_v5  ;;  %2634 = vmatpush1.bf16.msra.mxu1 %v2452_v6  ;;  %v2491_v5 = vunpack.c.l.s8.bf16 %v2369_v2  ;;  %v2493_v6 = vunpack.c.l.s8.bf16 %v2371_v3 }
 0x59b   :  { %2553 = vmatprep.subr.bf16.mxu0 %v2455_v7  ;;  %2635 = vmatprep.subr.bf16.mxu1 %v2457_v8  ;;  %v2368_v7 = vld [vmem:[#allocation7 + $0x1c0] sm:$0xff]  ;;  %v2370_v8 = vld [vmem:[#allocation7 + $0x1d0] sm:$0xff] }
 0x59c   :  { %v2490_v9 = vunpack.c.l.s8.bf16 %v2368_v7  ;;  %v2492_v10 = vunpack.c.l.s8.bf16 %v2370_v8  ;;  %v2494_v16 = vunpack.c.h.s8.bf16 %v2368_v7 }
 0x59e   :  { %2554 = vmatpush1.bf16.msra.mxu0 %v2454_v11  ;;  %2636 = vmatpush1.bf16.msra.mxu1 %v2456_v12  ;;  %v2210_v11 = vrot.slane %v5420_v46, %v5331_v23  ;;  %v2495_v12 = vunpack.c.h.s8.bf16 %v2369_v2  ;;  %v2372_v46 = vld [vmem:[#allocation7 + $0x1e0] sm:$0xff] }
 0x59f   :  { %2555 = vmatprep.subr.bf16.mxu0 %v2459_v13  ;;  %2637 = vmatprep.subr.bf16.mxu1 %v2461_v14  ;;  %v2497_v13 = vunpack.c.h.s8.bf16 %v2371_v3  ;;  %v2373_v14 = vld [vmem:[#allocation7 + $0x1e8] sm:$0xff]  ;;  %v2737_v3 = vld [vmem:[#allocation7 + $0x240] sm:$0xff] }
 0x5a2   :  { %2556 = vmatpush1.bf16.msra.mxu0 %v2458_v17  ;;  %2638 = vmatpush1.bf16.msra.mxu1 %v2460_v18  ;;  %v2496_v17 = vunpack.c.h.s8.bf16 %v2370_v8  ;;  %v2241_v18 = vmul.f32 %v2210_v11, %v5435_v30  ;;  %v2732_v30 = vld [vmem:[#allocation7 + $0x218] sm:$0xff]  ;;  %v2742_v8 = vld [vmem:[#allocation7 + $0x268] sm:$0xff] }
 0x5a3   :  { %2557 = vmatprep.subr.bf16.mxu0 %v2463_v19  ;;  %2639 = vmatprep.subr.bf16.mxu1 %v2465_v20  ;;  %v2259_v19 = vrot.slane %v5425_v22, %v5331_v23  ;;  %v2499_v20 = vunpack.c.l.s8.bf16 %v2373_v14  ;;  %v2502_v22 = vunpack.c.h.s8.bf16 %v2372_v46  ;;  %v2804_v43 = vunpack.c.h.s8.bf16 %v2732_v30 }
 0x5a6   :  { %2558 = vmatpush1.bf16.msra.mxu0 %v2462_v25  ;;  %2640 = vmatpush1.bf16.msra.mxu1 %v2464_v27  ;;  %v2498_v25 = vunpack.c.l.s8.bf16 %v2372_v46  ;;  %v2500_v27 = vunpack.c.l.s8.bf16 %v2374_v24 }
 0x5a7   :  { %2559 = vmatprep.subr.bf16.mxu0 %v2467_v28  ;;  %2641 = vmatprep.subr.bf16.mxu1 %v2469_v51  ;;  %v2290_v28 = vadd.f32 %v2259_v19, %v2241_v18  ;;  %v2503_v51 = vunpack.c.h.s8.bf16 %v2373_v14  ;;  %v2741_v14 = vld [vmem:[#allocation7 + $0x260] sm:$0xff]  ;;  %v2826_v18 = vunpack.c.h.s8.bf16 %v2742_v8 }
 0x5a8   :  { %v2825_v46 = vunpack.c.h.s8.bf16 %v2741_v14 }
 0x5aa   :  { %2560 = vmatpush1.bf16.msra.mxu0 %v2466_v32  ;;  %2642 = vmatpush1.bf16.msra.mxu1 %v2468_v33  ;;  %v2504_v32 = vunpack.c.h.s8.bf16 %v2374_v24  ;;  %v2298_v33 = vmax.f32 %v2290_v28, 0.0  ;;  %v2827_v24 = vunpack.c.h.s8.bf16 %v2743_v15  ;;  %v2745_v28 = vld [vmem:[#allocation7 + $0x280] sm:$0xff] }
 0x5ab   :  { %2561 = vmatprep.subr.bf16.mxu0 %v2471_v34  ;;  %2643 = vmatprep.subr.bf16.mxu1 %v2473_v35  ;;  %v2798_v34 = vunpack.c.l.s8.bf16 %v2730_v29  ;;  %v2800_v35 = vunpack.c.l.s8.bf16 %v2732_v30 }
 0x5ae   :  { %2562 = vmatpush1.bf16.msra.mxu0 %v2470_v38  ;;  %2644 = vmatpush1.bf16.msra.mxu1 %v2472_v40  ;;  %v2797_v38 = vunpack.c.l.s8.bf16 %v2729_v36  ;;  %v2799_v40 = vunpack.c.l.s8.bf16 %v2731_v37 }
 0x5af   :  { %2563 = vmatprep.subr.bf16.mxu0 %v2475_v41  ;;  %2645 = vmatprep.subr.bf16.mxu1 %v2477_v42  ;;  %v2306_v41 = vpack.c.bf16 %v2298_v33, %v2298_v33  ;;  %v2802_v42 = vunpack.c.h.s8.bf16 %v2730_v29  ;;  %v2752_v33 = vld [vmem:[#allocation7 + $0x2b8] sm:$0xff] }
 0x5b2   :  { %2564 = vmatpush1.bf16.msra.mxu0 %v2474_v50  ;;  %2646 = vmatpush1.bf16.msra.mxu1 %v2476_v39  ;;  %v2736_v50 = vld [vmem:[#allocation7 + $0x238] sm:$0xff]  ;;  %v2801_v39 = vunpack.c.h.s8.bf16 %v2729_v36 }
 0x5b3   :  { %2565 = vmatprep.subr.bf16.mxu0 %v2479_v52  ;;  %2647 = vmatprep.subr.bf16.mxu1 %v2481_v57  ;;  %v2803_v52 = vunpack.c.h.s8.bf16 %v2731_v37  ;;  %v2806_v57 = vunpack.c.l.s8.bf16 %v2734_v49  ;;  %v2808_v53 = vunpack.c.l.s8.bf16 %v2736_v50  ;;  %v2812_v60 = vunpack.c.h.s8.bf16 %v2736_v50  ;;  %v2754_v50 = vld [vmem:[#allocation7 + $0x2c8] sm:$0xff] }
 0x5b4   :  { %v2840_v37 = vunpack.c.l.s8.bf16 %v2752_v33 }
 0x5b6   :  { %2566 = vmatpush1.bf16.msra.mxu0 %v2478_v55  ;;  %2648 = vmatpush1.bf16.msra.mxu1 %v2480_v56  ;;  %v2735_v55 = vld [vmem:[#allocation7 + $0x230] sm:$0xff]  ;;  %v2805_v56 = vunpack.c.l.s8.bf16 %v2733_v54 }
 0x5b7   :  { %2567 = vmatprep.subr.bf16.mxu0 %v2483_v58  ;;  %2649 = vmatprep.subr.bf16.mxu1 %v2485_v59  ;;  %v2807_v58 = vunpack.c.l.s8.bf16 %v2735_v55  ;;  %v2810_v59 = vunpack.c.h.s8.bf16 %v2734_v49  ;;  %v2844_v49 = vunpack.c.h.s8.bf16 %v2752_v33 }
 0x5ba   :  { %2568 = vmatpush1.bf16.msra.mxu0 %v2482_v62  ;;  %2650 = vmatpush1.bf16.msra.mxu1 %v2484_v63  ;;  %v2740_v62 = vld [vmem:[#allocation7 + $0x258] sm:$0xff]  ;;  %v2809_v63 = vunpack.c.h.s8.bf16 %v2733_v54 }
 0x5bb   :  { %2569 = vmatprep.subr.bf16.mxu0 %v2487_v0  ;;  %2651 = vmatprep.subr.bf16.mxu1 %v2489_v1  ;;  %v2811_v0 = vunpack.c.h.s8.bf16 %v2735_v55  ;;  %v2814_v1 = vunpack.c.l.s8.bf16 %v2738_v61  ;;  %v2816_v2 = vunpack.c.l.s8.bf16 %v2740_v62  ;;  %v2820_v7 = vunpack.c.h.s8.bf16 %v2740_v62  ;;  %v2753_v55 = vld [vmem:[#allocation7 + $0x2c0] sm:$0xff] }
 0x5bc   :  { %v2849_v62 = vunpack.c.h.s8.bf16 %v2753_v55 }
 0x5be   :  { %2570 = vmatpush1.bf16.msra.mxu0 %v2486_v4  ;;  %2652 = vmatpush1.bf16.msra.mxu1 %v2488_v26  ;;  %v2739_v4 = vld [vmem:[#allocation7 + $0x250] sm:$0xff]  ;;  %v2813_v26 = vunpack.c.l.s8.bf16 %v2737_v3 }
 0x5bf   :  { %2571 = vmatprep.subr.bf16.mxu0 %v2491_v5  ;;  %2653 = vmatprep.subr.bf16.mxu1 %v2493_v6  ;;  %v2815_v5 = vunpack.c.l.s8.bf16 %v2739_v4  ;;  %v2818_v6 = vunpack.c.h.s8.bf16 %v2738_v61  ;;  %v2819_v11 = vunpack.c.h.s8.bf16 %v2739_v4 }
 0x5c2   :  { %2572 = vmatpush1.bf16.msra.mxu0 %v2490_v9  ;;  %2654 = vmatpush1.bf16.msra.mxu1 %v2492_v10  ;;  %v2744_v9 = vld [vmem:[#allocation7 + $0x278] sm:$0xff]  ;;  %v2817_v10 = vunpack.c.h.s8.bf16 %v2737_v3 }
 0x5c3   :  { %2573 = vmatprep.subr.bf16.mxu0 %v2495_v12  ;;  %2655 = vmatprep.subr.bf16.mxu1 %v2497_v13  ;;  %v2822_v12 = vunpack.c.l.s8.bf16 %v2742_v8  ;;  %v2824_v13 = vunpack.c.l.s8.bf16 %v2744_v9  ;;  %v2828_v19 = vunpack.c.h.s8.bf16 %v2744_v9  ;;  %v2760_v8 = vld [vmem:[#allocation7 + $0x2f8] sm:$0xff] }
 0x5c6   :  { %2574 = vmatpush1.bf16.msra.mxu0 %v2494_v16  ;;  %2656 = vmatpush1.bf16.msra.mxu1 %v2496_v17  ;;  %v2821_v16 = vunpack.c.l.s8.bf16 %v2741_v14  ;;  %v2823_v17 = vunpack.c.l.s8.bf16 %v2743_v15 }
 0x5c7   :  { %2575 = vmatprep.subr.bf16.mxu0 %v2499_v20  ;;  %2657 = vmatprep.subr.bf16.mxu1 %v2501_v21  ;;  %v2746_v20 = vld [vmem:[#allocation7 + $0x288] sm:$0xff]  ;;  %v2748_v21 = vld [vmem:[#allocation7 + $0x298] sm:$0xff] }
 0x5c8   :  { %v2834_v30 = vunpack.c.h.s8.bf16 %v2746_v20 }
 0x5ca   :  { %2576 = vmatpush1.bf16.msra.mxu0 %v2498_v25  ;;  %2658 = vmatpush1.bf16.msra.mxu1 %v2500_v27  ;;  %v2830_v25 = vunpack.c.l.s8.bf16 %v2746_v20  ;;  %v2832_v27 = vunpack.c.l.s8.bf16 %v2748_v21  ;;  %v2764_v20 = vld [vmem:[#allocation7 + $0x318] sm:$0xff] }
 0x5cb   :  { %2577 = vmatprep.subr.bf16.mxu0 %v2503_v51  ;;  %2659 = vmatprep.subr.bf16.mxu1 %v2505_v31  ;;  %v2747_v51 = vld [vmem:[#allocation7 + $0x290] sm:$0xff]  ;;  %v2829_v31 = vunpack.c.l.s8.bf16 %v2745_v28 }
 0x5cc   :  { %v2831_v29 = vunpack.c.l.s8.bf16 %v2747_v51 }
 0x5ce   :  { %2578 = vmatpush1.bf16.msra.mxu0 %v2502_v22  ;;  %2660 = vmatpush1.bf16.msra.mxu1 %v2504_v32  ;;  %v2836_v22 = vunpack.c.h.s8.bf16 %v2748_v21  ;;  %v2750_v32 = vld [vmem:[#allocation7 + $0x2a8] sm:$0xff] }
 0x5cf   :  { %2925 = vmatprep.subr.bf16.mxu0 %v2798_v34  ;;  %3007 = vmatprep.subr.bf16.mxu1 %v2800_v35  ;;  %v2833_v34 = vunpack.c.h.s8.bf16 %v2745_v28  ;;  %v2835_v35 = vunpack.c.h.s8.bf16 %v2747_v51  ;;  %v2838_v36 = vunpack.c.l.s8.bf16 %v2750_v32 }
 0x5d1   :  { %2580 = vmatmul.mubr.bf16.vlgmr.msra.gmra.mrb[24].mxu0 %v2306_v41  ;;  %2662 = vmatmul.mubr.bf16.vlgmr.msra.gmra.mrb[24].mxu1 %v2306_v41 }
 0x5d2   :  { %2926 = vmatpush1.bf16.msra.mxu0 %v2797_v38  ;;  %3008 = vmatpush1.bf16.msra.mxu1 %v2799_v40  ;;  %v2749_v38 = vld [vmem:[#allocation7 + $0x2a0] sm:$0xff]  ;;  %v2751_v40 = vld [vmem:[#allocation7 + $0x2b0] sm:$0xff] }
 0x5d3   :  { %2927 = vmatprep.subr.bf16.mxu0 %v2802_v42  ;;  %3009 = vmatprep.subr.bf16.mxu1 %v2804_v43  ;;  %v2837_v41 = vunpack.c.l.s8.bf16 %v2749_v38  ;;  %v2839_v42 = vunpack.c.l.s8.bf16 %v2751_v40  ;;  %v2842_v43 = vunpack.c.h.s8.bf16 %v2750_v32 }
 0x5d6   :  { %2928 = vmatpush1.bf16.msra.mxu0 %v2801_v39  ;;  %3010 = vmatpush1.bf16.msra.mxu1 %v2803_v52  ;;  %v2756_v39 = vld [vmem:[#allocation7 + $0x2d8] sm:$0xff]  ;;  %v2841_v52 = vunpack.c.h.s8.bf16 %v2749_v38 }
 0x5d7   :  { %2929 = vmatprep.subr.bf16.mxu0 %v2806_v57  ;;  %3011 = vmatprep.subr.bf16.mxu1 %v2808_v53  ;;  %v2843_v57 = vunpack.c.h.s8.bf16 %v2751_v40  ;;  %v2846_v53 = vunpack.c.l.s8.bf16 %v2754_v50  ;;  %v2848_v54 = vunpack.c.l.s8.bf16 %v2756_v39  ;;  %v2852_v61 = vunpack.c.h.s8.bf16 %v2756_v39 }
 0x5da   :  { %2930 = vmatpush1.bf16.msra.mxu0 %v2805_v56  ;;  %3012 = vmatpush1.bf16.msra.mxu1 %v2807_v58  ;;  %v2755_v56 = vld [vmem:[#allocation7 + $0x2d0] sm:$0xff]  ;;  %v2845_v58 = vunpack.c.l.s8.bf16 %v2753_v55  ;;  %v2761_v55 = vld [vmem:[#allocation7 + $0x300] sm:$0xff] }
 0x5db   :  { %2931 = vmatprep.subr.bf16.mxu0 %v2810_v59  ;;  %3013 = vmatprep.subr.bf16.mxu1 %v2812_v60  ;;  %v2847_v59 = vunpack.c.l.s8.bf16 %v2755_v56  ;;  %v2850_v60 = vunpack.c.h.s8.bf16 %v2754_v50 }
 0x5de   :  { %2932 = vmatpush1.bf16.msra.mxu0 %v2809_v63  ;;  %3014 = vmatpush1.bf16.msra.mxu1 %v2811_v0  ;;  %v2851_v63 = vunpack.c.h.s8.bf16 %v2755_v56  ;;  %v2763_v56 = vld [vmem:[#allocation7 + $0x310] sm:$0xff] }
 0x5df   :  { %2933 = vmatprep.subr.bf16.mxu0 %v2814_v1  ;;  %3015 = vmatprep.subr.bf16.mxu1 %v2816_v2 }
 0x5e2   :  { %2934 = vmatpush1.bf16.msra.mxu0 %v2813_v26  ;;  %3016 = vmatpush1.bf16.msra.mxu1 %v2815_v5 }
 0x5e3   :  { %2935 = vmatprep.subr.bf16.mxu0 %v2818_v6  ;;  %3017 = vmatprep.subr.bf16.mxu1 %v2820_v7  ;;  %v2758_v7 = vld [vmem:[#allocation7 + $0x2e8] sm:$0xff] }
 0x5e4   :  { %v2854_v9 = vunpack.c.l.s8.bf16 %v2758_v7  ;;  %v2858_v15 = vunpack.c.h.s8.bf16 %v2758_v7 }
 0x5e6   :  { %2936 = vmatpush1.bf16.msra.mxu0 %v2817_v10  ;;  %3018 = vmatpush1.bf16.msra.mxu1 %v2819_v11  ;;  %v2757_v10 = vld [vmem:[#allocation7 + $0x2e0] sm:$0xff]  ;;  %v2759_v11 = vld [vmem:[#allocation7 + $0x2f0] sm:$0xff] }
 0x5e7   :  { %2937 = vmatprep.subr.bf16.mxu0 %v2822_v12  ;;  %3019 = vmatprep.subr.bf16.mxu1 %v2824_v13  ;;  %v2856_v12 = vunpack.c.l.s8.bf16 %v2760_v8  ;;  %v2853_v13 = vunpack.c.l.s8.bf16 %v2757_v10  ;;  %v2855_v14 = vunpack.c.l.s8.bf16 %v2759_v11 }
 0x5ea   :  { %2938 = vmatpush1.bf16.msra.mxu0 %v2821_v16  ;;  %3020 = vmatpush1.bf16.msra.mxu1 %v2823_v17  ;;  %v2860_v16 = vunpack.c.h.s8.bf16 %v2760_v8  ;;  %v2857_v17 = vunpack.c.h.s8.bf16 %v2757_v10  ;;  %v2865_v8 = vunpack.c.h.s8.bf16 %v2761_v55 }
 0x5eb   :  { %2939 = vmatprep.subr.bf16.mxu0 %v2826_v18  ;;  %3021 = vmatprep.subr.bf16.mxu1 %v2828_v19  ;;  %v2859_v18 = vunpack.c.h.s8.bf16 %v2759_v11  ;;  %v2762_v19 = vld [vmem:[#allocation7 + $0x308] sm:$0xff] }
 0x5ec   :  { %v2862_v21 = vunpack.c.l.s8.bf16 %v2762_v19 }
 0x5ee   :  { %2940 = vmatpush1.bf16.msra.mxu0 %v2825_v46  ;;  %3022 = vmatpush1.bf16.msra.mxu1 %v2827_v24  ;;  %v2864_v46 = vunpack.c.l.s8.bf16 %v2764_v20  ;;  %v2376_v24 = vld [vmem:[%s5775_s9] ss:$4 sm:$0xf] }
 0x5ef   :  { %2941 = vmatprep.subr.bf16.mxu0 %v2830_v25  ;;  %3023 = vmatprep.subr.bf16.mxu1 %v2832_v27  ;;  %v2377_v25 = vld [vmem:[%s5776_s10] ss:$4 sm:$0xf]  ;;  %v2674_v27 = vrot.slane %v2376_v24, %v5309_v45  ;;  %v2682_v28 = vrot.slane %v2376_v24, %v5331_v23  ;;  %v2678_v51 = vrot.slane %v2376_v24, %v5317_v47 }
 0x5f0   :  { %v2703_v33 = vrot.slane %v2377_v25, %v5317_v47 }
 0x5f2   :  { %2942 = vmatpush1.bf16.msra.mxu0 %v2829_v31  ;;  %3024 = vmatpush1.bf16.msra.mxu1 %v2831_v29  ;;  %v2686_v31 = vrot.slane %v2376_v24, %v5320_v48  ;;  %v2699_v29 = vrot.slane %v2377_v25, %v5309_v45 }
 0x5f3   :  { %2943 = vmatprep.subr.bf16.mxu0 %v2834_v30  ;;  %3025 = vmatprep.subr.bf16.mxu1 %v2836_v22  ;;  %v2707_v30 = vrot.slane %v2377_v25, %v5331_v23 }
 0x5f6   :  { %2944 = vmatpush1.bf16.msra.mxu0 %v2833_v34  ;;  %3026 = vmatpush1.bf16.msra.mxu1 %v2835_v35  ;;  %v2711_v34 = vrot.slane %v2377_v25, %v5320_v48  ;;  %v2769_v25 = vld [vmem:[#allocation7 + $0x340] sm:$0xff] }
 0x5f7   :  { %2945 = vmatprep.subr.bf16.mxu0 %v2838_v36  ;;  %3027 = vmatprep.subr.bf16.mxu1 %v2840_v37 }
 0x5fa   :  { %2946 = vmatpush1.bf16.msra.mxu0 %v2837_v41  ;;  %3028 = vmatpush1.bf16.msra.mxu1 %v2839_v42 }
 0x5fb   :  { %2947 = vmatprep.subr.bf16.mxu0 %v2842_v43  ;;  %3029 = vmatprep.subr.bf16.mxu1 %v2844_v49 }
 0x5fe   :  { %2948 = vmatpush1.bf16.msra.mxu0 %v2841_v52  ;;  %3030 = vmatpush1.bf16.msra.mxu1 %v2843_v57 }
 0x5ff   :  { %2949 = vmatprep.subr.bf16.mxu0 %v2846_v53  ;;  %3031 = vmatprep.subr.bf16.mxu1 %v2848_v54 }
 0x602   :  { %2950 = vmatpush1.bf16.msra.mxu0 %v2845_v58  ;;  %3032 = vmatpush1.bf16.msra.mxu1 %v2847_v59 }
 0x603   :  { %2951 = vmatprep.subr.bf16.mxu0 %v2850_v60  ;;  %3033 = vmatprep.subr.bf16.mxu1 %v2852_v61  ;;  %v2861_v61 = vunpack.c.l.s8.bf16 %v2761_v55  ;;  %v2779_v55 = vld [vmem:[#allocation7 + $0x390] sm:$0xff] }
 0x606   :  { %v5448_v0 = vpop.f32.mrb[20].mxu0  ;;  %2952 = vmatpush1.bf16.msra.mxu0 %v2849_v62  ;;  %3034 = vmatpush1.bf16.msra.mxu1 %v2851_v63  ;;  %v2863_v62 = vunpack.c.l.s8.bf16 %v2763_v56 }
 0x607   :  { %v5450_v1 = vpop.f32.mrb[20].mxu1  ;;  %v5452_v2 = vpop.f32.mrb[21].mxu0  ;;  %2953 = vmatprep.subr.bf16.mxu0 %v2854_v9  ;;  %3035 = vmatprep.subr.bf16.mxu1 %v2856_v12  ;;  %v2867_v9 = vunpack.c.h.s8.bf16 %v2763_v56  ;;  %v2765_v12 = vld [vmem:[#allocation7 + $0x320] sm:$0xff] }
 0x608   :  { %v5454_v3 = vpop.f32.mrb[21].mxu1  ;;  %v2113_v4 = vpop.f32.mrb[22].mxu0 }
 0x609   :  { %v2195_v26 = vpop.f32.mrb[22].mxu1  ;;  %v2114_v5 = vpop.f32.mrb[23].mxu0  ;;  %v2866_v4 = vunpack.c.h.s8.bf16 %v2762_v19  ;;  %v2772_v19 = vld [vmem:[#allocation7 + $0x358] sm:$0xff] }
 0x60a   :  { %v2196_v6 = vpop.f32.mrb[23].mxu1  ;;  %2954 = vmatpush1.bf16.msra.mxu0 %v2853_v13  ;;  %3036 = vmatpush1.bf16.msra.mxu1 %v2855_v14  ;;  %v2868_v26 = vunpack.c.h.s8.bf16 %v2764_v20  ;;  %v2766_v5 = vld [vmem:[#allocation7 + $0x328] sm:$0xff]  ;;  %v2767_v13 = vld [vmem:[#allocation7 + $0x330] sm:$0xff]  ;;  %v2869_v14 = vunpack.c.l.s8.bf16 %v2765_v12  ;;  %v2873_v20 = vunpack.c.h.s8.bf16 %v2765_v12  ;;  %v2880_v24 = vunpack.c.l.s8.bf16 %v2772_v19 }
 0x60b   :  { %2955 = vmatprep.subr.bf16.mxu0 %v2858_v15  ;;  %3037 = vmatprep.subr.bf16.mxu1 %v2860_v16  ;;  %v2768_v6 = vld [vmem:[#allocation7 + $0x338] sm:$0xff]  ;;  %v2870_v10 = vunpack.c.l.s8.bf16 %v2766_v5  ;;  %v2871_v15 = vunpack.c.l.s8.bf16 %v2767_v13  ;;  %v2874_v16 = vunpack.c.h.s8.bf16 %v2766_v5  ;;  %v2786_v12 = vld [vmem:[#allocation7 + $0x3c8] sm:$0xff] }
 0x60c   :  { %v2872_v11 = vunpack.c.l.s8.bf16 %v2768_v6 }
 0x60e   :  { %2956 = vmatpush1.bf16.msra.mxu0 %v2857_v17  ;;  %3038 = vmatpush1.bf16.msra.mxu1 %v2859_v18  ;;  %v2876_v17 = vunpack.c.h.s8.bf16 %v2768_v6  ;;  %v2770_v18 = vld [vmem:[#allocation7 + $0x348] sm:$0xff]  ;;  %v2781_v6 = vld [vmem:[#allocation7 + $0x3a0] sm:$0xff] }
 0x60f   :  { %2966 = vmatprep.subr.bf16.mxu0 %v2862_v21  ;;  %3048 = vmatprep.subr.bf16.mxu1 %v2864_v46  ;;  %v2875_v21 = vunpack.c.h.s8.bf16 %v2767_v13  ;;  %v2878_v46 = vunpack.c.l.s8.bf16 %v2770_v18  ;;  %v2788_v13 = vld [vmem:[#allocation7 + $0x3d8] sm:$0xff] }
 0x6a4   :  { %v2581_v22 = vpop.f32.mrb[24].mxu0  ;;  %v2663_v32 = vpop.f32.mrb[24].mxu1 }
 0x6a5   :  { %v2691_v35 = vmul.f32 %v2674_v27, %v2581_v22  ;;  %v2693_v36 = vmul.f32 %v2682_v28, %v2663_v32  ;;  %v2583_v37 = vpop.f32.mrb[25].mxu0  ;;  %v2665_v38 = vpop.f32.mrb[25].mxu1  ;;  %v2771_v27 = vld [vmem:[#allocation7 + $0x350] sm:$0xff]  ;;  %v2877_v28 = vunpack.c.l.s8.bf16 %v2769_v25  ;;  %v2776_v22 = vld [vmem:[#allocation7 + $0x378] sm:$0xff]  ;;  %v2881_v32 = vunpack.c.h.s8.bf16 %v2769_v25  ;;  %v2790_v25 = vld [vmem:[#allocation7 + $0x3e8] sm:$0xff] }
 0x6a6   :  { %v2692_v40 = vmul.f32 %v2678_v51, %v2583_v37  ;;  %v2694_v41 = vmul.f32 %v2686_v31, %v2665_v38  ;;  %v2585_v42 = vpop.f32.mrb[26].mxu0  ;;  %v2667_v43 = vpop.f32.mrb[26].mxu1  ;;  %v2879_v51 = vunpack.c.l.s8.bf16 %v2771_v27  ;;  %v2882_v31 = vunpack.c.h.s8.bf16 %v2770_v18  ;;  %v2775_v37 = vld [vmem:[#allocation7 + $0x370] sm:$0xff]  ;;  %v2785_v18 = vld [vmem:[#allocation7 + $0x3c0] sm:$0xff] }
 0x6a7   :  { %v2716_v49 = vadd.f32 %v2699_v29, %v2691_v35  ;;  %v5470_v50 = vadd.f32 %v2707_v30, %v2693_v36  ;;  %v2586_v39 = vpop.f32.mrb[27].mxu0  ;;  %v2668_v52 = vpop.f32.mrb[27].mxu1  ;;  %v2884_v29 = vunpack.c.h.s8.bf16 %v2772_v19  ;;  %v2774_v30 = vld [vmem:[#allocation7 + $0x368] sm:$0xff]  ;;  %v2888_v35 = vunpack.c.l.s8.bf16 %v2776_v22  ;;  %v2773_v36 = vld [vmem:[#allocation7 + $0x360] sm:$0xff]  ;;  %v2787_v19 = vld [vmem:[#allocation7 + $0x3d0] sm:$0xff] }
 0x6a8   :  { %v2717_v57 = vadd.f32 %v2703_v33, %v2692_v40  ;;  %v2719_v53 = vadd.f32 %v2711_v34, %v2694_v41  ;;  %v2883_v33 = vunpack.c.h.s8.bf16 %v2771_v27  ;;  %v2886_v34 = vunpack.c.l.s8.bf16 %v2774_v30  ;;  %v2778_v43 = vld [vmem:[#allocation7 + $0x388] sm:$0xff]  ;;  %v2792_v27 = vld [vmem:[#allocation7 + $0x3f8] sm:$0xff] }
 0x6a9   :  { %v2720_v54 = vmax.f32 %v2716_v49, 0.0  ;;  %v2885_v38 = vunpack.c.l.s8.bf16 %v2773_v36  ;;  %v2887_v40 = vunpack.c.l.s8.bf16 %v2775_v37  ;;  %v2890_v41 = vunpack.c.h.s8.bf16 %v2774_v30  ;;  %v2780_v49 = vld [vmem:[#allocation7 + $0x398] sm:$0xff]  ;;  %v2789_v30 = vld [vmem:[#allocation7 + $0x3e0] sm:$0xff] }
 0x6aa   :  { %v2721_v58 = vmax.f32 %v2717_v57, 0.0  ;;  %v2723_v59 = vmax.f32 %v2719_v53, 0.0  ;;  %v2892_v42 = vunpack.c.h.s8.bf16 %v2776_v22  ;;  %v2889_v39 = vunpack.c.h.s8.bf16 %v2773_v36  ;;  %v2791_v22 = vld [vmem:[#allocation7 + $0x3f0] sm:$0xff] }
 0x6ab   :  { %v2724_v63 = vpack.c.bf16 %v2720_v54, %v2720_v54  ;;  %v2891_v52 = vunpack.c.h.s8.bf16 %v2775_v37  ;;  %v2894_v57 = vunpack.c.l.s8.bf16 %v2778_v43  ;;  %v2896_v53 = vunpack.c.l.s8.bf16 %v2780_v49  ;;  %v2777_v54 = vld [vmem:[#allocation7 + $0x380] sm:$0xff] }
 0x6ac   :  { %v2725_v60 = vpack.c.bf16 %v2721_v58, %v2721_v58  ;;  %v2727_v7 = vpack.c.bf16 %v2723_v59, %v2723_v59  ;;  %v2893_v56 = vunpack.c.l.s8.bf16 %v2777_v54  ;;  %v2895_v58 = vunpack.c.l.s8.bf16 %v2779_v55 }
 0x6ad   :  { %v2898_v59 = vunpack.c.h.s8.bf16 %v2778_v43  ;;  %v2921_v36 = vunpack.c.h.s8.bf16 %v2789_v30  ;;  %v2923_v37 = vunpack.c.h.s8.bf16 %v2791_v22 }
 0x6ae   :  { %2957 = vmatprep.mubr.bf16.mxu0 %v2725_v60  ;;  %3039 = vmatprep.mubr.bf16.mxu1 %v2725_v60  ;;  %v2900_v60 = vunpack.c.h.s8.bf16 %v2780_v49  ;;  %v5017_v49 = vld [vmem:[%s5777_s11 + $0x48] sm:$0xff]  }
 0x6af   :  { %2958 = vmatmul.mubr.bf16.vlgmr.msra.gmra.mrb[28].mxu0 %v2724_v63  ;;  %3040 = vmatmul.mubr.bf16.vlgmr.msra.gmra.mrb[28].mxu1 %v2724_v63  ;;  %v2897_v63 = vunpack.c.h.s8.bf16 %v2777_v54  ;;  %v5022_v54 = vld [vmem:[%s5777_s11 + $0xd0] sm:$0xff]  }
 0x6b0   :  { %2967 = vmatpush1.bf16.msra.mxu0 %v2861_v61  ;;  %3049 = vmatpush1.bf16.msra.mxu1 %v2863_v62  ;;  %v2782_v61 = vld [vmem:[#allocation7 + $0x3a8] sm:$0xff]  ;;  %v2784_v62 = vld [vmem:[#allocation7 + $0x3b8] sm:$0xff] }
 0x6b1   :  { %2998 = vmatprep.mubr.bf16.mxu0 %v2727_v7  ;;  %3080 = vmatprep.mubr.bf16.mxu1 %v2727_v7  ;;  %v2904_v5 = vunpack.c.l.s8.bf16 %v2784_v62  ;;  %v2783_v7 = vld [vmem:[#allocation7 + $0x3b0] sm:$0xff] }
 0x6b2   :  { %2968 = vmatprep.subr.bf16.mxu0 %v2866_v4  ;;  %3050 = vmatprep.subr.bf16.mxu1 %v2868_v26  ;;  %v2899_v4 = vunpack.c.h.s8.bf16 %v2779_v55  ;;  %v2902_v26 = vunpack.c.l.s8.bf16 %v2782_v61  ;;  %v5023_v55 = vld [vmem:[%s5777_s11 + $0x10] sm:$0xff]  }
 0x6b4   :  { %2969 = vmatpush1.bf16.msra.mxu0 %v2865_v8  ;;  %3051 = vmatpush1.bf16.msra.mxu1 %v2867_v9  ;;  %v2901_v8 = vunpack.c.l.s8.bf16 %v2781_v6  ;;  %v2903_v9 = vunpack.c.l.s8.bf16 %v2783_v7 }
 0x6b5   :  { %2970 = vmatprep.subr.bf16.mxu0 %v2870_v10  ;;  %3052 = vmatprep.subr.bf16.mxu1 %v2872_v11  ;;  %v2906_v10 = vunpack.c.h.s8.bf16 %v2782_v61  ;;  %v2908_v11 = vunpack.c.h.s8.bf16 %v2784_v62  ;;  %v5028_v61 = vld [vmem:[%s5777_s11 + $0x98] sm:$0xff]   ;;  %v5029_v62 = vld [vmem:[%s5777_s11 + $0x60] sm:$0xff]  }
 0x6b8   :  { %2971 = vmatpush1.bf16.msra.mxu0 %v2869_v14  ;;  %3053 = vmatpush1.bf16.msra.mxu1 %v2871_v15  ;;  %v2905_v14 = vunpack.c.h.s8.bf16 %v2781_v6  ;;  %v2907_v15 = vunpack.c.h.s8.bf16 %v2783_v7  ;;  %v5034_v6 = vld [vmem:[%s5777_s11 + $0xe8] sm:$0xff]  }
 0x6b9   :  { %2972 = vmatprep.subr.bf16.mxu0 %v2874_v16  ;;  %3054 = vmatprep.subr.bf16.mxu1 %v2876_v17  ;;  %v2910_v16 = vunpack.c.l.s8.bf16 %v2786_v12  ;;  %v2912_v17 = vunpack.c.l.s8.bf16 %v2788_v13  ;;  %v5035_v7 = vld [vmem:[%s5777_s11 + $0x28] sm:$0xff]  }
 0x6bc   :  { %2973 = vmatpush1.bf16.msra.mxu0 %v2873_v20  ;;  %3055 = vmatpush1.bf16.msra.mxu1 %v2875_v21  ;;  %v2909_v20 = vunpack.c.l.s8.bf16 %v2785_v18  ;;  %v2911_v21 = vunpack.c.l.s8.bf16 %v2787_v19 }
 0x6bd   :  { %2974 = vmatprep.subr.bf16.mxu0 %v2878_v46  ;;  %3056 = vmatprep.subr.bf16.mxu1 %v2880_v24  ;;  %v2914_v46 = vunpack.c.h.s8.bf16 %v2786_v12  ;;  %v2916_v24 = vunpack.c.h.s8.bf16 %v2788_v13  ;;  %v5040_v12 = vld [vmem:[%s5777_s11 + $0xb0] sm:$0xff]   ;;  %v5041_v13 = vld [vmem:[%s5777_s11 + $0x78] sm:$0xff]  }
 0x6c0   :  { %2975 = vmatpush1.bf16.msra.mxu0 %v2877_v28  ;;  %3057 = vmatpush1.bf16.msra.mxu1 %v2879_v51  ;;  %v2913_v28 = vunpack.c.h.s8.bf16 %v2785_v18  ;;  %v2915_v51 = vunpack.c.h.s8.bf16 %v2787_v19  ;;  %v5571_v18 = vld [vmem:[#allocation7 + $0x418] sm:$0xff] }
 0x6c1   :  { %2976 = vmatprep.subr.bf16.mxu0 %v2882_v31  ;;  %3058 = vmatprep.subr.bf16.mxu1 %v2884_v29  ;;  %v2918_v31 = vunpack.c.l.s8.bf16 %v2790_v25  ;;  %v2920_v29 = vunpack.c.l.s8.bf16 %v2792_v27 }
 0x6c4   :  { %2977 = vmatpush1.bf16.msra.mxu0 %v2881_v32  ;;  %3059 = vmatpush1.bf16.msra.mxu1 %v2883_v33  ;;  %v2917_v32 = vunpack.c.l.s8.bf16 %v2789_v30  ;;  %v2919_v33 = vunpack.c.l.s8.bf16 %v2791_v22  ;;  %v5596_v22 = vld [vmem:[%s5773_s7] sm:$0xff] }
 0x6c5   :  { %2978 = vmatprep.subr.bf16.mxu0 %v2886_v34  ;;  %3060 = vmatprep.subr.bf16.mxu1 %v2888_v35  ;;  %v2922_v34 = vunpack.c.h.s8.bf16 %v2790_v25  ;;  %v2924_v35 = vunpack.c.h.s8.bf16 %v2792_v27  ;;  %v4703_v27 = vld [vmem:[%s5776_s10 + $0x1] ss:$4 sm:$0xf] }
 0x6c8   :  { %2979 = vmatpush1.bf16.msra.mxu0 %v2885_v38  ;;  %3061 = vmatpush1.bf16.msra.mxu1 %v2887_v40  ;;  %v2722_v38 = vmax.f32 %v5470_v50, 0.0  ;;  %v5013_v40 = vld [vmem:[%s5777_s11 + $0x40] sm:$0xff]  }
 0x6c9   :  { %2980 = vmatprep.subr.bf16.mxu0 %v2890_v41  ;;  %3062 = vmatprep.subr.bf16.mxu1 %v2892_v42  ;;  %v5014_v41 = vld [vmem:[%s5777_s11 + $0xc0] sm:$0xff]  }
 0x6ca   :  { %v5015_v42 = vld [vmem:[%s5777_s11] sm:$0xff]   ;;  %v2726_v43 = vpack.c.bf16 %v2722_v38, %v2722_v38  ;;  %v3130_v38 = vrot.slane %v4703_v27, %v5320_v48 }
 0x6cb   :  { %v5016_v50 = vld [vmem:[%s5777_s11 + $0x80] sm:$0xff]  }
 0x6cc   :  { %2981 = vmatpush1.bf16.msra.mxu0 %v2889_v39  ;;  %3063 = vmatpush1.bf16.msra.mxu1 %v2891_v52  ;;  %v5018_v39 = vld [vmem:[%s5777_s11 + $0xc8] sm:$0xff]  }
 0x6cd   :  { %2982 = vmatprep.subr.bf16.mxu0 %v2894_v57  ;;  %3064 = vmatprep.subr.bf16.mxu1 %v2896_v53  ;;  %v5019_v52 = vld [vmem:[%s5777_s11 + $0x8] sm:$0xff]   ;;  %v5021_v53 = vld [vmem:[%s5777_s11 + $0x50] sm:$0xff]  }
 0x6ce   :  { %v5020_v57 = vld [vmem:[%s5777_s11 + $0x88] sm:$0xff]  }
 0x6d0   :  { %2983 = vmatpush1.bf16.msra.mxu0 %v2893_v56  ;;  %3065 = vmatpush1.bf16.msra.mxu1 %v2895_v58  ;;  %v5024_v56 = vld [vmem:[%s5777_s11 + $0x90] sm:$0xff]   ;;  %v5025_v58 = vld [vmem:[%s5777_s11 + $0x58] sm:$0xff]  }
 0x6d1   :  { %2984 = vmatprep.subr.bf16.mxu0 %v2898_v59  ;;  %3066 = vmatprep.subr.bf16.mxu1 %v2900_v60  ;;  %v5026_v59 = vld [vmem:[%s5777_s11 + $0xd8] sm:$0xff]  }
 0x6d2   :  { %v5027_v60 = vld [vmem:[%s5777_s11 + $0x18] sm:$0xff]  }
 0x6d4   :  { %2985 = vmatpush1.bf16.msra.mxu0 %v2897_v63  ;;  %3067 = vmatpush1.bf16.msra.mxu1 %v2899_v4  ;;  %v5030_v63 = vld [vmem:[%s5777_s11 + $0xe0] sm:$0xff]  }
 0x6d5   :  { %2986 = vmatprep.subr.bf16.mxu0 %v2902_v26  ;;  %3068 = vmatprep.subr.bf16.mxu1 %v2904_v5  ;;  %v5031_v4 = vld [vmem:[%s5777_s11 + $0x20] sm:$0xff]   ;;  %v5033_v5 = vld [vmem:[%s5777_s11 + $0x68] sm:$0xff]  }
 0x6d6   :  { %v5032_v26 = vld [vmem:[%s5777_s11 + $0xa0] sm:$0xff]  }
 0x6d8   :  { %2987 = vmatpush1.bf16.msra.mxu0 %v2901_v8  ;;  %3069 = vmatpush1.bf16.msra.mxu1 %v2903_v9  ;;  %v5036_v8 = vld [vmem:[%s5777_s11 + $0xa8] sm:$0xff]   ;;  %v5037_v9 = vld [vmem:[%s5777_s11 + $0x70] sm:$0xff]  }
 0x6d9   :  { %2988 = vmatprep.subr.bf16.mxu0 %v2906_v10  ;;  %3070 = vmatprep.subr.bf16.mxu1 %v2908_v11  ;;  %v5038_v10 = vld [vmem:[%s5777_s11 + $0xf0] sm:$0xff]  }
 0x6da   :  { %v5039_v11 = vld [vmem:[%s5777_s11 + $0x30] sm:$0xff]  }
 0x6dc   :  { %2989 = vmatpush1.bf16.msra.mxu0 %v2905_v14  ;;  %3071 = vmatpush1.bf16.msra.mxu1 %v2907_v15  ;;  %v5042_v14 = vld [vmem:[%s5777_s11 + $0xf8] sm:$0xff]  }
 0x6dd   :  { %2990 = vmatprep.subr.bf16.mxu0 %v2910_v16  ;;  %3072 = vmatprep.subr.bf16.mxu1 %v2912_v17  ;;  %v5043_v15 = vld [vmem:[%s5777_s11 + $0x38] sm:$0xff]   ;;  %v5569_v17 = vld [vmem:[#allocation7 + $0x408] sm:$0xff] }
 0x6de   :  { %v5044_v16 = vld [vmem:[%s5777_s11 + $0xb8] sm:$0xff]   ;;  %v3558_v19 = vunpack.c.l.s8.bf16 %v5569_v17 }
 0x6e0   :  { %2991 = vmatpush1.bf16.msra.mxu0 %v2909_v20  ;;  %3073 = vmatpush1.bf16.msra.mxu1 %v2911_v21  ;;  %v3560_v20 = vunpack.c.l.s8.bf16 %v5571_v18  ;;  %v2221_v21 = vsub.s32 5, %v5306_v44 }
 0x6e1   :  { %2992 = vmatprep.subr.bf16.mxu0 %v2914_v46  ;;  %3074 = vmatprep.subr.bf16.mxu1 %v2916_v24  ;;  %v4702_v46 = vld [vmem:[%s5775_s9 + $0x1] ss:$4 sm:$0xf] }
 0x6e2   :  { %v5582_v24 = vld [vmem:[%s5772_s6] sm:$0xff] }
 0x6e3   :  { %v2222_v25 = vrot.slane %v5582_v24, %v2221_v21 }
 0x6e4   :  { %2993 = vmatpush1.bf16.msra.mxu0 %v2913_v28  ;;  %3075 = vmatpush1.bf16.msra.mxu1 %v2915_v51  ;;  %v3093_v28 = vrot.slane %v4702_v46, %v5309_v45  ;;  %v3101_v51 = vrot.slane %v4702_v46, %v5331_v23 }
 0x6e5   :  { %2994 = vmatprep.subr.bf16.mxu0 %v2918_v31  ;;  %3076 = vmatprep.subr.bf16.mxu1 %v2920_v29  ;;  %v3097_v31 = vrot.slane %v4702_v46, %v5317_v47  ;;  %v3105_v29 = vrot.slane %v4702_v46, %v5320_v48  ;;  %v2244_v30 = vmul.f32 %v2222_v25, %v5452_v2  ;;  %v3493_v46 = vld [vmem:[#allocation7 + $0x420] sm:$0xff]  ;;  %v3495_v25 = vld [vmem:[#allocation7 + $0x430] sm:$0xff] }
 0x6e8   :  { %2995 = vmatpush1.bf16.msra.mxu0 %v2917_v32  ;;  %3077 = vmatpush1.bf16.msra.mxu1 %v2919_v33  ;;  %v2271_v32 = vrot.slane %v5596_v22, %v2221_v21  ;;  %v3118_v33 = vrot.slane %v4703_v27, %v5309_v45 }
 0x6e9   :  { %2996 = vmatprep.subr.bf16.mxu0 %v2922_v34  ;;  %3078 = vmatprep.subr.bf16.mxu1 %v2924_v35  ;;  %v3126_v34 = vrot.slane %v4703_v27, %v5331_v23 }
 0x6ec   :  { %2997 = vmatpush1.bf16.msra.mxu0 %v2921_v36  ;;  %3079 = vmatpush1.bf16.msra.mxu1 %v2923_v37  ;;  %v3122_v37 = vrot.slane %v4703_v27, %v5317_v47 }
 0x6ed   :  { %4838 = vmatprep.subr.bf16.mxu0 %v5013_v40  ;;  %4860 = vmatprep.subr.bf16.mxu1 %v5014_v41 }
 0x6ef   :  { %2999 = vmatmul.mubr.bf16.vlgmr.msra.gmra.mrb[28].mxu0 %v2726_v43  ;;  %3081 = vmatmul.mubr.bf16.vlgmr.msra.gmra.mrb[28].mxu1 %v2726_v43 }
 0x6f0   :  { %4839 = vmatpush3.bf16.msra.mxu0 %v5015_v42  ;;  %4861 = vmatpush3.bf16.msra.mxu1 %v5016_v50 }
 0x6f1   :  { %4840 = vmatprep.subr.bf16.mxu0 %v5017_v49  ;;  %4862 = vmatprep.subr.bf16.mxu1 %v5018_v39 }
 0x6f4   :  { %4841 = vmatpush3.bf16.msra.mxu0 %v5019_v52  ;;  %4863 = vmatpush3.bf16.msra.mxu1 %v5020_v57  ;;  %v2293_v52 = vadd.f32 %v2271_v32, %v2244_v30  ;;  %v3571_v30 = vunpack.c.h.s8.bf16 %v3495_v25 }
 0x6f5   :  { %4842 = vmatprep.subr.bf16.mxu0 %v5021_v53  ;;  %4864 = vmatprep.subr.bf16.mxu1 %v5022_v54 }
 0x6f8   :  { %4843 = vmatpush3.bf16.msra.mxu0 %v5023_v55  ;;  %4865 = vmatpush3.bf16.msra.mxu1 %v5024_v56 }
 0x6f9   :  { %4844 = vmatprep.subr.bf16.mxu0 %v5025_v58  ;;  %4866 = vmatprep.subr.bf16.mxu1 %v5026_v59 }
 0x6fc   :  { %4845 = vmatpush3.bf16.msra.mxu0 %v5027_v60  ;;  %4867 = vmatpush3.bf16.msra.mxu1 %v5028_v61  ;;  %v3489_v61 = vld [vmem:[#allocation7 + $0x400] sm:$0xff] }
 0x6fd   :  { %4846 = vmatprep.subr.bf16.mxu0 %v5029_v62  ;;  %4868 = vmatprep.subr.bf16.mxu1 %v5030_v63  ;;  %v3491_v62 = vld [vmem:[#allocation7 + $0x410] sm:$0xff] }
 0x700   :  { %4847 = vmatpush3.bf16.msra.mxu0 %v5031_v4  ;;  %4869 = vmatpush3.bf16.msra.mxu1 %v5032_v26  ;;  %v2301_v26 = vmax.f32 %v2293_v52, 0.0  ;;  %v3503_v52 = vld [vmem:[#allocation7 + $0x470] sm:$0xff] }
 0x701   :  { %4848 = vmatprep.subr.bf16.mxu0 %v5033_v5  ;;  %4870 = vmatprep.subr.bf16.mxu1 %v5034_v6 }
 0x704   :  { %4849 = vmatpush3.bf16.msra.mxu0 %v5035_v7  ;;  %4871 = vmatpush3.bf16.msra.mxu1 %v5036_v8  ;;  %v3557_v7 = vunpack.c.l.s8.bf16 %v3489_v61  ;;  %v3559_v8 = vunpack.c.l.s8.bf16 %v3491_v62 }
 0x705   :  { %4850 = vmatprep.subr.bf16.mxu0 %v5037_v9  ;;  %4872 = vmatprep.subr.bf16.mxu1 %v5038_v10 }
 0x708   :  { %4851 = vmatpush3.bf16.msra.mxu0 %v5039_v11  ;;  %4873 = vmatpush3.bf16.msra.mxu1 %v5040_v12  ;;  %v3562_v11 = vunpack.c.h.s8.bf16 %v5569_v17  ;;  %v3564_v12 = vunpack.c.h.s8.bf16 %v5571_v18  ;;  %v3565_v17 = vunpack.c.l.s8.bf16 %v3493_v46  ;;  %v3567_v18 = vunpack.c.l.s8.bf16 %v3495_v25  ;;  %v3516_v25 = vld [vmem:[#allocation7 + $0x4d8] sm:$0xff] }
 0x709   :  { %4852 = vmatprep.subr.bf16.mxu0 %v5041_v13  ;;  %4874 = vmatprep.subr.bf16.mxu1 %v5042_v14  ;;  %v3494_v13 = vld [vmem:[#allocation7 + $0x428] sm:$0xff]  ;;  %v3496_v14 = vld [vmem:[#allocation7 + $0x438] sm:$0xff] }
 0x70a   :  { %v3568_v21 = vunpack.c.l.s8.bf16 %v3496_v14  ;;  %v3570_v27 = vunpack.c.h.s8.bf16 %v3494_v13 }
 0x70c   :  { %4853 = vmatpush3.bf16.msra.mxu0 %v5043_v15  ;;  %4875 = vmatpush3.bf16.msra.mxu1 %v5044_v16  ;;  %v2309_v15 = vpack.c.bf16 %v2301_v26, %v2301_v26  ;;  %v3561_v16 = vunpack.c.h.s8.bf16 %v3489_v61 }
 0x70d   :  { %3685 = vmatprep.subr.bf16.mxu0 %v3558_v19  ;;  %3767 = vmatprep.subr.bf16.mxu1 %v3560_v20  ;;  %v3563_v19 = vunpack.c.h.s8.bf16 %v3491_v62  ;;  %v3566_v20 = vunpack.c.l.s8.bf16 %v3494_v13 }
 0x7c2   :  { %v3000_v35 = vpop.f32.mrb[28].mxu0  ;;  %v3082_v36 = vpop.f32.mrb[28].mxu1 }
 0x7c3   :  { %v3110_v40 = vmul.f32 %v3093_v28, %v3000_v35  ;;  %v3112_v41 = vmul.f32 %v3101_v51, %v3082_v36  ;;  %v3002_v2 = vpop.f32.mrb[29].mxu0  ;;  %v3084_v42 = vpop.f32.mrb[29].mxu1  ;;  %v3572_v28 = vunpack.c.h.s8.bf16 %v3496_v14  ;;  %v3498_v51 = vld [vmem:[#allocation7 + $0x448] sm:$0xff]  ;;  %v3499_v35 = vld [vmem:[#allocation7 + $0x450] sm:$0xff]  ;;  %v3509_v14 = vld [vmem:[#allocation7 + $0x4a0] sm:$0xff] }
 0x7c4   :  { %v3111_v50 = vmul.f32 %v3097_v31, %v3002_v2  ;;  %v3113_v43 = vmul.f32 %v3105_v29, %v3084_v42  ;;  %v3004_v49 = vpop.f32.mrb[30].mxu0  ;;  %v3086_v39 = vpop.f32.mrb[30].mxu1  ;;  %v3500_v31 = vld [vmem:[#allocation7 + $0x458] sm:$0xff]  ;;  %v3569_v29 = vunpack.c.h.s8.bf16 %v3493_v46  ;;  %v3574_v32 = vunpack.c.l.s8.bf16 %v3498_v51  ;;  %v3514_v46 = vld [vmem:[#allocation7 + $0x4c8] sm:$0xff] }
 0x7c5   :  { %v3135_v57 = vadd.f32 %v3118_v33, %v3110_v40  ;;  %v3137_v53 = vadd.f32 %v3126_v34, %v3112_v41  ;;  %v3005_v54 = vpop.f32.mrb[31].mxu0  ;;  %v3087_v55 = vpop.f32.mrb[31].mxu1  ;;  %v3576_v33 = vunpack.c.l.s8.bf16 %v3500_v31  ;;  %v3497_v34 = vld [vmem:[#allocation7 + $0x440] sm:$0xff]  ;;  %v3580_v40 = vunpack.c.h.s8.bf16 %v3500_v31  ;;  %v3502_v41 = vld [vmem:[#allocation7 + $0x468] sm:$0xff]  ;;  %v3504_v2 = vld [vmem:[#allocation7 + $0x478] sm:$0xff] }
 0x7c6   :  { %v3136_v56 = vadd.f32 %v3122_v37, %v3111_v50  ;;  %v3138_v58 = vadd.f32 %v3130_v38, %v3113_v43  ;;  %v3573_v36 = vunpack.c.l.s8.bf16 %v3497_v34  ;;  %v3575_v37 = vunpack.c.l.s8.bf16 %v3499_v35  ;;  %v3501_v39 = vld [vmem:[#allocation7 + $0x460] sm:$0xff] }
 0x7c7   :  { %v3139_v59 = vmax.f32 %v3135_v57, 0.0  ;;  %v3141_v60 = vmax.f32 %v3137_v53, 0.0  ;;  %v3578_v38 = vunpack.c.h.s8.bf16 %v3498_v51  ;;  %v3577_v42 = vunpack.c.h.s8.bf16 %v3497_v34  ;;  %v3513_v31 = vld [vmem:[#allocation7 + $0x4c0] sm:$0xff] }
 0x7c8   :  { %v3140_v63 = vmax.f32 %v3136_v56, 0.0  ;;  %v3142_v4 = vmax.f32 %v3138_v58, 0.0  ;;  %v3579_v50 = vunpack.c.h.s8.bf16 %v3499_v35  ;;  %v3582_v43 = vunpack.c.l.s8.bf16 %v3502_v41  ;;  %v3506_v56 = vld [vmem:[#allocation7 + $0x488] sm:$0xff]  ;;  %v3508_v58 = vld [vmem:[#allocation7 + $0x498] sm:$0xff] }
 0x7c9   :  { %v3143_v9 = vpack.c.bf16 %v3139_v59, %v3139_v59  ;;  %v3145_v10 = vpack.c.bf16 %v3141_v60, %v3141_v60  ;;  %v3584_v49 = vunpack.c.l.s8.bf16 %v3504_v2  ;;  %v3581_v57 = vunpack.c.l.s8.bf16 %v3501_v39 }
 0x7ca   :  { %v3144_v5 = vpack.c.bf16 %v3140_v63, %v3140_v63  ;;  %v3146_v6 = vpack.c.bf16 %v3142_v4, %v3142_v4  ;;  %v3583_v53 = vunpack.c.l.s8.bf16 %v3503_v52  ;;  %v3586_v54 = vunpack.c.h.s8.bf16 %v3502_v41  ;;  %v3505_v63 = vld [vmem:[#allocation7 + $0x480] sm:$0xff]  ;;  %v3507_v4 = vld [vmem:[#allocation7 + $0x490] sm:$0xff] }
 0x7cb   :  { %v3588_v55 = vunpack.c.h.s8.bf16 %v3504_v2  ;;  %v3585_v59 = vunpack.c.h.s8.bf16 %v3501_v39  ;;  %v3587_v60 = vunpack.c.h.s8.bf16 %v3503_v52  ;;  %v3590_v61 = vunpack.c.l.s8.bf16 %v3506_v56  ;;  %v3517_v39 = vld [vmem:[#allocation7 + $0x4e0] sm:$0xff]  ;;  %v3519_v52 = vld [vmem:[#allocation7 + $0x4f0] sm:$0xff] }
 0x7cc   :  { %3440 = vmatprep.mubr.bf16.mxu0 %v3144_v5  ;;  %3480 = vmatprep.mubr.bf16.mxu1 %v3146_v6  ;;  %v3592_v62 = vunpack.c.l.s8.bf16 %v3508_v58  ;;  %v3589_v26 = vunpack.c.l.s8.bf16 %v3505_v63  ;;  %v3591_v5 = vunpack.c.l.s8.bf16 %v3507_v4  ;;  %v3594_v6 = vunpack.c.h.s8.bf16 %v3506_v56 }
 0x7cd   :  { %3441 = vmatmul.mubr.bf16.vlgmr.msra.gmra.mrb[32].mxu0 %v3143_v9  ;;  %3481 = vmatmul.mubr.bf16.vlgmr.msra.gmra.mrb[32].mxu1 %v3145_v10  ;;  %v3512_v9 = vld [vmem:[#allocation7 + $0x4b8] sm:$0xff]  ;;  %v3593_v10 = vunpack.c.h.s8.bf16 %v3505_v63  ;;  %v3608_v51 = vunpack.c.l.s8.bf16 %v3516_v25  ;;  %v3610_v35 = vunpack.c.h.s8.bf16 %v3514_v46  ;;  %v3609_v41 = vunpack.c.h.s8.bf16 %v3513_v31 }
 0x7ce   :  { %3686 = vmatpush1.bf16.msra.mxu0 %v3557_v7  ;;  %3768 = vmatpush1.bf16.msra.mxu1 %v3559_v8  ;;  %v3596_v7 = vunpack.c.h.s8.bf16 %v3508_v58  ;;  %v3510_v8 = vld [vmem:[#allocation7 + $0x4a8] sm:$0xff]  ;;  %v3600_v13 = vunpack.c.l.s8.bf16 %v3512_v9  ;;  %v3619_v63 = vunpack.c.h.s8.bf16 %v3519_v52 }
 0x7cf   :  { %3717 = vmatprep.mubr.bf16.mxu0 %v2309_v15  ;;  %3799 = vmatprep.mubr.bf16.mxu1 %v2309_v15  ;;  %v3511_v15 = vld [vmem:[#allocation7 + $0x4b0] sm:$0xff] }
 0x7d0   :  { %3687 = vmatprep.subr.bf16.mxu0 %v3562_v11  ;;  %3769 = vmatprep.subr.bf16.mxu1 %v3564_v12  ;;  %v3595_v11 = vunpack.c.h.s8.bf16 %v3507_v4  ;;  %v3598_v12 = vunpack.c.l.s8.bf16 %v3510_v8 }
 0x7d2   :  { %3688 = vmatpush1.bf16.msra.mxu0 %v3561_v16  ;;  %3770 = vmatpush1.bf16.msra.mxu1 %v3563_v19  ;;  %v3597_v16 = vunpack.c.l.s8.bf16 %v3509_v14  ;;  %v3599_v19 = vunpack.c.l.s8.bf16 %v3511_v15 }
 0x7d3   :  { %3689 = vmatprep.subr.bf16.mxu0 %v3566_v20  ;;  %3771 = vmatprep.subr.bf16.mxu1 %v3568_v21  ;;  %v3602_v20 = vunpack.c.h.s8.bf16 %v3510_v8  ;;  %v3604_v21 = vunpack.c.h.s8.bf16 %v3512_v9 }
 0x7d6   :  { %3690 = vmatpush1.bf16.msra.mxu0 %v3565_v17  ;;  %3772 = vmatpush1.bf16.msra.mxu1 %v3567_v18  ;;  %v3601_v17 = vunpack.c.h.s8.bf16 %v3509_v14  ;;  %v3603_v18 = vunpack.c.h.s8.bf16 %v3511_v15  ;;  %v3526_v14 = vld [vmem:[#allocation7 + $0x528] sm:$0xff]  ;;  %v3528_v15 = vld [vmem:[#allocation7 + $0x538] sm:$0xff] }
 0x7d7   :  { %3691 = vmatprep.subr.bf16.mxu0 %v3570_v27  ;;  %3773 = vmatprep.subr.bf16.mxu1 %v3572_v28  ;;  %v2217_v27 = vsub.s32 4, %v5306_v44  ;;  %v3606_v28 = vunpack.c.l.s8.bf16 %v3514_v46  ;;  %v3632_v46 = vunpack.c.l.s8.bf16 %v3528_v15 }
 0x7d9   :  { %v2218_v34 = vrot.slane %v5582_v24, %v2217_v27 }
 0x7da   :  { %3692 = vmatpush1.bf16.msra.mxu0 %v3569_v29  ;;  %3774 = vmatpush1.bf16.msra.mxu1 %v3571_v30  ;;  %v3515_v29 = vld [vmem:[#allocation7 + $0x4d0] sm:$0xff]  ;;  %v2229_v30 = vsub.s32 7, %v5306_v44 }
 0x7db   :  { %3693 = vmatprep.subr.bf16.mxu0 %v3574_v32  ;;  %3775 = vmatprep.subr.bf16.mxu1 %v3576_v33  ;;  %v3605_v32 = vunpack.c.l.s8.bf16 %v3513_v31  ;;  %v3607_v33 = vunpack.c.l.s8.bf16 %v3515_v29  ;;  %v3611_v2 = vunpack.c.h.s8.bf16 %v3515_v29  ;;  %v3532_v31 = vld [vmem:[#allocation7 + $0x558] sm:$0xff] }
 0x7de   :  { %3694 = vmatpush1.bf16.msra.mxu0 %v3573_v36  ;;  %3776 = vmatpush1.bf16.msra.mxu1 %v3575_v37  ;;  %v3612_v36 = vunpack.c.h.s8.bf16 %v3516_v25  ;;  %v2230_v37 = vrot.slane %v5582_v24, %v2229_v30  ;;  %v3527_v25 = vld [vmem:[#allocation7 + $0x530] sm:$0xff] }
 0x7df   :  { %3695 = vmatprep.subr.bf16.mxu0 %v3578_v38  ;;  %3777 = vmatprep.subr.bf16.mxu1 %v3580_v40  ;;  %v3518_v38 = vld [vmem:[#allocation7 + $0x4e8] sm:$0xff]  ;;  %v3520_v40 = vld [vmem:[#allocation7 + $0x4f8] sm:$0xff] }
 0x7e0   :  { %v3620_v58 = vunpack.c.h.s8.bf16 %v3520_v40 }
 0x7e2   :  { %3696 = vmatpush1.bf16.msra.mxu0 %v3577_v42  ;;  %3778 = vmatpush1.bf16.msra.mxu1 %v3579_v50  ;;  %v2243_v42 = vmul.f32 %v2218_v34, %v5448_v0  ;;  %v2267_v50 = vrot.slane %v5596_v22, %v2217_v27  ;;  %v3618_v0 = vunpack.c.h.s8.bf16 %v3518_v38  ;;  %v3634_v27 = vunpack.c.h.s8.bf16 %v3526_v14 }
 0x7e3   :  { %3697 = vmatprep.subr.bf16.mxu0 %v3582_v43  ;;  %3779 = vmatprep.subr.bf16.mxu1 %v3584_v49  ;;  %v3614_v43 = vunpack.c.l.s8.bf16 %v3518_v38  ;;  %v3616_v49 = vunpack.c.l.s8.bf16 %v3520_v40  ;;  %v3640_v34 = vunpack.c.l.s8.bf16 %v3532_v31  ;;  %v3644_v40 = vunpack.c.h.s8.bf16 %v3532_v31 }
 0x7e4   :  { %v2292_v56 = vadd.f32 %v2267_v50, %v2243_v42 }
 0x7e6   :  { %3698 = vmatpush1.bf16.msra.mxu0 %v3581_v57  ;;  %3780 = vmatpush1.bf16.msra.mxu1 %v3583_v53  ;;  %v2246_v57 = vmul.f32 %v2230_v37, %v5454_v3  ;;  %v2279_v53 = vrot.slane %v5596_v22, %v2229_v30  ;;  %v2300_v4 = vmax.f32 %v2292_v56, 0.0  ;;  %v3635_v30 = vunpack.c.h.s8.bf16 %v3527_v25  ;;  %v3538_v56 = vld [vmem:[#allocation7 + $0x588] sm:$0xff] }
 0x7e7   :  { %3699 = vmatprep.subr.bf16.mxu0 %v3586_v54  ;;  %3781 = vmatprep.subr.bf16.mxu1 %v3588_v55  ;;  %v3613_v54 = vunpack.c.l.s8.bf16 %v3517_v39  ;;  %v3615_v55 = vunpack.c.l.s8.bf16 %v3519_v52  ;;  %v3535_v52 = vld [vmem:[#allocation7 + $0x570] sm:$0xff] }
 0x7e8   :  { %v2308_v9 = vpack.c.bf16 %v2300_v4, %v2300_v4 }
 0x7ea   :  { %3700 = vmatpush1.bf16.msra.mxu0 %v3585_v59  ;;  %3782 = vmatpush1.bf16.msra.mxu1 %v3587_v60  ;;  %v2295_v59 = vadd.f32 %v2279_v53, %v2246_v57  ;;  %v3522_v60 = vld [vmem:[#allocation7 + $0x508] sm:$0xff]  ;;  %v3647_v53 = vunpack.c.l.s8.bf16 %v3535_v52 }
 0x7eb   :  { %3701 = vmatprep.subr.bf16.mxu0 %v3590_v61  ;;  %3783 = vmatprep.subr.bf16.mxu1 %v3592_v62  ;;  %v3524_v61 = vld [vmem:[#allocation7 + $0x518] sm:$0xff]  ;;  %v3617_v62 = vunpack.c.h.s8.bf16 %v3517_v39  ;;  %v3622_v3 = vunpack.c.l.s8.bf16 %v3522_v60 }
 0x7ee   :  { %3702 = vmatpush1.bf16.msra.mxu0 %v3589_v26  ;;  %3784 = vmatpush1.bf16.msra.mxu1 %v3591_v5  ;;  %v3624_v26 = vunpack.c.l.s8.bf16 %v3524_v61  ;;  %v3521_v5 = vld [vmem:[#allocation7 + $0x500] sm:$0xff] }
 0x7ef   :  { %3703 = vmatprep.subr.bf16.mxu0 %v3594_v6  ;;  %3785 = vmatprep.subr.bf16.mxu1 %v3596_v7  ;;  %v2303_v6 = vmax.f32 %v2295_v59, 0.0  ;;  %v3523_v7 = vld [vmem:[#allocation7 + $0x510] sm:$0xff]  ;;  %v3621_v8 = vunpack.c.l.s8.bf16 %v3521_v5  ;;  %v3651_v59 = vunpack.c.h.s8.bf16 %v3535_v52  ;;  %v3911_v52 = vld [vmem:[#allocation7 + $0x618] sm:$0xff] }
 0x7f2   :  { %3704 = vmatpush1.bf16.msra.mxu0 %v3593_v10  ;;  %3786 = vmatpush1.bf16.msra.mxu1 %v3595_v11  ;;  %v3623_v10 = vunpack.c.l.s8.bf16 %v3523_v7  ;;  %v2311_v11 = vpack.c.bf16 %v2303_v6, %v2303_v6  ;;  %v3542_v6 = vld [vmem:[#allocation7 + $0x5a8] sm:$0xff] }
 0x7f3   :  { %3705 = vmatprep.subr.bf16.mxu0 %v3598_v12  ;;  %3787 = vmatprep.subr.bf16.mxu1 %v3600_v13  ;;  %v3626_v12 = vunpack.c.h.s8.bf16 %v3522_v60  ;;  %v3628_v13 = vunpack.c.h.s8.bf16 %v3524_v61  ;;  %v3654_v60 = vunpack.c.l.s8.bf16 %v3538_v56  ;;  %v3537_v61 = vld [vmem:[#allocation7 + $0x580] sm:$0xff] }
 0x7f4   :  { %v3653_v4 = vunpack.c.l.s8.bf16 %v3537_v61 }
 0x7f6   :  { %3706 = vmatpush1.bf16.msra.mxu0 %v3597_v16  ;;  %3788 = vmatpush1.bf16.msra.mxu1 %v3599_v19  ;;  %v3625_v16 = vunpack.c.h.s8.bf16 %v3521_v5  ;;  %v3627_v19 = vunpack.c.h.s8.bf16 %v3523_v7  ;;  %v3544_v7 = vld [vmem:[#allocation7 + $0x5b8] sm:$0xff] }
 0x7f7   :  { %3707 = vmatprep.subr.bf16.mxu0 %v3602_v20  ;;  %3789 = vmatprep.subr.bf16.mxu1 %v3604_v21  ;;  %v3630_v20 = vunpack.c.l.s8.bf16 %v3526_v14  ;;  %v3525_v21 = vld [vmem:[#allocation7 + $0x520] sm:$0xff] }
 0x7f8   :  { %v3633_v29 = vunpack.c.h.s8.bf16 %v3525_v21 }
 0x7fa   :  { %3708 = vmatpush1.bf16.msra.mxu0 %v3601_v17  ;;  %3790 = vmatpush1.bf16.msra.mxu1 %v3603_v18  ;;  %v3629_v17 = vunpack.c.l.s8.bf16 %v3525_v21  ;;  %v3631_v18 = vunpack.c.l.s8.bf16 %v3527_v25  ;;  %v3548_v21 = vld [vmem:[#allocation7 + $0x5d8] sm:$0xff]  ;;  %v2225_v25 = vsub.s32 6, %v5306_v44 }
 0x7fb   :  { %3709 = vmatprep.subr.bf16.mxu0 %v3606_v28  ;;  %3791 = vmatprep.subr.bf16.mxu1 %v3608_v51  ;;  %v3636_v28 = vunpack.c.h.s8.bf16 %v3528_v15  ;;  %v3530_v51 = vld [vmem:[#allocation7 + $0x548] sm:$0xff]  ;;  %v3552_v44 = vld [vmem:[#allocation7 + $0x5f8] sm:$0xff] }
 0x7fc   :  { %v3642_v38 = vunpack.c.h.s8.bf16 %v3530_v51 }
 0x7fe   :  { %3710 = vmatpush1.bf16.msra.mxu0 %v3605_v32  ;;  %3792 = vmatpush1.bf16.msra.mxu1 %v3607_v33  ;;  %v3638_v32 = vunpack.c.l.s8.bf16 %v3530_v51  ;;  %v3529_v33 = vld [vmem:[#allocation7 + $0x540] sm:$0xff]  ;;  %v3547_v51 = vld [vmem:[#allocation7 + $0x5d0] sm:$0xff] }
 0x7ff   :  { %3711 = vmatprep.subr.bf16.mxu0 %v3610_v35  ;;  %3793 = vmatprep.subr.bf16.mxu1 %v3612_v36  ;;  %v3531_v35 = vld [vmem:[#allocation7 + $0x550] sm:$0xff]  ;;  %v3637_v36 = vunpack.c.l.s8.bf16 %v3529_v33  ;;  %v3641_v42 = vunpack.c.h.s8.bf16 %v3529_v33  ;;  %v3676_v33 = vunpack.c.h.s8.bf16 %v3548_v21 }
 0x800   :  { %v3639_v37 = vunpack.c.l.s8.bf16 %v3531_v35  ;;  %v3643_v50 = vunpack.c.h.s8.bf16 %v3531_v35 }
 0x802   :  { %3712 = vmatpush1.bf16.msra.mxu0 %v3609_v41  ;;  %3794 = vmatpush1.bf16.msra.mxu1 %v3611_v2  ;;  %v3534_v41 = vld [vmem:[#allocation7 + $0x568] sm:$0xff]  ;;  %v3536_v2 = vld [vmem:[#allocation7 + $0x578] sm:$0xff] }
 0x803   :  { %3713 = vmatprep.subr.bf16.mxu0 %v3614_v43  ;;  %3795 = vmatprep.subr.bf16.mxu1 %v3616_v49  ;;  %v3646_v43 = vunpack.c.l.s8.bf16 %v3534_v41  ;;  %v3533_v49 = vld [vmem:[#allocation7 + $0x560] sm:$0xff]  ;;  %v3648_v39 = vunpack.c.l.s8.bf16 %v3536_v2 }
 0x804   :  { %v3645_v57 = vunpack.c.l.s8.bf16 %v3533_v49 }
 0x806   :  { %3714 = vmatpush1.bf16.msra.mxu0 %v3613_v54  ;;  %3796 = vmatpush1.bf16.msra.mxu1 %v3615_v55  ;;  %v3650_v54 = vunpack.c.h.s8.bf16 %v3534_v41  ;;  %v3652_v55 = vunpack.c.h.s8.bf16 %v3536_v2  ;;  %v3549_v41 = vld [vmem:[#allocation7 + $0x5e0] sm:$0xff]  ;;  %v3551_v2 = vld [vmem:[#allocation7 + $0x5f0] sm:$0xff] }
 0x807   :  { %3715 = vmatprep.subr.bf16.mxu0 %v3618_v0  ;;  %3797 = vmatprep.subr.bf16.mxu1 %v3620_v58  ;;  %v3540_v0 = vld [vmem:[#allocation7 + $0x598] sm:$0xff]  ;;  %v3649_v58 = vunpack.c.h.s8.bf16 %v3533_v49 }
 0x808   :  { %v3660_v5 = vunpack.c.h.s8.bf16 %v3540_v0 }
 0x80a   :  { %3716 = vmatpush1.bf16.msra.mxu0 %v3617_v62  ;;  %3798 = vmatpush1.bf16.msra.mxu1 %v3619_v63  ;;  %v3656_v62 = vunpack.c.l.s8.bf16 %v3540_v0  ;;  %v3539_v63 = vld [vmem:[#allocation7 + $0x590] sm:$0xff] }
 0x80b   :  { %3726 = vmatprep.subr.bf16.mxu0 %v3622_v3  ;;  %3808 = vmatprep.subr.bf16.mxu1 %v3624_v26  ;;  %v3655_v3 = vunpack.c.l.s8.bf16 %v3539_v63  ;;  %v3658_v26 = vunpack.c.h.s8.bf16 %v3538_v56  ;;  %v3979_v56 = vunpack.c.l.s8.bf16 %v3911_v52  ;;  %v3910_v0 = vld [vmem:[#allocation7 + $0x610] sm:$0xff] }
 0x80d   :  { %3718 = vmatmul.mubr.bf16.vlgmr.msra.gmra.mrb[36].mxu0 %v2308_v9  ;;  %3800 = vmatmul.mubr.bf16.vlgmr.msra.gmra.mrb[36].mxu1 %v2308_v9  ;;  %v3659_v9 = vunpack.c.h.s8.bf16 %v3539_v63  ;;  %v3913_v63 = vld [vmem:[#allocation7 + $0x628] sm:$0xff] }
 0x80e   :  { %3727 = vmatpush1.bf16.msra.mxu0 %v3621_v8  ;;  %3758 = vmatprep.mubr.bf16.mxu0 %v2311_v11  ;;  %v3657_v8 = vunpack.c.h.s8.bf16 %v3537_v61 }
 0x80f   :  { %3809 = vmatpush1.bf16.msra.mxu1 %v3623_v10  ;;  %3840 = vmatprep.mubr.bf16.mxu1 %v2311_v11  ;;  %v3662_v10 = vunpack.c.l.s8.bf16 %v3542_v6  ;;  %v3541_v11 = vld [vmem:[#allocation7 + $0x5a0] sm:$0xff] }
 0x810   :  { %3728 = vmatprep.subr.bf16.mxu0 %v3626_v12  ;;  %3810 = vmatprep.subr.bf16.mxu1 %v3628_v13  ;;  %v3664_v12 = vunpack.c.l.s8.bf16 %v3544_v7  ;;  %v3543_v13 = vld [vmem:[#allocation7 + $0x5b0] sm:$0xff]  ;;  %v3661_v14 = vunpack.c.l.s8.bf16 %v3541_v11 }
 0x811   :  { %v3663_v15 = vunpack.c.l.s8.bf16 %v3543_v13 }
 0x812   :  { %3729 = vmatpush1.bf16.msra.mxu0 %v3625_v16  ;;  %v3666_v16 = vunpack.c.h.s8.bf16 %v3542_v6  ;;  %v3912_v6 = vld [vmem:[#allocation7 + $0x620] sm:$0xff] }
 0x813   :  { %3811 = vmatpush1.bf16.msra.mxu1 %v3627_v19  ;;  %3730 = vmatprep.subr.bf16.mxu0 %v3630_v20  ;;  %v3668_v19 = vunpack.c.h.s8.bf16 %v3544_v7  ;;  %v3546_v20 = vld [vmem:[#allocation7 + $0x5c8] sm:$0xff] }
 0x814   :  { %3812 = vmatprep.subr.bf16.mxu1 %v3632_v46  ;;  %v3665_v46 = vunpack.c.h.s8.bf16 %v3541_v11  ;;  %v3989_v11 = vunpack.c.h.s8.bf16 %v3913_v63 }
 0x816   :  { %3731 = vmatpush1.bf16.msra.mxu0 %v3629_v17  ;;  %v3667_v17 = vunpack.c.h.s8.bf16 %v3543_v13  ;;  %v3917_v13 = vld [vmem:[#allocation7 + $0x648] sm:$0xff] }
 0x817   :  { %3813 = vmatpush1.bf16.msra.mxu1 %v3631_v18  ;;  %3732 = vmatprep.subr.bf16.mxu0 %v3634_v27  ;;  %v3670_v18 = vunpack.c.l.s8.bf16 %v3546_v20  ;;  %v3545_v27 = vld [vmem:[#allocation7 + $0x5c0] sm:$0xff] }
 0x818   :  { %3814 = vmatprep.subr.bf16.mxu1 %v3636_v28  ;;  %v3672_v28 = vunpack.c.l.s8.bf16 %v3548_v21  ;;  %v3669_v31 = vunpack.c.l.s8.bf16 %v3545_v27  ;;  %v3673_v35 = vunpack.c.h.s8.bf16 %v3545_v27 }
 0x81a   :  { %3733 = vmatpush1.bf16.msra.mxu0 %v3633_v29  ;;  %v2226_v29 = vrot.slane %v5582_v24, %v2225_v25  ;;  %v3680_v24 = vunpack.c.l.s8.bf16 %v3552_v44 }
 0x81b   :  { %3815 = vmatpush1.bf16.msra.mxu1 %v3635_v30  ;;  %3734 = vmatprep.subr.bf16.mxu0 %v3638_v32  ;;  %v3671_v30 = vunpack.c.l.s8.bf16 %v3547_v51  ;;  %v3674_v32 = vunpack.c.h.s8.bf16 %v3546_v20  ;;  %v3916_v20 = vld [vmem:[#allocation7 + $0x640] sm:$0xff] }
 0x81c   :  { %3816 = vmatprep.subr.bf16.mxu1 %v3640_v34  ;;  %v3550_v34 = vld [vmem:[#allocation7 + $0x5e8] sm:$0xff] }
 0x81d   :  { %v3682_v49 = vunpack.c.h.s8.bf16 %v3550_v34 }
 0x81e   :  { %3735 = vmatpush1.bf16.msra.mxu0 %v3637_v36  ;;  %v2245_v36 = vmul.f32 %v2226_v29, %v5450_v1  ;;  %v3909_v1 = vld [vmem:[#allocation7 + $0x608] sm:$0xff] }
 0x81f   :  { %3817 = vmatpush1.bf16.msra.mxu1 %v3639_v37  ;;  %3736 = vmatprep.subr.bf16.mxu0 %v3642_v38  ;;  %v2275_v37 = vrot.slane %v5596_v22, %v2225_v25  ;;  %v3675_v38 = vunpack.c.h.s8.bf16 %v3547_v51  ;;  %v3681_v22 = vunpack.c.h.s8.bf16 %v3549_v41  ;;  %v3981_v61 = vunpack.c.h.s8.bf16 %v3909_v1  ;;  %v3923_v51 = vld [vmem:[#allocation7 + $0x678] sm:$0xff] }
 0x820   :  { %3818 = vmatprep.subr.bf16.mxu1 %v3644_v40  ;;  %v3678_v40 = vunpack.c.l.s8.bf16 %v3550_v34  ;;  %v3992_v25 = vunpack.c.l.s8.bf16 %v3916_v20  ;;  %v3922_v34 = vld [vmem:[#allocation7 + $0x670] sm:$0xff] }
 0x822   :  { %3737 = vmatpush1.bf16.msra.mxu0 %v3641_v42  ;;  %v3677_v42 = vunpack.c.l.s8.bf16 %v3549_v41 }
 0x823   :  { %3819 = vmatpush1.bf16.msra.mxu1 %v3643_v50  ;;  %3738 = vmatprep.subr.bf16.mxu0 %v3646_v43  ;;  %v2294_v50 = vadd.f32 %v2275_v37, %v2245_v36  ;;  %v3679_v43 = vunpack.c.l.s8.bf16 %v3551_v2  ;;  %v4007_v37 = vunpack.c.h.s8.bf16 %v3923_v51 }
 0x824   :  { %3820 = vmatprep.subr.bf16.mxu1 %v3648_v39  ;;  %v3684_v39 = vunpack.c.h.s8.bf16 %v3552_v44 }
 0x826   :  { %3739 = vmatpush1.bf16.msra.mxu0 %v3645_v57  ;;  %v2302_v57 = vmax.f32 %v2294_v50, 0.0 }
 0x827   :  { %3821 = vmatpush1.bf16.msra.mxu1 %v3647_v53  ;;  %3740 = vmatprep.subr.bf16.mxu0 %v3650_v54  ;;  %v3683_v53 = vunpack.c.h.s8.bf16 %v3551_v2  ;;  %v3977_v54 = vunpack.c.l.s8.bf16 %v3909_v1 }
 0x828   :  { %3822 = vmatprep.subr.bf16.mxu1 %v3652_v55  ;;  %v3908_v55 = vld [vmem:[#allocation7 + $0x600] sm:$0xff] }
 0x82a   :  { %3741 = vmatpush1.bf16.msra.mxu0 %v3649_v58  ;;  %v3976_v58 = vunpack.c.l.s8.bf16 %v3908_v55 }
 0x82b   :  { %3823 = vmatpush1.bf16.msra.mxu1 %v3651_v59  ;;  %3742 = vmatprep.subr.bf16.mxu0 %v3654_v60  ;;  %v2310_v59 = vpack.c.bf16 %v2302_v57, %v2302_v57  ;;  %v3978_v60 = vunpack.c.l.s8.bf16 %v3910_v0  ;;  %v3931_v57 = vld [vmem:[#allocation7 + $0x6b8] sm:$0xff] }
 0x82c   :  { %3824 = vmatprep.subr.bf16.mxu1 %v3656_v62  ;;  %v3983_v62 = vunpack.c.h.s8.bf16 %v3911_v52 }
 0x82e   :  { %3743 = vmatpush1.bf16.msra.mxu0 %v3653_v4  ;;  %v3915_v4 = vld [vmem:[#allocation7 + $0x638] sm:$0xff] }
 0x82f   :  { %3825 = vmatpush1.bf16.msra.mxu1 %v3655_v3  ;;  %3744 = vmatprep.subr.bf16.mxu0 %v3658_v26  ;;  %v3980_v3 = vunpack.c.h.s8.bf16 %v3908_v55  ;;  %v3982_v26 = vunpack.c.h.s8.bf16 %v3910_v0  ;;  %v3987_v7 = vunpack.c.l.s8.bf16 %v3915_v4  ;;  %v4019_v0 = vunpack.c.l.s8.bf16 %v3931_v57 }
 0x830   :  { %3826 = vmatprep.subr.bf16.mxu1 %v3660_v5  ;;  %v3985_v5 = vunpack.c.l.s8.bf16 %v3913_v63  ;;  %v3933_v63 = vld [vmem:[#allocation7 + $0x6c8] sm:$0xff] }
 0x832   :  { %3745 = vmatpush1.bf16.msra.mxu0 %v3657_v8  ;;  %v3914_v8 = vld [vmem:[#allocation7 + $0x630] sm:$0xff] }
 0x833   :  { %3827 = vmatpush1.bf16.msra.mxu1 %v3659_v9  ;;  %3746 = vmatprep.subr.bf16.mxu0 %v3662_v10  ;;  %v3984_v9 = vunpack.c.l.s8.bf16 %v3912_v6  ;;  %v3986_v10 = vunpack.c.l.s8.bf16 %v3914_v8 }
 0x834   :  { %3828 = vmatprep.subr.bf16.mxu1 %v3664_v12  ;;  %v3991_v12 = vunpack.c.h.s8.bf16 %v3915_v4  ;;  %v3935_v4 = vld [vmem:[#allocation7 + $0x6d8] sm:$0xff] }
 0x836   :  { %3747 = vmatpush1.bf16.msra.mxu0 %v3661_v14  ;;  %v3919_v14 = vld [vmem:[#allocation7 + $0x658] sm:$0xff] }
 0x837   :  { %3829 = vmatpush1.bf16.msra.mxu1 %v3663_v15  ;;  %3748 = vmatprep.subr.bf16.mxu0 %v3666_v16  ;;  %v3988_v15 = vunpack.c.h.s8.bf16 %v3912_v6  ;;  %v3990_v16 = vunpack.c.h.s8.bf16 %v3914_v8  ;;  %v3995_v21 = vunpack.c.l.s8.bf16 %v3919_v14  ;;  %v3999_v27 = vunpack.c.h.s8.bf16 %v3919_v14  ;;  %v3932_v6 = vld [vmem:[#allocation7 + $0x6c0] sm:$0xff]  ;;  %v3934_v8 = vld [vmem:[#allocation7 + $0x6d0] sm:$0xff] }
 0x838   :  { %3830 = vmatprep.subr.bf16.mxu1 %v3668_v19  ;;  %v3993_v19 = vunpack.c.l.s8.bf16 %v3917_v13  ;;  %v4030_v14 = vunpack.c.h.s8.bf16 %v3934_v8 }
 0x83a   :  { %3749 = vmatpush1.bf16.msra.mxu0 %v3665_v46  ;;  %v3918_v46 = vld [vmem:[#allocation7 + $0x650] sm:$0xff] }
 0x83b   :  { %3831 = vmatpush1.bf16.msra.mxu1 %v3667_v17  ;;  %3750 = vmatprep.subr.bf16.mxu0 %v3670_v18  ;;  %v3994_v17 = vunpack.c.l.s8.bf16 %v3918_v46  ;;  %v3997_v18 = vunpack.c.h.s8.bf16 %v3917_v13  ;;  %v3998_v29 = vunpack.c.h.s8.bf16 %v3918_v46  ;;  %v4028_v13 = vunpack.c.h.s8.bf16 %v3932_v6 }
 0x83c   :  { %3832 = vmatprep.subr.bf16.mxu1 %v3672_v28  ;;  %v3921_v28 = vld [vmem:[#allocation7 + $0x668] sm:$0xff] }
 0x83d   :  { %v4005_v36 = vunpack.c.h.s8.bf16 %v3921_v28 }
 0x83e   :  { %3751 = vmatpush1.bf16.msra.mxu0 %v3669_v31  ;;  %v3996_v31 = vunpack.c.h.s8.bf16 %v3916_v20  ;;  %v3939_v20 = vld [vmem:[#allocation7 + $0x6f8] sm:$0xff] }
 0x83f   :  { %3833 = vmatpush1.bf16.msra.mxu1 %v3671_v30  ;;  %3752 = vmatprep.subr.bf16.mxu0 %v3674_v32  ;;  %v4001_v30 = vunpack.c.l.s8.bf16 %v3921_v28  ;;  %v3920_v32 = vld [vmem:[#allocation7 + $0x660] sm:$0xff] }
 0x840   :  { %3834 = vmatprep.subr.bf16.mxu1 %v3676_v33  ;;  %v4003_v33 = vunpack.c.l.s8.bf16 %v3923_v51  ;;  %v4000_v44 = vunpack.c.l.s8.bf16 %v3920_v32  ;;  %v4004_v41 = vunpack.c.h.s8.bf16 %v3920_v32 }
 0x842   :  { %3753 = vmatpush1.bf16.msra.mxu0 %v3673_v35  ;;  %v4002_v35 = vunpack.c.l.s8.bf16 %v3922_v34 }
 0x843   :  { %3835 = vmatpush1.bf16.msra.mxu1 %v3675_v38  ;;  %3754 = vmatprep.subr.bf16.mxu0 %v3678_v40  ;;  %v3925_v38 = vld [vmem:[#allocation7 + $0x688] sm:$0xff]  ;;  %v3927_v40 = vld [vmem:[#allocation7 + $0x698] sm:$0xff] }
 0x844   :  { %3836 = vmatprep.subr.bf16.mxu1 %v3680_v24  ;;  %v4006_v24 = vunpack.c.h.s8.bf16 %v3922_v34  ;;  %v4009_v2 = vunpack.c.l.s8.bf16 %v3925_v38  ;;  %v4011_v50 = vunpack.c.l.s8.bf16 %v3927_v40  ;;  %v4013_v1 = vunpack.c.h.s8.bf16 %v3925_v38 }
 0x845   :  { %v4015_v52 = vunpack.c.h.s8.bf16 %v3927_v40 }
 0x846   :  { %3755 = vmatpush1.bf16.msra.mxu0 %v3677_v42  ;;  %v3924_v42 = vld [vmem:[#allocation7 + $0x680] sm:$0xff] }
 0x847   :  { %3837 = vmatpush1.bf16.msra.mxu1 %v3679_v43  ;;  %3756 = vmatprep.subr.bf16.mxu0 %v3682_v49  ;;  %v3926_v43 = vld [vmem:[#allocation7 + $0x690] sm:$0xff]  ;;  %v4008_v49 = vunpack.c.l.s8.bf16 %v3924_v42 }
 0x848   :  { %3838 = vmatprep.subr.bf16.mxu1 %v3684_v39  ;;  %v4010_v39 = vunpack.c.l.s8.bf16 %v3926_v43 }
 0x84a   :  { %3757 = vmatpush1.bf16.msra.mxu0 %v3681_v22  ;;  %v3929_v22 = vld [vmem:[#allocation7 + $0x6a8] sm:$0xff] }
 0x84b   :  { %3839 = vmatpush1.bf16.msra.mxu1 %v3683_v53  ;;  %4104 = vmatprep.subr.bf16.mxu0 %v3977_v54  ;;  %v4012_v53 = vunpack.c.h.s8.bf16 %v3924_v42  ;;  %v4014_v54 = vunpack.c.h.s8.bf16 %v3926_v43  ;;  %v4017_v55 = vunpack.c.l.s8.bf16 %v3929_v22  ;;  %v4737_v43 = vld [vmem:[%s5775_s9 + $0x2] ss:$4 sm:$0xf] }
 0x84c   :  { %4186 = vmatprep.subr.bf16.mxu1 %v3979_v56  ;;  %v3928_v56 = vld [vmem:[#allocation7 + $0x6a0] sm:$0xff] }
 0x84d   :  { %3759 = vmatmul.mubr.bf16.vlgmr.msra.gmra.mrb[36].mxu0 %v2310_v59 }
 0x84e   :  { %3841 = vmatmul.mubr.bf16.vlgmr.msra.gmra.mrb[36].mxu1 %v2310_v59  ;;  %4105 = vmatpush1.bf16.msra.mxu0 %v3976_v58  ;;  %v3930_v58 = vld [vmem:[#allocation7 + $0x6b0] sm:$0xff]  ;;  %v4016_v59 = vunpack.c.l.s8.bf16 %v3928_v56 }
 0x84f   :  { %4187 = vmatpush1.bf16.msra.mxu1 %v3978_v60  ;;  %4106 = vmatprep.subr.bf16.mxu0 %v3981_v61  ;;  %v4018_v60 = vunpack.c.l.s8.bf16 %v3930_v58  ;;  %v4021_v61 = vunpack.c.h.s8.bf16 %v3929_v22 }
 0x850   :  { %4188 = vmatprep.subr.bf16.mxu1 %v3983_v62  ;;  %v4023_v62 = vunpack.c.h.s8.bf16 %v3931_v57  ;;  %v3865_v57 = vrot.slane %v4737_v43, %v5320_v48 }
 0x852   :  { %4107 = vmatpush1.bf16.msra.mxu0 %v3980_v3  ;;  %v4020_v3 = vunpack.c.h.s8.bf16 %v3928_v56 }
 0x853   :  { %4189 = vmatpush1.bf16.msra.mxu1 %v3982_v26  ;;  %4108 = vmatprep.subr.bf16.mxu0 %v3985_v5  ;;  %v4022_v26 = vunpack.c.h.s8.bf16 %v3930_v58  ;;  %v4025_v5 = vunpack.c.l.s8.bf16 %v3933_v63 }
 0x854   :  { %4190 = vmatprep.subr.bf16.mxu1 %v3987_v7  ;;  %v4027_v7 = vunpack.c.l.s8.bf16 %v3935_v4 }
 0x856   :  { %4109 = vmatpush1.bf16.msra.mxu0 %v3984_v9  ;;  %v4024_v9 = vunpack.c.l.s8.bf16 %v3932_v6 }
 0x857   :  { %4191 = vmatpush1.bf16.msra.mxu1 %v3986_v10  ;;  %4110 = vmatprep.subr.bf16.mxu0 %v3989_v11  ;;  %v4026_v10 = vunpack.c.l.s8.bf16 %v3934_v8  ;;  %v4029_v11 = vunpack.c.h.s8.bf16 %v3933_v63 }
 0x858   :  { %4192 = vmatprep.subr.bf16.mxu1 %v3991_v12  ;;  %v4031_v12 = vunpack.c.h.s8.bf16 %v3935_v4 }
 0x85a   :  { %4111 = vmatpush1.bf16.msra.mxu0 %v3988_v15 }
 0x85b   :  { %4193 = vmatpush1.bf16.msra.mxu1 %v3990_v16  ;;  %4112 = vmatprep.subr.bf16.mxu0 %v3993_v19  ;;  %v3937_v19 = vld [vmem:[#allocation7 + $0x6e8] sm:$0xff] }
 0x85c   :  { %4194 = vmatprep.subr.bf16.mxu1 %v3995_v21  ;;  %v4704_v21 = vld [vmem:[%s5778_s12] ss:$0 sm:$0xff] }
 0x85e   :  { %4113 = vmatpush1.bf16.msra.mxu0 %v3992_v25 }
 0x85f   :  { %4195 = vmatpush1.bf16.msra.mxu1 %v3994_v17  ;;  %4114 = vmatprep.subr.bf16.mxu0 %v3997_v18  ;;  %v4033_v17 = vunpack.c.l.s8.bf16 %v3937_v19  ;;  %v3936_v18 = vld [vmem:[#allocation7 + $0x6e0] sm:$0xff] }
 0x860   :  { %4196 = vmatprep.subr.bf16.mxu1 %v3999_v27  ;;  %v3938_v27 = vld [vmem:[#allocation7 + $0x6f0] sm:$0xff]  ;;  %v4032_v34 = vunpack.c.l.s8.bf16 %v3936_v18  ;;  %v4036_v40 = vunpack.c.h.s8.bf16 %v3936_v18 }
 0x862   :  { %4115 = vmatpush1.bf16.msra.mxu0 %v3996_v31 }
 0x863   :  { %4197 = vmatpush1.bf16.msra.mxu1 %v3998_v29  ;;  %4116 = vmatprep.subr.bf16.mxu0 %v4001_v30  ;;  %v4035_v30 = vunpack.c.l.s8.bf16 %v3939_v20 }
 0x864   :  { %4198 = vmatprep.subr.bf16.mxu1 %v4003_v33 }
 0x866   :  { %4117 = vmatpush1.bf16.msra.mxu0 %v4000_v44  ;;  %v4034_v44 = vunpack.c.l.s8.bf16 %v3938_v27 }
 0x867   :  { %4199 = vmatpush1.bf16.msra.mxu1 %v4002_v35  ;;  %4118 = vmatprep.subr.bf16.mxu0 %v4005_v36  ;;  %v4037_v36 = vunpack.c.h.s8.bf16 %v3937_v19 }
 0x868   :  { %4200 = vmatprep.subr.bf16.mxu1 %v4007_v37  ;;  %v4039_v37 = vunpack.c.h.s8.bf16 %v3939_v20 }
 0x86a   :  { %4119 = vmatpush1.bf16.msra.mxu0 %v4004_v41  ;;  %v4038_v41 = vunpack.c.h.s8.bf16 %v3938_v27 }
 0x86b   :  { %4201 = vmatpush1.bf16.msra.mxu1 %v4006_v24  ;;  %4120 = vmatprep.subr.bf16.mxu0 %v4009_v2  ;;  %v3941_v24 = vld [vmem:[#allocation7 + $0x708] sm:$0xff]  ;;  %v3943_v2 = vld [vmem:[#allocation7 + $0x718] sm:$0xff] }
 0x86c   :  { %4202 = vmatprep.subr.bf16.mxu1 %v4011_v50  ;;  %v4041_v42 = vunpack.c.l.s8.bf16 %v3941_v24  ;;  %v4043_v50 = vunpack.c.l.s8.bf16 %v3943_v2 }
 0x86e   :  { %4121 = vmatpush1.bf16.msra.mxu0 %v4008_v49  ;;  %v4738_v49 = vld [vmem:[%s5776_s10 + $0x2] ss:$4 sm:$0xf] }
 0x86f   :  { %4203 = vmatpush1.bf16.msra.mxu1 %v4010_v39  ;;  %4122 = vmatprep.subr.bf16.mxu0 %v4013_v1  ;;  %v3853_v39 = vrot.slane %v4737_v43, %v5309_v45  ;;  %v3861_v1 = vrot.slane %v4737_v43, %v5331_v23  ;;  %v3878_v22 = vrot.slane %v4738_v49, %v5309_v45 }
 0x870   :  { %4204 = vmatprep.subr.bf16.mxu1 %v4015_v52  ;;  %v3857_v52 = vrot.slane %v4737_v43, %v5317_v47 }
 0x872   :  { %4123 = vmatpush1.bf16.msra.mxu0 %v4012_v53 }
 0x873   :  { %4205 = vmatpush1.bf16.msra.mxu1 %v4014_v54  ;;  %4124 = vmatprep.subr.bf16.mxu0 %v4017_v55  ;;  %v3886_v54 = vrot.slane %v4738_v49, %v5331_v23  ;;  %v3882_v55 = vrot.slane %v4738_v49, %v5317_v47 }
 0x874   :  { %4206 = vmatprep.subr.bf16.mxu1 %v4019_v0 }
 0x876   :  { %4125 = vmatpush1.bf16.msra.mxu0 %v4016_v59  ;;  %v3890_v59 = vrot.slane %v4738_v49, %v5320_v48 }
 0x877   :  { %4207 = vmatpush1.bf16.msra.mxu1 %v4018_v60  ;;  %4126 = vmatprep.subr.bf16.mxu0 %v4021_v61 }
 0x878   :  { %4208 = vmatprep.subr.bf16.mxu1 %v4023_v62 }
 0x87a   :  { %4127 = vmatpush1.bf16.msra.mxu0 %v4020_v3 }
 0x87b   :  { %4209 = vmatpush1.bf16.msra.mxu1 %v4022_v26  ;;  %4128 = vmatprep.subr.bf16.mxu0 %v4025_v5 }
 0x87c   :  { %4210 = vmatprep.subr.bf16.mxu1 %v4027_v7 }
 0x87e   :  { %4129 = vmatpush1.bf16.msra.mxu0 %v4024_v9 }
 0x87f   :  { %4211 = vmatpush1.bf16.msra.mxu1 %v4026_v10  ;;  %4130 = vmatprep.subr.bf16.mxu0 %v4029_v11  ;;  %v3940_v11 = vld [vmem:[#allocation7 + $0x700] sm:$0xff] }
 0x880   :  { %4212 = vmatprep.subr.bf16.mxu1 %v4031_v12  ;;  %v3942_v12 = vld [vmem:[#allocation7 + $0x710] sm:$0xff]  ;;  %v4044_v27 = vunpack.c.h.s8.bf16 %v3940_v11 }
 0x881   :  { %v4042_v19 = vunpack.c.l.s8.bf16 %v3942_v12 }
 0x882   :  { %4131 = vmatpush1.bf16.msra.mxu0 %v4028_v13 }
 0x883   :  { %4213 = vmatpush1.bf16.msra.mxu1 %v4030_v14  ;;  %4132 = vmatprep.subr.bf16.mxu0 %v4033_v17  ;;  %v3947_v17 = vld [vmem:[#allocation7 + $0x738] sm:$0xff] }
 0x884   :  { %4214 = vmatprep.subr.bf16.mxu1 %v4035_v30  ;;  %v3946_v30 = vld [vmem:[#allocation7 + $0x730] sm:$0xff] }
 0x886   :  { %4133 = vmatpush1.bf16.msra.mxu0 %v4032_v34 }
 0x887   :  { %4215 = vmatpush1.bf16.msra.mxu1 %v4034_v44  ;;  %4134 = vmatprep.subr.bf16.mxu0 %v4037_v36  ;;  %v4055_v44 = vunpack.c.h.s8.bf16 %v3947_v17  ;;  %v3951_v36 = vld [vmem:[#allocation7 + $0x758] sm:$0xff] }
 0x888   :  { %4216 = vmatprep.subr.bf16.mxu1 %v4039_v37 }
 0x88a   :  { %4135 = vmatpush1.bf16.msra.mxu0 %v4036_v40  ;;  %v4054_v40 = vunpack.c.h.s8.bf16 %v3946_v30 }
 0x88b   :  { %4217 = vmatpush1.bf16.msra.mxu1 %v4038_v41  ;;  %4145 = vmatprep.subr.bf16.mxu0 %v4041_v42  ;;  %v3950_v42 = vld [vmem:[#allocation7 + $0x750] sm:$0xff] }
 0x88c   :  { %4227 = vmatprep.subr.bf16.mxu1 %v4043_v50  ;;  %v4058_v43 = vunpack.c.l.s8.bf16 %v3950_v42 }
 0x8a0   :  { %v4854_v15 = vpop.f32.mrb[32].mxu0  ;;  %v4876_v16 = vpop.f32.mrb[32].mxu1 }
 0x8a1   :  { %v4855_v46 = vpop.f32.mrb[33].mxu0  ;;  %v4877_v25 = vpop.f32.mrb[33].mxu1 }
 0x8a2   :  { %v4856_v28 = vadd.f32 %v4855_v46, %v4854_v15  ;;  %v4878_v51 = vadd.f32 %v4877_v25, %v4876_v16  ;;  %v4857_v31 = vpop.f32.mrb[34].mxu0  ;;  %v4879_v29 = vpop.f32.mrb[34].mxu1  ;;  %v4040_v16 = vunpack.c.l.s8.bf16 %v3940_v11  ;;  %v4047_v46 = vunpack.c.h.s8.bf16 %v3943_v2  ;;  %v3945_v25 = vld [vmem:[#allocation7 + $0x728] sm:$0xff]  ;;  %v3948_v2 = vld [vmem:[#allocation7 + $0x740] sm:$0xff] }
 0x8a3   :  { %v4858_v32 = vpop.f32.mrb[35].mxu0  ;;  %v4880_v33 = vpop.f32.mrb[35].mxu1  ;;  %v4051_v31 = vunpack.c.l.s8.bf16 %v3947_v17  ;;  %v3944_v29 = vld [vmem:[#allocation7 + $0x720] sm:$0xff]  ;;  %v4053_v34 = vunpack.c.h.s8.bf16 %v3945_v25  ;;  %v4056_v50 = vunpack.c.l.s8.bf16 %v3948_v2 }
 0x8a4   :  { %v3443_v35 = vadd.f32 %v4856_v28, %v4704_v21  ;;  %v4045_v21 = vunpack.c.h.s8.bf16 %v3941_v24  ;;  %v4046_v28 = vunpack.c.h.s8.bf16 %v3942_v12  ;;  %v4048_v32 = vunpack.c.l.s8.bf16 %v3944_v29  ;;  %v3961_v12 = vld [vmem:[#allocation7 + $0x7a8] sm:$0xff] }
 0x8a5   :  { %v4050_v33 = vunpack.c.l.s8.bf16 %v3946_v30  ;;  %v4052_v37 = vunpack.c.h.s8.bf16 %v3944_v29  ;;  %v4059_v24 = vunpack.c.l.s8.bf16 %v3951_v36  ;;  %v4085_v17 = vunpack.c.h.s8.bf16 %v3961_v12 }
 0x8a6   :  { %v5620_v38 = vadd.f32 %v4878_v51, %v3443_v35  ;;  %v4049_v51 = vunpack.c.l.s8.bf16 %v3945_v25  ;;  %v3949_v35 = vld [vmem:[#allocation7 + $0x748] sm:$0xff] }
 0x8a7   :  { %v4057_v41 = vunpack.c.l.s8.bf16 %v3949_v35  ;;  %v4061_v49 = vunpack.c.h.s8.bf16 %v3949_v35 }
 0x920   :  { %v3760_v53 = vpop.f32.mrb[36].mxu0 }
 0x921   :  { %v3870_v56 = vmul.f32 %v3853_v39, %v3760_v53  ;;  %v3842_v0 = vpop.f32.mrb[36].mxu1  ;;  %v3762_v58 = vpop.f32.mrb[37].mxu0  ;;  %v4063_v39 = vunpack.c.h.s8.bf16 %v3951_v36 }
 0x922   :  { %v3872_v60 = vmul.f32 %v3861_v1, %v3842_v0  ;;  %v3871_v61 = vmul.f32 %v3857_v52, %v3762_v58  ;;  %v3844_v62 = vpop.f32.mrb[37].mxu1  ;;  %v3764_v63 = vpop.f32.mrb[38].mxu0  ;;  %v3953_v1 = vld [vmem:[#allocation7 + $0x768] sm:$0xff]  ;;  %v3955_v52 = vld [vmem:[#allocation7 + $0x778] sm:$0xff] }
 0x923   :  { %v3895_v4 = vadd.f32 %v3878_v22, %v3870_v56  ;;  %v3873_v3 = vmul.f32 %v3865_v57, %v3844_v62  ;;  %v3846_v26 = vpop.f32.mrb[38].mxu1  ;;  %v3765_v5 = vpop.f32.mrb[39].mxu0  ;;  %v4060_v22 = vunpack.c.h.s8.bf16 %v3948_v2  ;;  %v4062_v57 = vunpack.c.h.s8.bf16 %v3950_v42  ;;  %v3954_v56 = vld [vmem:[#allocation7 + $0x770] sm:$0xff]  ;;  %v3959_v62 = vld [vmem:[#allocation7 + $0x798] sm:$0xff] }
 0x924   :  { %v5636_v6 = vadd.f32 %v3886_v54, %v3872_v60  ;;  %v3896_v7 = vadd.f32 %v3882_v55, %v3871_v61  ;;  %v3847_v8 = vpop.f32.mrb[39].mxu1  ;;  %v4065_v53 = vunpack.c.l.s8.bf16 %v3953_v1  ;;  %v4067_v54 = vunpack.c.l.s8.bf16 %v3955_v52  ;;  %v3952_v55 = vld [vmem:[#allocation7 + $0x760] sm:$0xff]  ;;  %v3957_v61 = vld [vmem:[#allocation7 + $0x788] sm:$0xff] }
 0x925   :  { %v3899_v9 = vmax.f32 %v3895_v4, 0.0  ;;  %v3898_v10 = vadd.f32 %v3890_v59, %v3873_v3  ;;  %v4064_v0 = vunpack.c.l.s8.bf16 %v3952_v55  ;;  %v4066_v58 = vunpack.c.l.s8.bf16 %v3954_v56  ;;  %v3956_v5 = vld [vmem:[#allocation7 + $0x780] sm:$0xff] }
 0x926   :  { %v3900_v13 = vmax.f32 %v3896_v7, 0.0  ;;  %v4069_v59 = vunpack.c.h.s8.bf16 %v3953_v1  ;;  %v4071_v60 = vunpack.c.h.s8.bf16 %v3955_v52  ;;  %v4068_v63 = vunpack.c.h.s8.bf16 %v3952_v55  ;;  %v3958_v7 = vld [vmem:[#allocation7 + $0x790] sm:$0xff]  ;;  %v5046_v55 = vld [vmem:[%s5777_s11 + $0x1c0] sm:$0xff]  }
 0x927   :  { %v3902_v14 = vmax.f32 %v3898_v10, 0.0  ;;  %v3903_v20 = vpack.c.bf16 %v3899_v9, %v3899_v9  ;;  %v4070_v4 = vunpack.c.h.s8.bf16 %v3954_v56  ;;  %v4073_v3 = vunpack.c.l.s8.bf16 %v3957_v61  ;;  %v5047_v56 = vld [vmem:[%s5777_s11 + $0x100] sm:$0xff]  }
 0x928   :  { %v3904_v15 = vpack.c.bf16 %v3900_v13, %v3900_v13  ;;  %v4075_v26 = vunpack.c.l.s8.bf16 %v3959_v62  ;;  %v4072_v8 = vunpack.c.l.s8.bf16 %v3956_v5  ;;  %v4074_v9 = vunpack.c.l.s8.bf16 %v3958_v7  ;;  %v3963_v13 = vld [vmem:[#allocation7 + $0x7b8] sm:$0xff] }
 0x929   :  { %v3906_v18 = vpack.c.bf16 %v3902_v14, %v3902_v14  ;;  %v4077_v10 = vunpack.c.h.s8.bf16 %v3957_v61  ;;  %v4079_v11 = vunpack.c.h.s8.bf16 %v3959_v62  ;;  %v4076_v14 = vunpack.c.h.s8.bf16 %v3956_v5  ;;  %v5052_v61 = vld [vmem:[%s5777_s11 + $0x188] sm:$0xff]   ;;  %v5053_v62 = vld [vmem:[%s5777_s11 + $0x150] sm:$0xff]   ;;  %v5058_v5 = vld [vmem:[%s5777_s11 + $0x1d8] sm:$0xff]  }
 0x92a   :  { %4136 = vmatprep.mubr.bf16.mxu0 %v3904_v15  ;;  %4218 = vmatprep.mubr.bf16.mxu1 %v3904_v15  ;;  %v4078_v15 = vunpack.c.h.s8.bf16 %v3958_v7  ;;  %v5059_v7 = vld [vmem:[%s5777_s11 + $0x118] sm:$0xff]  }
 0x92b   :  { %4137 = vmatmul.mubr.bf16.vlgmr.msra.gmra.mrb[40].mxu0 %v3903_v20  ;;  %4219 = vmatmul.mubr.bf16.vlgmr.msra.gmra.mrb[40].mxu1 %v3903_v20  ;;  %v3960_v20 = vld [vmem:[#allocation7 + $0x7a0] sm:$0xff] }
 0x92c   :  { %4146 = vmatpush1.bf16.msra.mxu0 %v4040_v16  ;;  %4228 = vmatpush1.bf16.msra.mxu1 %v4042_v19  ;;  %v4081_v16 = vunpack.c.l.s8.bf16 %v3961_v12  ;;  %v4083_v19 = vunpack.c.l.s8.bf16 %v3963_v13  ;;  %v5064_v12 = vld [vmem:[%s5777_s11 + $0x1a0] sm:$0xff]  }
 0x92d   :  { %4177 = vmatprep.mubr.bf16.mxu0 %v3906_v18  ;;  %4259 = vmatprep.mubr.bf16.mxu1 %v3906_v18  ;;  %v4087_v18 = vunpack.c.h.s8.bf16 %v3963_v13  ;;  %v5065_v13 = vld [vmem:[%s5777_s11 + $0x168] sm:$0xff]  }
 0x92e   :  { %4147 = vmatprep.subr.bf16.mxu0 %v4045_v21  ;;  %4229 = vmatprep.subr.bf16.mxu1 %v4047_v46  ;;  %v3962_v21 = vld [vmem:[#allocation7 + $0x7b0] sm:$0xff]  ;;  %v4080_v46 = vunpack.c.l.s8.bf16 %v3960_v20 }
 0x92f   :  { %v4082_v25 = vunpack.c.l.s8.bf16 %v3962_v21 }
 0x930   :  { %4148 = vmatpush1.bf16.msra.mxu0 %v4044_v27  ;;  %4230 = vmatpush1.bf16.msra.mxu1 %v4046_v28  ;;  %v3965_v27 = vld [vmem:[#allocation7 + $0x7c8] sm:$0xff]  ;;  %v3967_v28 = vld [vmem:[#allocation7 + $0x7d8] sm:$0xff] }
 0x931   :  { %4149 = vmatprep.subr.bf16.mxu0 %v4049_v51  ;;  %4231 = vmatprep.subr.bf16.mxu1 %v4051_v31  ;;  %v4084_v51 = vunpack.c.h.s8.bf16 %v3960_v20  ;;  %v4086_v31 = vunpack.c.h.s8.bf16 %v3962_v21  ;;  %v4089_v29 = vunpack.c.l.s8.bf16 %v3965_v27  ;;  %v4091_v30 = vunpack.c.l.s8.bf16 %v3967_v28  ;;  %v5070_v20 = vld [vmem:[%s5777_s11 + $0x1f0] sm:$0xff]  }
 0x932   :  { %v4093_v35 = vunpack.c.h.s8.bf16 %v3965_v27  ;;  %v4095_v36 = vunpack.c.h.s8.bf16 %v3967_v28  ;;  %v5071_v21 = vld [vmem:[%s5777_s11 + $0x130] sm:$0xff]   ;;  %v5076_v27 = vld [vmem:[%s5777_s11 + $0x1b8] sm:$0xff]   ;;  %v4739_v28 = vld [vmem:[%s5775_s9 + $0x3] ss:$4 sm:$0xf] }
 0x934   :  { %4150 = vmatpush1.bf16.msra.mxu0 %v4048_v32  ;;  %4232 = vmatpush1.bf16.msra.mxu1 %v4050_v33  ;;  %v3964_v32 = vld [vmem:[#allocation7 + $0x7c0] sm:$0xff]  ;;  %v3966_v33 = vld [vmem:[#allocation7 + $0x7d0] sm:$0xff] }
 0x935   :  { %4151 = vmatprep.subr.bf16.mxu0 %v4053_v34  ;;  %4233 = vmatprep.subr.bf16.mxu1 %v4055_v44  ;;  %v4088_v34 = vunpack.c.l.s8.bf16 %v3964_v32  ;;  %v4090_v44 = vunpack.c.l.s8.bf16 %v3966_v33 }
 0x938   :  { %4152 = vmatpush1.bf16.msra.mxu0 %v4052_v37  ;;  %4234 = vmatpush1.bf16.msra.mxu1 %v4054_v40  ;;  %v3969_v37 = vld [vmem:[#allocation7 + $0x7e8] sm:$0xff]  ;;  %v3971_v40 = vld [vmem:[#allocation7 + $0x7f8] sm:$0xff] }
 0x939   :  { %4153 = vmatprep.subr.bf16.mxu0 %v4057_v41  ;;  %4235 = vmatprep.subr.bf16.mxu1 %v4059_v24  ;;  %v4092_v41 = vunpack.c.h.s8.bf16 %v3964_v32  ;;  %v4094_v24 = vunpack.c.h.s8.bf16 %v3966_v33  ;;  %v4097_v2 = vunpack.c.l.s8.bf16 %v3969_v37  ;;  %v4099_v42 = vunpack.c.l.s8.bf16 %v3971_v40 }
 0x93a   :  { %v4101_v1 = vunpack.c.h.s8.bf16 %v3969_v37  ;;  %v4103_v52 = vunpack.c.h.s8.bf16 %v3971_v40  ;;  %v4284_v32 = vrot.slane %v4739_v28, %v5320_v48 }
 0x93c   :  { %4154 = vmatpush1.bf16.msra.mxu0 %v4056_v50  ;;  %4236 = vmatpush1.bf16.msra.mxu1 %v4058_v43  ;;  %v3968_v50 = vld [vmem:[#allocation7 + $0x7e0] sm:$0xff]  ;;  %v3970_v43 = vld [vmem:[#allocation7 + $0x7f0] sm:$0xff] }
 0x93d   :  { %4155 = vmatprep.subr.bf16.mxu0 %v4061_v49  ;;  %4237 = vmatprep.subr.bf16.mxu1 %v4063_v39  ;;  %v4096_v49 = vunpack.c.l.s8.bf16 %v3968_v50  ;;  %v4098_v39 = vunpack.c.l.s8.bf16 %v3970_v43 }
 0x940   :  { %4156 = vmatpush1.bf16.msra.mxu0 %v4060_v22  ;;  %4238 = vmatpush1.bf16.msra.mxu1 %v4062_v57  ;;  %v4100_v22 = vunpack.c.h.s8.bf16 %v3968_v50  ;;  %v4102_v57 = vunpack.c.h.s8.bf16 %v3970_v43 }
 0x941   :  { %4157 = vmatprep.subr.bf16.mxu0 %v4065_v53  ;;  %4239 = vmatprep.subr.bf16.mxu1 %v4067_v54  ;;  %v3901_v53 = vmax.f32 %v5636_v6, 0.0  ;;  %v5045_v54 = vld [vmem:[%s5777_s11 + $0x140] sm:$0xff]  }
 0x942   :  { %v5048_v6 = vld [vmem:[%s5777_s11 + $0x180] sm:$0xff]  }
 0x944   :  { %4158 = vmatpush1.bf16.msra.mxu0 %v4064_v0  ;;  %4240 = vmatpush1.bf16.msra.mxu1 %v4066_v58  ;;  %v3905_v0 = vpack.c.bf16 %v3901_v53, %v3901_v53  ;;  %v5049_v58 = vld [vmem:[%s5777_s11 + $0x148] sm:$0xff]  }
 0x945   :  { %4159 = vmatprep.subr.bf16.mxu0 %v4069_v59  ;;  %4241 = vmatprep.subr.bf16.mxu1 %v4071_v60  ;;  %v5050_v59 = vld [vmem:[%s5777_s11 + $0x1c8] sm:$0xff]  }
 0x946   :  { %v5051_v60 = vld [vmem:[%s5777_s11 + $0x108] sm:$0xff]  }
 0x948   :  { %4160 = vmatpush1.bf16.msra.mxu0 %v4068_v63  ;;  %4242 = vmatpush1.bf16.msra.mxu1 %v4070_v4  ;;  %v5054_v63 = vld [vmem:[%s5777_s11 + $0x1d0] sm:$0xff]  }
 0x949   :  { %4161 = vmatprep.subr.bf16.mxu0 %v4073_v3  ;;  %4243 = vmatprep.subr.bf16.mxu1 %v4075_v26  ;;  %v5055_v4 = vld [vmem:[%s5777_s11 + $0x110] sm:$0xff]   ;;  %v5057_v26 = vld [vmem:[%s5777_s11 + $0x158] sm:$0xff]  }
 0x94a   :  { %v5056_v3 = vld [vmem:[%s5777_s11 + $0x190] sm:$0xff]  }
 0x94c   :  { %4162 = vmatpush1.bf16.msra.mxu0 %v4072_v8  ;;  %4244 = vmatpush1.bf16.msra.mxu1 %v4074_v9  ;;  %v5060_v8 = vld [vmem:[%s5777_s11 + $0x198] sm:$0xff]   ;;  %v5061_v9 = vld [vmem:[%s5777_s11 + $0x160] sm:$0xff]  }
 0x94d   :  { %4163 = vmatprep.subr.bf16.mxu0 %v4077_v10  ;;  %4245 = vmatprep.subr.bf16.mxu1 %v4079_v11  ;;  %v5062_v10 = vld [vmem:[%s5777_s11 + $0x1e0] sm:$0xff]  }
 0x94e   :  { %v5063_v11 = vld [vmem:[%s5777_s11 + $0x120] sm:$0xff]  }
 0x950   :  { %4164 = vmatpush1.bf16.msra.mxu0 %v4076_v14  ;;  %4246 = vmatpush1.bf16.msra.mxu1 %v4078_v15  ;;  %v5066_v14 = vld [vmem:[%s5777_s11 + $0x1e8] sm:$0xff]  }
 0x951   :  { %4165 = vmatprep.subr.bf16.mxu0 %v4081_v16  ;;  %4247 = vmatprep.subr.bf16.mxu1 %v4083_v19  ;;  %v5067_v15 = vld [vmem:[%s5777_s11 + $0x128] sm:$0xff]   ;;  %v5069_v19 = vld [vmem:[%s5777_s11 + $0x170] sm:$0xff]  }
 0x952   :  { %v5068_v16 = vld [vmem:[%s5777_s11 + $0x1a8] sm:$0xff]  }
 0x954   :  { %4166 = vmatpush1.bf16.msra.mxu0 %v4080_v46  ;;  %4248 = vmatpush1.bf16.msra.mxu1 %v4082_v25  ;;  %v5072_v46 = vld [vmem:[%s5777_s11 + $0x1b0] sm:$0xff]   ;;  %v5073_v25 = vld [vmem:[%s5777_s11 + $0x178] sm:$0xff]  }
 0x955   :  { %4167 = vmatprep.subr.bf16.mxu0 %v4085_v17  ;;  %4249 = vmatprep.subr.bf16.mxu1 %v4087_v18  ;;  %v5074_v17 = vld [vmem:[%s5777_s11 + $0x1f8] sm:$0xff]  }
 0x956   :  { %v5075_v18 = vld [vmem:[%s5777_s11 + $0x138] sm:$0xff]   ;;  %s5181_s11 = smov [#allocation8]  }
 0x957   :  { %s4681_s1 = sshll.u32 %s5181_s11, 4  ;;  %s4682_s1 = int_to_ptr.vmem [resolvable:$true] %s4681_s1 }
 0x958   :  { %4168 = vmatpush1.bf16.msra.mxu0 %v4084_v51  ;;  %4250 = vmatpush1.bf16.msra.mxu1 %v4086_v31  ;;  %v4740_v51 = vld [vmem:[%s5776_s10 + $0x3] ss:$4 sm:$0xf]  ;;  %v4272_v31 = vrot.slane %v4739_v28, %v5309_v45  ;;  %s5145_s6 = scalar_lea.vmem %s4682_s1, 128  ;;  %p5150_p11 = scmp.lt.s32.totalorder %s4682_s1, %s4682_s1 }
 0x959   :  { %4169 = vmatprep.subr.bf16.mxu0 %v4089_v29  ;;  %4251 = vmatprep.subr.bf16.mxu1 %v4091_v30  ;;  %v4280_v29 = vrot.slane %v4739_v28, %v5331_v23  ;;  %v4276_v30 = vrot.slane %v4739_v28, %v5317_v47  ;;  %v4297_v33 = vrot.slane %v4740_v51, %v5309_v45  ;;  %p5146_p10 = scmp.ne.s32.totalorder %s4682_s1, %s5145_s6  ;;  %p5151_p12 = scmp.lt.s32.totalorder %s5145_s6, %s5145_s6 }
 0x95a   :  { %v4309_v37 = vrot.slane %v4740_v51, %v5320_v48 }
 0x95b   :  { %p5152_p13 = por %p5151_p12, %p5150_p11 }
 0x95c   :  { %4170 = vmatpush1.bf16.msra.mxu0 %v4088_v34  ;;  %4252 = vmatpush1.bf16.msra.mxu1 %v4090_v44  ;;  %v4305_v34 = vrot.slane %v4740_v51, %v5331_v23 }
 0x95d   :  { %4171 = vmatprep.subr.bf16.mxu0 %v4093_v35  ;;  %4253 = vmatprep.subr.bf16.mxu1 %v4095_v36  ;;  %v4301_v36 = vrot.slane %v4740_v51, %v5317_v47  ;;  %p5153_p0 = pnand %p5152_p13, %p5146_p10 }
 0x960   :  { %4172 = vmatpush1.bf16.msra.mxu0 %v4092_v41  ;;  %4254 = vmatpush1.bf16.msra.mxu1 %v4094_v24 }
 0x961   :  { %4173 = vmatprep.subr.bf16.mxu0 %v4097_v2  ;;  %4255 = vmatprep.subr.bf16.mxu1 %v4099_v42 }
 0x964   :  { %4174 = vmatpush1.bf16.msra.mxu0 %v4096_v49  ;;  %4256 = vmatpush1.bf16.msra.mxu1 %v4098_v39 }
 0x965   :  { %4175 = vmatprep.subr.bf16.mxu0 %v4101_v1  ;;  %4257 = vmatprep.subr.bf16.mxu1 %v4103_v52 }
 0x968   :  { %4176 = vmatpush1.bf16.msra.mxu0 %v4100_v22  ;;  %4258 = vmatpush1.bf16.msra.mxu1 %v4102_v57 }
 0x969   :  { %4882 = vmatprep.subr.bf16.mxu0 %v5045_v54  ;;  %4904 = vmatprep.subr.bf16.mxu1 %v5046_v55 }
 0x96b   :  { %4178 = vmatmul.mubr.bf16.vlgmr.msra.gmra.mrb[40].mxu0 %v3905_v0  ;;  %4260 = vmatmul.mubr.bf16.vlgmr.msra.gmra.mrb[40].mxu1 %v3905_v0 }
 0x96c   :  { %4883 = vmatpush3.bf16.msra.mxu0 %v5047_v56  ;;  %4905 = vmatpush3.bf16.msra.mxu1 %v5048_v6 }
 0x96d   :  { %4884 = vmatprep.subr.bf16.mxu0 %v5049_v58  ;;  %4906 = vmatprep.subr.bf16.mxu1 %v5050_v59 }
 0x970   :  { %4885 = vmatpush3.bf16.msra.mxu0 %v5051_v60  ;;  %4907 = vmatpush3.bf16.msra.mxu1 %v5052_v61  ;;  %v4805_v61 = vld [vmem:[%s5778_s12 + $0x1] ss:$0 sm:$0xff] }
 0x971   :  { %4886 = vmatprep.subr.bf16.mxu0 %v5053_v62  ;;  %4908 = vmatprep.subr.bf16.mxu1 %v5054_v63 }
 0x974   :  { %4887 = vmatpush3.bf16.msra.mxu0 %v5055_v4  ;;  %4909 = vmatpush3.bf16.msra.mxu1 %v5056_v3 }
 0x975   :  { %4888 = vmatprep.subr.bf16.mxu0 %v5057_v26  ;;  %4910 = vmatprep.subr.bf16.mxu1 %v5058_v5 }
 0x978   :  { %4889 = vmatpush3.bf16.msra.mxu0 %v5059_v7  ;;  %4911 = vmatpush3.bf16.msra.mxu1 %v5060_v8 }
 0x979   :  { %4890 = vmatprep.subr.bf16.mxu0 %v5061_v9  ;;  %4912 = vmatprep.subr.bf16.mxu1 %v5062_v10 }
 0x97c   :  { %4891 = vmatpush3.bf16.msra.mxu0 %v5063_v11  ;;  %4913 = vmatpush3.bf16.msra.mxu1 %v5064_v12 }
 0x97d   :  { %4892 = vmatprep.subr.bf16.mxu0 %v5065_v13  ;;  %4914 = vmatprep.subr.bf16.mxu1 %v5066_v14 }
 0x980   :  { %4893 = vmatpush3.bf16.msra.mxu0 %v5067_v15  ;;  %4915 = vmatpush3.bf16.msra.mxu1 %v5068_v16 }
 0x981   :  { %4894 = vmatprep.subr.bf16.mxu0 %v5069_v19  ;;  %4916 = vmatprep.subr.bf16.mxu1 %v5070_v20 }
 0x984   :  { %4895 = vmatpush3.bf16.msra.mxu0 %v5071_v21  ;;  %4917 = vmatpush3.bf16.msra.mxu1 %v5072_v46 }
 0x985   :  { %4896 = vmatprep.subr.bf16.mxu0 %v5073_v25  ;;  %4918 = vmatprep.subr.bf16.mxu1 %v5074_v17 }
 0x988   :  { %4897 = vmatpush3.bf16.msra.mxu0 %v5075_v18  ;;  %4919 = vmatpush3.bf16.msra.mxu1 %v5076_v27 }
 0xa3e   :  { %v4179_v44 = vpop.f32.mrb[40].mxu0  ;;  %v4261_v35 = vpop.f32.mrb[40].mxu1 }
 0xa3f   :  { %v4289_v40 = vmul.f32 %v4272_v31, %v4179_v44  ;;  %v4291_v41 = vmul.f32 %v4280_v29, %v4261_v35  ;;  %v4181_v24 = vpop.f32.mrb[41].mxu0  ;;  %v4263_v2 = vpop.f32.mrb[41].mxu1 }
 0xa40   :  { %v4290_v42 = vmul.f32 %v4276_v30, %v4181_v24  ;;  %v4292_v50 = vmul.f32 %v4284_v32, %v4263_v2  ;;  %v4183_v43 = vpop.f32.mrb[42].mxu0  ;;  %v4265_v49 = vpop.f32.mrb[42].mxu1 }
 0xa41   :  { %v4314_v39 = vadd.f32 %v4297_v33, %v4289_v40  ;;  %v4316_v1 = vadd.f32 %v4305_v34, %v4291_v41  ;;  %v4184_v52 = vpop.f32.mrb[43].mxu0  ;;  %v4266_v45 = vpop.f32.mrb[43].mxu1 }
 0xa42   :  { %v4315_v22 = vadd.f32 %v4301_v36, %v4290_v42  ;;  %v4317_v23 = vadd.f32 %v4309_v37, %v4292_v50 }
 0xa43   :  { %v4318_v57 = vmax.f32 %v4314_v39, 0.0  ;;  %v4320_v53 = vmax.f32 %v4316_v1, 0.0 }
 0xa44   :  { %v4319_v54 = vmax.f32 %v4315_v22, 0.0  ;;  %v4321_v47 = vmax.f32 %v4317_v23, 0.0 }
 0xa45   :  { %v4322_v56 = vpack.c.bf16 %v4318_v57, %v4318_v57  ;;  %v4324_v6 = vpack.c.bf16 %v4320_v53, %v4320_v53 }
 0xa46   :  { %v4323_v55 = vpack.c.bf16 %v4319_v54, %v4319_v54  ;;  %v4325_v48 = vpack.c.bf16 %v4321_v47, %v4321_v47 }
 0xa48   :  { %4620 = vmatprep.mubr.bf16.mxu0 %v4323_v55  ;;  %4660 = vmatprep.mubr.bf16.mxu1 %v4325_v48 }
 0xa49   :  { %4621 = vmatmul.mubr.bf16.vlgmr.msra.gmra.mrb[44].mxu0 %v4322_v56  ;;  %4661 = vmatmul.mubr.bf16.vlgmr.msra.gmra.mrb[44].mxu1 %v4324_v6 }
 0xb1c   :  { %v4898_v0 = vpop.f32.mrb[44].mxu0  ;;  %v4920_v58 = vpop.f32.mrb[44].mxu1 }
 0xb1d   :  { %v4899_v59 = vpop.f32.mrb[45].mxu0  ;;  %v4921_v60 = vpop.f32.mrb[45].mxu1 }
 0xb1e   :  { %v4900_v62 = vadd.f32 %v4899_v59, %v4898_v0  ;;  %v4922_v63 = vadd.f32 %v4921_v60, %v4920_v58  ;;  %v4901_v4 = vpop.f32.mrb[46].mxu0  ;;  %v4923_v3 = vpop.f32.mrb[46].mxu1 }
 0xb1f   :  { %v4902_v26 = vpop.f32.mrb[47].mxu0  ;;  %v4924_v5 = vpop.f32.mrb[47].mxu1 }
 0xb20   :  { %v4623_v7 = vadd.f32 %v4900_v62, %v4805_v61 }
 0xb22   :  { %v4663_v8 = vadd.f32 %v4922_v63, %v4623_v7 }
 0xb24   :  { %4669 = vrot.lane.b32.xlu0 %v4663_v8, %s5175_s19 }
 0xb96   :  { %v4670_v9 = vpop.permute.xlu0 %4669 }
 0xb97   :  { %v4673_v10 = vsel %vm4672_vm1, %v5620_v38, %v4670_v9 }
 0xb98   :  { %4674 = vst [vmem:[#allocation8] sm:$0xff] %v4673_v10 }
 0xb99   :  { %5156 = shalt.err (!%p5153_p0)
}
 0xb9a   :  { %s5157_s22 = scalar_lea.hbm %s5779_s13, 128 }
 0xb9b   :  { %p5158_p1 = scmp.ne.s32.totalorder %s5779_s13, %s5157_s22  ;;  %p5161_p2 = scmp.lt.u32.totalorder %s5157_s22, %s5779_s13 }
 0xb9d   :  { %p5163_p3 = pnand %p5161_p2, %p5158_p1 }
 0xb9f   :  { %5166 = shalt.err (!%p5163_p3)
}
 0xba0   :  { %4684 = dma.vmem_to_hbm [thread:$0]  %s4682_s1, 128, %s5779_s13, [#allocation4]  }
 0xba1   :  { %5171 = dma.done.wait [#allocation4], 128  }
 0xba2   :  { %5172 = vsyncadd [#allocation4], 4294967168 }
 0xba3   :  { %4688 = vsyncpa [#allocation3], 1 }
 0xba4   :  { %4689 = vsyncpa [#allocation6], 1 }
 0xba5   :  { %4690 = vsyncpa [#allocation4], 1 }

</bundles_post_ra>
